<compile_context>
chip_gen: v5e
topology: v5e:2x2
jax: 0.10.0
libtpu: 0.0.40
codegen_flags: <defaults>
</compile_context>

<pallas_src>
from functools import partial

import jax
import jax.numpy as jnp
from jax import lax
from jax.experimental import pallas as pl
from jax.experimental.pallas import tpu as pltpu

KSIZE = 7
PAD = (KSIZE - 1) // 2
LANE = 128


def _round_up(n, m):
    return (n + m - 1) // m * m


def spatial_gate_kernel(w_ref, b_ref, colmask_ref, rowmask_ref, x_ref, o_ref,
                        pooled_ref, scale_ref, q_ref, *, W, lane_tiles, hw_pad):
    # Grid: (B, phase, n_c_tiles).
    #   phase 0: channel max/sum pooling (accumulated across C tiles in pooled_ref);
    #            on the last C tile, the 7x7 conv + BN + sigmoid -> scale_ref.
    #   phase 1: out = x * scale (lane-dense stores).
    # w_ref    : SMEM (98,) f32  BN-folded conv weights (mean channel also has 1/C folded)
    # b_ref    : SMEM (1,)  f32  BN-folded bias
    # colmask_ref / rowmask_ref : VMEM (7, hw_pad) f32 per-tap validity masks
    # x_ref / o_ref : VMEM (1, tc, hw_pad)
    # pooled_ref : VMEM (2, hw_pad) f32   row 0 = channel max, row 1 = channel sum
    # scale_ref  : VMEM (1, hw_pad) f32   sigmoid(BN(conv(pool)))
    # q_ref      : VMEM (14, hw_pad) f32  per-(channel, kj) column-shifted pooled maps
    phase = pl.program_id(1)
    ci = pl.program_id(2)
    last_ci = pl.num_programs(2) - 1

    _, tc, _ = x_ref.shape
    n_full = tc // 8
    c_rem = tc % 8

    # ------------------------------- phase 0: channel pooling (+ conv on last C tile)
    @pl.when(phase == 0)
    def _pool_phase():
        @pl.when(ci == 0)
        def _init():
            pooled_ref[pl.ds(0, 1), :] = jnp.full((1, hw_pad), -jnp.inf, jnp.float32)
            pooled_ref[pl.ds(1, 1), :] = jnp.zeros((1, hw_pad), jnp.float32)

        for (l0, lt) in lane_tiles:
            # (8, lt) elementwise accumulators (VALU only); one cross-sublane reduce at end.
            def pool_body(i, carry):
                mx8, sm8 = carry
                c0 = pl.multiple_of(i * 8, 8)
                blk = x_ref[0, pl.ds(c0, 8), pl.ds(l0, lt)]
                mx8 = jnp.maximum(mx8, blk)
                sm8 = sm8 + blk.astype(jnp.float32)
                return mx8, sm8

            mx8 = jnp.full((8, lt), -jnp.inf, dtype=x_ref.dtype)
            sm8 = jnp.zeros((8, lt), dtype=jnp.float32)
            if n_full > 0:
                mx8, sm8 = lax.fori_loop(0, n_full, pool_body, (mx8, sm8), unroll=2)
            mx = jnp.max(mx8.astype(jnp.float32), axis=0, keepdims=True)
            sm = jnp.sum(sm8, axis=0, keepdims=True)
            if c_rem > 0:
                blk = x_ref[0, pl.ds(n_full * 8, c_rem), pl.ds(l0, lt)].astype(jnp.float32)
                mx = jnp.maximum(mx, jnp.max(blk, axis=0, keepdims=True))
                sm = sm + jnp.sum(blk, axis=0, keepdims=True)
            # fold into the running cross-C-tile accumulators (VMEM scratch)
            pooled_ref[pl.ds(0, 1), pl.ds(l0, lt)] = jnp.maximum(
                pooled_ref[pl.ds(0, 1), pl.ds(l0, lt)], mx)
            pooled_ref[pl.ds(1, 1), pl.ds(l0, lt)] = (
                pooled_ref[pl.ds(1, 1), pl.ds(l0, lt)] + sm)

        # ------------------ 7x7 conv (2->1 ch, zero pad 3) on the flat pooled maps
        @pl.when(ci == last_ci)
        def _conv():
            # Per-(channel, kj) column-shifted taps: 14 lane rolls (XLU), masked, staged
            # through VMEM scratch so they are never all live in vregs.
            for c in range(2):
                p = pooled_ref[pl.ds(c, 1), :]
                for kj in range(KSIZE):
                    s = kj - PAD
                    shifted = p if s == 0 else pltpu.roll(p, shift=(-s) % hw_pad, axis=1)
                    q_ref[pl.ds(c * KSIZE + kj, 1), :] = (
                        colmask_ref[pl.ds(kj, 1), :] * shifted)

            scale_ref[...] = jnp.zeros_like(scale_ref)
            for ki in range(KSIZE):
                t = jnp.zeros((1, hw_pad), jnp.float32)
                for c in range(2):
                    for kj in range(KSIZE):
                        w = w_ref[c * KSIZE * KSIZE + ki * KSIZE + kj]
                        t = t + w * q_ref[pl.ds(c * KSIZE + kj, 1), :]
                rs = (ki - PAD) * W                 # one row shift per ki
                if rs != 0:
                    t = pltpu.roll(t, shift=(-rs) % hw_pad, axis=1)
                scale_ref[...] = scale_ref[...] + rowmask_ref[pl.ds(ki, 1), :] * t
            scale_ref[...] = jax.nn.sigmoid(scale_ref[...] + b_ref[0])

    # ----------------------------------------------- phase 1: out = x * scale (gating)
    @pl.when(phase == 1)
    def _gate_phase():
        for (l0, lt) in lane_tiles:
            # hoisted per lane tile: cast + sublane-broadcast the scale row once
            srow = scale_ref[pl.ds(0, 1), pl.ds(l0, lt)].astype(o_ref.dtype)
            s8 = jnp.broadcast_to(srow, (8, lt))

            def gate_body(i, carry):
                c0 = pl.multiple_of(i * 8, 8)
                blk = x_ref[0, pl.ds(c0, 8), pl.ds(l0, lt)]
                o_ref[0, pl.ds(c0, 8), pl.ds(l0, lt)] = blk * s8
                return carry

            if n_full > 0:
                lax.fori_loop(0, n_full, gate_body, 0, unroll=2)
            if c_rem > 0:
                c0 = n_full * 8
                blk = x_ref[0, pl.ds(c0, c_rem), pl.ds(l0, lt)]
                o_ref[0, pl.ds(c0, c_rem), pl.ds(l0, lt)] = blk * s8[:c_rem, :]


def spatial_gate(x, conv_w, bn_gamma, bn_beta, bn_mean, bn_var, eps=1e-5):
    """x: (B, C, H, W); conv_w: (1, 2, 7, 7); BN params: (1,) each (eval-mode running stats)."""
    B, C, H, W = x.shape
    HW = H * W
    hw_pad = _round_up(HW, LANE)
    itemsize = jnp.dtype(x.dtype).itemsize

    # ---- fold eval-mode BatchNorm + the channel-mean 1/C into the bias-free conv ----
    a = bn_gamma.astype(jnp.float32) / jnp.sqrt(bn_var.astype(jnp.float32) + eps)   # (1,)
    bias = (bn_beta.astype(jnp.float32) - bn_mean.astype(jnp.float32) * a)          # (1,)
    w = conv_w[0].astype(jnp.float32) * a[0]                                        # (2, 7, 7)
    w = w.at[1].multiply(1.0 / C)          # mean channel: kernel consumes the channel SUM
    w_flat = w.reshape(-1)                                                          # (98,)

    # ---- per-tap validity masks for the flattened conv (column and row of the tap) ----
    idx = jnp.arange(hw_pad, dtype=jnp.int32)
    col = idx % W
    row = idx // W
    d = jnp.arange(KSIZE, dtype=jnp.int32) - PAD
    colmask = ((col[None, :] + d[:, None] >= 0) &
               (col[None, :] + d[:, None] < W)).astype(jnp.float32)     # (7, hw_pad)
    rowmask = ((row[None, :] + d[:, None] >= 0) &
               (row[None, :] + d[:, None] < H)).astype(jnp.float32)     # (7, hw_pad)

    # ---- lane-dense layout, zero-padded to a multiple of 128 lanes (pure plumbing) ----
    x3 = x.reshape(B, C, HW)
    if hw_pad != HW:
        x3 = jnp.pad(x3, ((0, 0), (0, 0), (0, hw_pad - HW)))

    # ---- lane tiles for the streaming pool / gate loops (<= ~32 KiB live per chunk) ----
    hw_tile = min(hw_pad, 1024)
    lane_tiles = [(i * hw_tile, hw_tile) for i in range(hw_pad // hw_tile)]
    if hw_pad % hw_tile:
        lane_tiles.append((hw_pad - hw_pad % hw_tile, hw_pad % hw_tile))
    lane_tiles = tuple(lane_tiles)

    # ---- C tiling: full slab when it fits the chip's VMEM, else tile C (v7x: 64 MiB) ----
    try:
        vmem_cap = int(getattr(pltpu.get_tpu_info(), "vmem_capacity_bytes", 64 << 20))
    except Exception:
        vmem_cap = 64 << 20                      # conservative fallback (v7x per-core VMEM)
    budget = vmem_cap - (8 << 20)                # headroom for Mosaic internals

    fixed = (17 + 28) * hw_pad * 4 + (2 << 20)   # scratch (pooled+scale+q) + masks + margin

    def footprint(tc_):
        return 2 * 2 * tc_ * hw_pad * itemsize + fixed   # double-buffered in + out blocks

    tc = C
    if footprint(C) > budget:
        for cand in range((C // 8) * 8, 0, -8):
            if C % cand == 0 and footprint(cand) <= budget:
                tc = cand
                break
        # TODO(synk): if C has no multiple-of-8 divisor that fits, this stays full-slab;
        # a ragged last C tile would cover that corner.
    n_c_tiles = C // tc
    vmem_limit = int(min(budget, max(footprint(tc), 32 << 20)))

    kernel = partial(spatial_gate_kernel, W=W, lane_tiles=lane_tiles, hw_pad=hw_pad)

    x_spec = pl.BlockSpec((1, tc, hw_pad), lambda b, ph, ci: (b, ci, 0))
    # Output block index is pinned during the pool phase (ph=0) so the only HBM writebacks
    # are the gate phase's fully-written blocks; with a single C tile the x block index is
    # also unchanged across phases, so x is fetched once per batch element.
    o_spec = pl.BlockSpec((1, tc, hw_pad), lambda b, ph, ci: (b, ci * ph, 0))
    mask_spec = pl.BlockSpec((KSIZE, hw_pad), lambda b, ph, ci: (0, 0))
    smem_spec = pl.BlockSpec(memory_space=pltpu.MemorySpace.SMEM)

    out3 = pl.pallas_call(
        kernel,
        out_shape=jax.ShapeDtypeStruct((B, C, hw_pad), x.dtype),
        grid_spec=pltpu.PrefetchScalarGridSpec(
            num_scalar_prefetch=0,
            grid=(B, 2, n_c_tiles),
            in_specs=[smem_spec, smem_spec, mask_spec, mask_spec, x_spec],
            out_specs=o_spec,
            scratch_shapes=[
                pltpu.VMEM((2, hw_pad), jnp.float32),            # pooled max / sum
                pltpu.VMEM((1, hw_pad), jnp.float32),            # sigmoid(conv) scale
                pltpu.VMEM((2 * KSIZE, hw_pad), jnp.float32),    # column-shifted conv taps
            ],
        ),
        compiler_params=pltpu.CompilerParams(
            dimension_semantics=("parallel", "arbitrary", "arbitrary"),
            vmem_limit_bytes=vmem_limit,
        ),
    )(w_flat, bias, colmask, rowmask, x3)

    out = out3[..., :HW] if hw_pad != HW else out3
    return out.reshape(B, C, H, W)


def spatial_gate_reference(x, conv_w, bn_gamma, bn_beta, bn_mean, bn_var, eps=1e-5):
    pooled = jnp.concatenate(
        [jnp.max(x, axis=1, keepdims=True), jnp.mean(x, axis=1, keepdims=True)], axis=1)
    y = lax.conv_general_dilated(
        pooled, conv_w, window_strides=(1, 1), padding=[(PAD, PAD), (PAD, PAD)],
        dimension_numbers=("NCHW", "OIHW", "NCHW"))
    g = bn_gamma.reshape(1, -1, 1, 1)
    bb = bn_beta.reshape(1, -1, 1, 1)
    m = bn_mean.reshape(1, -1, 1, 1)
    v = bn_var.reshape(1, -1, 1, 1)
    y = g * (y - m) / jnp.sqrt(v + eps) + bb
    return x * jax.nn.sigmoid(y)


if __name__ == "__main__":
    key = jax.random.PRNGKey(0)
    kx, kw, kx2 = jax.random.split(key, 3)

    # Deterministic synthetic parameters (shapes from the module's __init__).
    conv_w = (jax.random.normal(kw, (1, 2, KSIZE, KSIZE), dtype=jnp.float32) * 0.1)
    bn_gamma = jnp.array([0.9], dtype=jnp.float32)
    bn_beta = jnp.array([0.1], dtype=jnp.float32)
    bn_mean = jnp.array([0.05], dtype=jnp.float32)   # eval-mode running stats
    bn_var = jnp.array([1.2], dtype=jnp.float32)

    # Case 1: lane-aligned spatial map (H*W multiple of 128).
    x1 = jax.random.normal(kx, (2, 4, 16, 16), dtype=jnp.float32)
    out1 = jax.block_until_ready(spatial_gate(x1, conv_w, bn_gamma, bn_beta, bn_mean, bn_var))
    ref1 = spatial_gate_reference(x1, conv_w, bn_gamma, bn_beta, bn_mean, bn_var)
    assert out1.shape == x1.shape and out1.dtype == x1.dtype
    assert jnp.allclose(out1, ref1, atol=1e-5, rtol=1e-5), "case1 mismatch vs JAX reference"

    # Case 2: non-aligned spatial map (exercises lane padding + row/col validity masks).
    x2 = jax.random.normal(kx2, (1, 12, 10, 10), dtype=jnp.float32)
    out2 = jax.block_until_ready(spatial_gate(x2, conv_w, bn_gamma, bn_beta, bn_mean, bn_var))
    ref2 = spatial_gate_reference(x2, conv_w, bn_gamma, bn_beta, bn_mean, bn_var)
    assert out2.shape == x2.shape and out2.dtype == x2.dtype
    assert jnp.allclose(out2, ref2, atol=1e-5, rtol=1e-5), "case2 mismatch vs JAX reference"

    print("KERNEL_OK")
</pallas_src>

<mosaic_0001>
module attributes {stable_mosaic.version = 11 : i64} {
  func.func @spatial_gate_kernel(%arg0: i32, %arg1: i32, %arg2: i32, %arg3: memref<98xf32, #tpu.memory_space<smem>>, %arg4: memref<1xf32, #tpu.memory_space<smem>>, %arg5: memref<7x256xf32, #tpu.memory_space<vmem>>, %arg6: memref<7x256xf32, #tpu.memory_space<vmem>>, %arg7: memref<1x4x256xf32, #tpu.memory_space<vmem>>, %arg8: memref<1x4x256xf32, #tpu.memory_space<vmem>>, %arg9: memref<2x256xf32, #tpu.memory_space<vmem>>, %arg10: memref<1x256xf32, #tpu.memory_space<vmem>>, %arg11: memref<14x256xf32, #tpu.memory_space<vmem>>) attributes {dimension_semantics = [#tpu.dimension_semantics<parallel>, #tpu.dimension_semantics<arbitrary>, #tpu.dimension_semantics<arbitrary>], iteration_bounds = array<i64: 2, 2, 1>, scalar_prefetch = 0 : i64, scratch_operands = 3 : i64, tpu.core_type = #tpu.core_type<tc>, window_params = [{transform_indices = @transform_0, window_bounds = array<i64: 98>}, {transform_indices = @transform_1, window_bounds = array<i64: 1>}, {pipeline_mode = #tpu.pipeline_mode<synchronous>, transform_indices = @transform_2, window_bounds = array<i64: 7, 256>}, {pipeline_mode = #tpu.pipeline_mode<synchronous>, transform_indices = @transform_3, window_bounds = array<i64: 7, 256>}, {transform_indices = @transform_4, window_bounds = array<i64: 1, 4, 256>}, {transform_indices = @transform_5, window_bounds = array<i64: 1, 4, 256>}]} {
    %c0_i32 = arith.constant 0 : i32
    %0 = arith.cmpi eq, %arg1, %c0_i32 : i32
    %1 = arith.extui %0 : i1 to i32
    %c0_i32_0 = arith.constant 0 : i32
    %2 = arith.cmpi ne, %1, %c0_i32_0 : i32
    scf.if %2 {
      %c0_i32_2 = arith.constant 0 : i32
      %6 = arith.cmpi eq, %arg2, %c0_i32_2 : i32
      %7 = arith.extui %6 : i1 to i32
      %c0_i32_3 = arith.constant 0 : i32
      %8 = arith.cmpi ne, %7, %c0_i32_3 : i32
      scf.if %8 {
        %cst_20 = arith.constant 0xFF800000 : f32
        %32 = vector.broadcast %cst_20 : f32 to vector<1x256xf32>
        %c0_21 = arith.constant 0 : index
        %c0_22 = arith.constant 0 : index
        %33 = vector.load %arg9[%c0_21, %c0_22] : memref<2x256xf32, #tpu.memory_space<vmem>>, vector<1x256xf32>
        tpu.vector_store %arg9[%c0_21, %c0_22], %32 {strides = array<i32>} : memref<2x256xf32, #tpu.memory_space<vmem>>, vector<1x256xf32>,
        %cst_23 = arith.constant 0.000000e+00 : f32
        %34 = vector.broadcast %cst_23 : f32 to vector<1x256xf32>
        %c1_24 = arith.constant 1 : index
        %c0_25 = arith.constant 0 : index
        %35 = vector.load %arg9[%c1_24, %c0_25] : memref<2x256xf32, #tpu.memory_space<vmem>>, vector<1x256xf32>
        tpu.vector_store %arg9[%c1_24, %c0_25], %34 {strides = array<i32>} : memref<2x256xf32, #tpu.memory_space<vmem>>, vector<1x256xf32>,
      } else {
      }
      %cst = arith.constant 0xFF800000 : f32
      %9 = vector.broadcast %cst : f32 to vector<8x256xf32>
      %cst_4 = arith.constant 0.000000e+00 : f32
      %10 = vector.broadcast %cst_4 : f32 to vector<8x256xf32>
      %cst_5 = arith.constant dense<0xFF800000> : vector<256xf32>
      %11 = vector.multi_reduction <maximumf>, %9, %cst_5 [0] : vector<8x256xf32> to vector<256xf32>
      %12 = vector.shape_cast %11 : vector<256xf32> to vector<1x256xf32>
      %cst_6 = arith.constant dense<0.000000e+00> : vector<256xf32>
      %13 = vector.multi_reduction <add>, %10, %cst_6 [0] : vector<8x256xf32> to vector<256xf32>
      %14 = vector.shape_cast %13 : vector<256xf32> to vector<1x256xf32>
      %c0 = arith.constant 0 : index
      %c0_7 = arith.constant 0 : index
      %c0_8 = arith.constant 0 : index
      %15 = vector.load %arg7[%c0, %c0_7, %c0_8] : memref<1x4x256xf32, #tpu.memory_space<vmem>>, vector<1x4x256xf32>
      %16 = vector.shape_cast %15 : vector<1x4x256xf32> to vector<4x256xf32>
      %cst_9 = arith.constant dense<0xFF800000> : vector<256xf32>
      %17 = vector.multi_reduction <maximumf>, %16, %cst_9 [0] : vector<4x256xf32> to vector<256xf32>
      %18 = vector.shape_cast %17 : vector<256xf32> to vector<1x256xf32>
      %19 = arith.maximumf %12, %18 : vector<1x256xf32>
      %cst_10 = arith.constant dense<0.000000e+00> : vector<256xf32>
      %20 = vector.multi_reduction <add>, %16, %cst_10 [0] : vector<4x256xf32> to vector<256xf32>
      %21 = vector.shape_cast %20 : vector<256xf32> to vector<1x256xf32>
      %22 = arith.addf %14, %21 : vector<1x256xf32>
      %c0_11 = arith.constant 0 : index
      %c0_12 = arith.constant 0 : index
      %23 = vector.load %arg9[%c0_11, %c0_12] : memref<2x256xf32, #tpu.memory_space<vmem>>, vector<1x256xf32>
      %24 = arith.maximumf %23, %19 : vector<1x256xf32>
      %c0_13 = arith.constant 0 : index
      %c0_14 = arith.constant 0 : index
      %25 = vector.load %arg9[%c0_13, %c0_14] : memref<2x256xf32, #tpu.memory_space<vmem>>, vector<1x256xf32>
      tpu.vector_store %arg9[%c0_13, %c0_14], %24 {strides = array<i32>} : memref<2x256xf32, #tpu.memory_space<vmem>>, vector<1x256xf32>,
      %c1 = arith.constant 1 : index
      %c0_15 = arith.constant 0 : index
      %26 = vector.load %arg9[%c1, %c0_15] : memref<2x256xf32, #tpu.memory_space<vmem>>, vector<1x256xf32>
      %27 = arith.addf %26, %22 : vector<1x256xf32>
      %c1_16 = arith.constant 1 : index
      %c0_17 = arith.constant 0 : index
      %28 = vector.load %arg9[%c1_16, %c0_17] : memref<2x256xf32, #tpu.memory_space<vmem>>, vector<1x256xf32>
      tpu.vector_store %arg9[%c1_16, %c0_17], %27 {strides = array<i32>} : memref<2x256xf32, #tpu.memory_space<vmem>>, vector<1x256xf32>,
      %c0_i32_18 = arith.constant 0 : i32
      %29 = arith.cmpi eq, %arg2, %c0_i32_18 : i32
      %30 = arith.extui %29 : i1 to i32
      %c0_i32_19 = arith.constant 0 : i32
      %31 = arith.cmpi ne, %30, %c0_i32_19 : i32
      scf.if %31 {
        %c0_20 = arith.constant 0 : index
        %c0_21 = arith.constant 0 : index
        %32 = vector.load %arg9[%c0_20, %c0_21] : memref<2x256xf32, #tpu.memory_space<vmem>>, vector<1x256xf32>
        %c3_i32 = arith.constant 3 : i32
        %33 = tpu.dynamic_rotate %32 by %c3_i32 dim 1 : vector<1x256xf32>, i32 -> vector<1x256xf32>
        %c0_22 = arith.constant 0 : index
        %c0_23 = arith.constant 0 : index
        %34 = vector.load %arg5[%c0_22, %c0_23] : memref<7x256xf32, #tpu.memory_space<vmem>>, vector<1x256xf32>
        %35 = arith.mulf %34, %33 : vector<1x256xf32>
        %c0_24 = arith.constant 0 : index
        %c0_25 = arith.constant 0 : index
        %36 = vector.load %arg11[%c0_24, %c0_25] : memref<14x256xf32, #tpu.memory_space<vmem>>, vector<1x256xf32>
        tpu.vector_store %arg11[%c0_24, %c0_25], %35 {strides = array<i32>} : memref<14x256xf32, #tpu.memory_space<vmem>>, vector<1x256xf32>,
        %c2_i32 = arith.constant 2 : i32
        %37 = tpu.dynamic_rotate %32 by %c2_i32 dim 1 : vector<1x256xf32>, i32 -> vector<1x256xf32>
        %c1_26 = arith.constant 1 : index
        %c0_27 = arith.constant 0 : index
        %38 = vector.load %arg5[%c1_26, %c0_27] : memref<7x256xf32, #tpu.memory_space<vmem>>, vector<1x256xf32>
        %39 = arith.mulf %38, %37 : vector<1x256xf32>
        %c1_28 = arith.constant 1 : index
        %c0_29 = arith.constant 0 : index
        %40 = vector.load %arg11[%c1_28, %c0_29] : memref<14x256xf32, #tpu.memory_space<vmem>>, vector<1x256xf32>
        tpu.vector_store %arg11[%c1_28, %c0_29], %39 {strides = array<i32>} : memref<14x256xf32, #tpu.memory_space<vmem>>, vector<1x256xf32>,
        %c1_i32_30 = arith.constant 1 : i32
        %41 = tpu.dynamic_rotate %32 by %c1_i32_30 dim 1 : vector<1x256xf32>, i32 -> vector<1x256xf32>
        %c2 = arith.constant 2 : index
        %c0_31 = arith.constant 0 : index
        %42 = vector.load %arg5[%c2, %c0_31] : memref<7x256xf32, #tpu.memory_space<vmem>>, vector<1x256xf32>
        %43 = arith.mulf %42, %41 : vector<1x256xf32>
        %c2_32 = arith.constant 2 : index
        %c0_33 = arith.constant 0 : index
        %44 = vector.load %arg11[%c2_32, %c0_33] : memref<14x256xf32, #tpu.memory_space<vmem>>, vector<1x256xf32>
        tpu.vector_store %arg11[%c2_32, %c0_33], %43 {strides = array<i32>} : memref<14x256xf32, #tpu.memory_space<vmem>>, vector<1x256xf32>,
        %c3 = arith.constant 3 : index
        %c0_34 = arith.constant 0 : index
        %45 = vector.load %arg5[%c3, %c0_34] : memref<7x256xf32, #tpu.memory_space<vmem>>, vector<1x256xf32>
        %46 = arith.mulf %45, %32 : vector<1x256xf32>
        %c3_35 = arith.constant 3 : index
        %c0_36 = arith.constant 0 : index
        %47 = vector.load %arg11[%c3_35, %c0_36] : memref<14x256xf32, #tpu.memory_space<vmem>>, vector<1x256xf32>
        tpu.vector_store %arg11[%c3_35, %c0_36], %46 {strides = array<i32>} : memref<14x256xf32, #tpu.memory_space<vmem>>, vector<1x256xf32>,
        %c255_i32 = arith.constant 255 : i32
        %48 = tpu.dynamic_rotate %32 by %c255_i32 dim 1 : vector<1x256xf32>, i32 -> vector<1x256xf32>
        %c4 = arith.constant 4 : index
        %c0_37 = arith.constant 0 : index
        %49 = vector.load %arg5[%c4, %c0_37] : memref<7x256xf32, #tpu.memory_space<vmem>>, vector<1x256xf32>
        %50 = arith.mulf %49, %48 : vector<1x256xf32>
        %c4_38 = arith.constant 4 : index
        %c0_39 = arith.constant 0 : index
        %51 = vector.load %arg11[%c4_38, %c0_39] : memref<14x256xf32, #tpu.memory_space<vmem>>, vector<1x256xf32>
        tpu.vector_store %arg11[%c4_38, %c0_39], %50 {strides = array<i32>} : memref<14x256xf32, #tpu.memory_space<vmem>>, vector<1x256xf32>,
        %c254_i32 = arith.constant 254 : i32
        %52 = tpu.dynamic_rotate %32 by %c254_i32 dim 1 : vector<1x256xf32>, i32 -> vector<1x256xf32>
        %c5 = arith.constant 5 : index
        %c0_40 = arith.constant 0 : index
        %53 = vector.load %arg5[%c5, %c0_40] : memref<7x256xf32, #tpu.memory_space<vmem>>, vector<1x256xf32>
        %54 = arith.mulf %53, %52 : vector<1x256xf32>
        %c5_41 = arith.constant 5 : index
        %c0_42 = arith.constant 0 : index
        %55 = vector.load %arg11[%c5_41, %c0_42] : memref<14x256xf32, #tpu.memory_space<vmem>>, vector<1x256xf32>
        tpu.vector_store %arg11[%c5_41, %c0_42], %54 {strides = array<i32>} : memref<14x256xf32, #tpu.memory_space<vmem>>, vector<1x256xf32>,
        %c253_i32 = arith.constant 253 : i32
        %56 = tpu.dynamic_rotate %32 by %c253_i32 dim 1 : vector<1x256xf32>, i32 -> vector<1x256xf32>
        %c6 = arith.constant 6 : index
        %c0_43 = arith.constant 0 : index
        %57 = vector.load %arg5[%c6, %c0_43] : memref<7x256xf32, #tpu.memory_space<vmem>>, vector<1x256xf32>
        %58 = arith.mulf %57, %56 : vector<1x256xf32>
        %c6_44 = arith.constant 6 : index
        %c0_45 = arith.constant 0 : index
        %59 = vector.load %arg11[%c6_44, %c0_45] : memref<14x256xf32, #tpu.memory_space<vmem>>, vector<1x256xf32>
        tpu.vector_store %arg11[%c6_44, %c0_45], %58 {strides = array<i32>} : memref<14x256xf32, #tpu.memory_space<vmem>>, vector<1x256xf32>,
        %c1_46 = arith.constant 1 : index
        %c0_47 = arith.constant 0 : index
        %60 = vector.load %arg9[%c1_46, %c0_47] : memref<2x256xf32, #tpu.memory_space<vmem>>, vector<1x256xf32>
        %c3_i32_48 = arith.constant 3 : i32
        %61 = tpu.dynamic_rotate %60 by %c3_i32_48 dim 1 : vector<1x256xf32>, i32 -> vector<1x256xf32>
        %c0_49 = arith.constant 0 : index
        %c0_50 = arith.constant 0 : index
        %62 = vector.load %arg5[%c0_49, %c0_50] : memref<7x256xf32, #tpu.memory_space<vmem>>, vector<1x256xf32>
        %63 = arith.mulf %62, %61 : vector<1x256xf32>
        %c7 = arith.constant 7 : index
        %c0_51 = arith.constant 0 : index
        %64 = vector.load %arg11[%c7, %c0_51] : memref<14x256xf32, #tpu.memory_space<vmem>>, vector<1x256xf32>
        tpu.vector_store %arg11[%c7, %c0_51], %63 {strides = array<i32>} : memref<14x256xf32, #tpu.memory_space<vmem>>, vector<1x256xf32>,
        %c2_i32_52 = arith.constant 2 : i32
        %65 = tpu.dynamic_rotate %60 by %c2_i32_52 dim 1 : vector<1x256xf32>, i32 -> vector<1x256xf32>
        %c1_53 = arith.constant 1 : index
        %c0_54 = arith.constant 0 : index
        %66 = vector.load %arg5[%c1_53, %c0_54] : memref<7x256xf32, #tpu.memory_space<vmem>>, vector<1x256xf32>
        %67 = arith.mulf %66, %65 : vector<1x256xf32>
        %c8 = arith.constant 8 : index
        %c0_55 = arith.constant 0 : index
        %68 = vector.load %arg11[%c8, %c0_55] : memref<14x256xf32, #tpu.memory_space<vmem>>, vector<1x256xf32>
        tpu.vector_store %arg11[%c8, %c0_55], %67 {strides = array<i32>} : memref<14x256xf32, #tpu.memory_space<vmem>>, vector<1x256xf32>,
        %c1_i32_56 = arith.constant 1 : i32
        %69 = tpu.dynamic_rotate %60 by %c1_i32_56 dim 1 : vector<1x256xf32>, i32 -> vector<1x256xf32>
        %c2_57 = arith.constant 2 : index
        %c0_58 = arith.constant 0 : index
        %70 = vector.load %arg5[%c2_57, %c0_58] : memref<7x256xf32, #tpu.memory_space<vmem>>, vector<1x256xf32>
        %71 = arith.mulf %70, %69 : vector<1x256xf32>
        %c9 = arith.constant 9 : index
        %c0_59 = arith.constant 0 : index
        %72 = vector.load %arg11[%c9, %c0_59] : memref<14x256xf32, #tpu.memory_space<vmem>>, vector<1x256xf32>
        tpu.vector_store %arg11[%c9, %c0_59], %71 {strides = array<i32>} : memref<14x256xf32, #tpu.memory_space<vmem>>, vector<1x256xf32>,
        %c3_60 = arith.constant 3 : index
        %c0_61 = arith.constant 0 : index
        %73 = vector.load %arg5[%c3_60, %c0_61] : memref<7x256xf32, #tpu.memory_space<vmem>>, vector<1x256xf32>
        %74 = arith.mulf %73, %60 : vector<1x256xf32>
        %c10 = arith.constant 10 : index
        %c0_62 = arith.constant 0 : index
        %75 = vector.load %arg11[%c10, %c0_62] : memref<14x256xf32, #tpu.memory_space<vmem>>, vector<1x256xf32>
        tpu.vector_store %arg11[%c10, %c0_62], %74 {strides = array<i32>} : memref<14x256xf32, #tpu.memory_space<vmem>>, vector<1x256xf32>,
        %c255_i32_63 = arith.constant 255 : i32
        %76 = tpu.dynamic_rotate %60 by %c255_i32_63 dim 1 : vector<1x256xf32>, i32 -> vector<1x256xf32>
        %c4_64 = arith.constant 4 : index
        %c0_65 = arith.constant 0 : index
        %77 = vector.load %arg5[%c4_64, %c0_65] : memref<7x256xf32, #tpu.memory_space<vmem>>, vector<1x256xf32>
        %78 = arith.mulf %77, %76 : vector<1x256xf32>
        %c11 = arith.constant 11 : index
        %c0_66 = arith.constant 0 : index
        %79 = vector.load %arg11[%c11, %c0_66] : memref<14x256xf32, #tpu.memory_space<vmem>>, vector<1x256xf32>
        tpu.vector_store %arg11[%c11, %c0_66], %78 {strides = array<i32>} : memref<14x256xf32, #tpu.memory_space<vmem>>, vector<1x256xf32>,
        %c254_i32_67 = arith.constant 254 : i32
        %80 = tpu.dynamic_rotate %60 by %c254_i32_67 dim 1 : vector<1x256xf32>, i32 -> vector<1x256xf32>
        %c5_68 = arith.constant 5 : index
        %c0_69 = arith.constant 0 : index
        %81 = vector.load %arg5[%c5_68, %c0_69] : memref<7x256xf32, #tpu.memory_space<vmem>>, vector<1x256xf32>
        %82 = arith.mulf %81, %80 : vector<1x256xf32>
        %c12 = arith.constant 12 : index
        %c0_70 = arith.constant 0 : index
        %83 = vector.load %arg11[%c12, %c0_70] : memref<14x256xf32, #tpu.memory_space<vmem>>, vector<1x256xf32>
        tpu.vector_store %arg11[%c12, %c0_70], %82 {strides = array<i32>} : memref<14x256xf32, #tpu.memory_space<vmem>>, vector<1x256xf32>,
        %c253_i32_71 = arith.constant 253 : i32
        %84 = tpu.dynamic_rotate %60 by %c253_i32_71 dim 1 : vector<1x256xf32>, i32 -> vector<1x256xf32>
        %c6_72 = arith.constant 6 : index
        %c0_73 = arith.constant 0 : index
        %85 = vector.load %arg5[%c6_72, %c0_73] : memref<7x256xf32, #tpu.memory_space<vmem>>, vector<1x256xf32>
        %86 = arith.mulf %85, %84 : vector<1x256xf32>
        %c13 = arith.constant 13 : index
        %c0_74 = arith.constant 0 : index
        %87 = vector.load %arg11[%c13, %c0_74] : memref<14x256xf32, #tpu.memory_space<vmem>>, vector<1x256xf32>
        tpu.vector_store %arg11[%c13, %c0_74], %86 {strides = array<i32>} : memref<14x256xf32, #tpu.memory_space<vmem>>, vector<1x256xf32>,
        %cst_75 = arith.constant 0.000000e+00 : f32
        %88 = vector.broadcast %cst_75 : f32 to vector<1x256xf32>
        %c0_76 = arith.constant 0 : index
        %c0_77 = arith.constant 0 : index
        %89 = vector.load %arg10[%c0_76, %c0_77] : memref<1x256xf32, #tpu.memory_space<vmem>>, vector<1x256xf32>
        tpu.vector_store %arg10[%c0_76, %c0_77], %88 {strides = array<i32>} : memref<1x256xf32, #tpu.memory_space<vmem>>, vector<1x256xf32>,
        %cst_78 = arith.constant 0.000000e+00 : f32
        %90 = vector.broadcast %cst_78 : f32 to vector<1x256xf32>
        %c0_79 = arith.constant 0 : index
        %91 = memref.load %arg3[%c0_79] : memref<98xf32, #tpu.memory_space<smem>>
        %c0_80 = arith.constant 0 : index
        %c0_81 = arith.constant 0 : index
        %92 = vector.load %arg11[%c0_80, %c0_81] : memref<14x256xf32, #tpu.memory_space<vmem>>, vector<1x256xf32>
        %93 = vector.broadcast %91 : f32 to vector<1x256xf32>
        %94 = arith.mulf %93, %92 : vector<1x256xf32>
        %95 = arith.addf %90, %94 : vector<1x256xf32>
        %c1_82 = arith.constant 1 : index
        %96 = memref.load %arg3[%c1_82] : memref<98xf32, #tpu.memory_space<smem>>
        %c1_83 = arith.constant 1 : index
        %c0_84 = arith.constant 0 : index
        %97 = vector.load %arg11[%c1_83, %c0_84] : memref<14x256xf32, #tpu.memory_space<vmem>>, vector<1x256xf32>
        %98 = vector.broadcast %96 : f32 to vector<1x256xf32>
        %99 = arith.mulf %98, %97 : vector<1x256xf32>
        %100 = arith.addf %95, %99 : vector<1x256xf32>
        %c2_85 = arith.constant 2 : index
        %101 = memref.load %arg3[%c2_85] : memref<98xf32, #tpu.memory_space<smem>>
        %c2_86 = arith.constant 2 : index
        %c0_87 = arith.constant 0 : index
        %102 = vector.load %arg11[%c2_86, %c0_87] : memref<14x256xf32, #tpu.memory_space<vmem>>, vector<1x256xf32>
        %103 = vector.broadcast %101 : f32 to vector<1x256xf32>
        %104 = arith.mulf %103, %102 : vector<1x256xf32>
        %105 = arith.addf %100, %104 : vector<1x256xf32>
        %c3_88 = arith.constant 3 : index
        %106 = memref.load %arg3[%c3_88] : memref<98xf32, #tpu.memory_space<smem>>
        %c3_89 = arith.constant 3 : index
        %c0_90 = arith.constant 0 : index
        %107 = vector.load %arg11[%c3_89, %c0_90] : memref<14x256xf32, #tpu.memory_space<vmem>>, vector<1x256xf32>
        %108 = vector.broadcast %106 : f32 to vector<1x256xf32>
        %109 = arith.mulf %108, %107 : vector<1x256xf32>
        %110 = arith.addf %105, %109 : vector<1x256xf32>
        %c4_91 = arith.constant 4 : index
        %111 = memref.load %arg3[%c4_91] : memref<98xf32, #tpu.memory_space<smem>>
        %c4_92 = arith.constant 4 : index
        %c0_93 = arith.constant 0 : index
        %112 = vector.load %arg11[%c4_92, %c0_93] : memref<14x256xf32, #tpu.memory_space<vmem>>, vector<1x256xf32>
        %113 = vector.broadcast %111 : f32 to vector<1x256xf32>
        %114 = arith.mulf %113, %112 : vector<1x256xf32>
        %115 = arith.addf %110, %114 : vector<1x256xf32>
        %c5_94 = arith.constant 5 : index
        %116 = memref.load %arg3[%c5_94] : memref<98xf32, #tpu.memory_space<smem>>
        %c5_95 = arith.constant 5 : index
        %c0_96 = arith.constant 0 : index
        %117 = vector.load %arg11[%c5_95, %c0_96] : memref<14x256xf32, #tpu.memory_space<vmem>>, vector<1x256xf32>
        %118 = vector.broadcast %116 : f32 to vector<1x256xf32>
        %119 = arith.mulf %118, %117 : vector<1x256xf32>
        %120 = arith.addf %115, %119 : vector<1x256xf32>
        %c6_97 = arith.constant 6 : index
        %121 = memref.load %arg3[%c6_97] : memref<98xf32, #tpu.memory_space<smem>>
        %c6_98 = arith.constant 6 : index
        %c0_99 = arith.constant 0 : index
        %122 = vector.load %arg11[%c6_98, %c0_99] : memref<14x256xf32, #tpu.memory_space<vmem>>, vector<1x256xf32>
        %123 = vector.broadcast %121 : f32 to vector<1x256xf32>
        %124 = arith.mulf %123, %122 : vector<1x256xf32>
        %125 = arith.addf %120, %124 : vector<1x256xf32>
        %c49 = arith.constant 49 : index
        %126 = memref.load %arg3[%c49] : memref<98xf32, #tpu.memory_space<smem>>
        %c7_100 = arith.constant 7 : index
        %c0_101 = arith.constant 0 : index
        %127 = vector.load %arg11[%c7_100, %c0_101] : memref<14x256xf32, #tpu.memory_space<vmem>>, vector<1x256xf32>
        %128 = vector.broadcast %126 : f32 to vector<1x256xf32>
        %129 = arith.mulf %128, %127 : vector<1x256xf32>
        %130 = arith.addf %125, %129 : vector<1x256xf32>
        %c50 = arith.constant 50 : index
        %131 = memref.load %arg3[%c50] : memref<98xf32, #tpu.memory_space<smem>>
        %c8_102 = arith.constant 8 : index
        %c0_103 = arith.constant 0 : index
        %132 = vector.load %arg11[%c8_102, %c0_103] : memref<14x256xf32, #tpu.memory_space<vmem>>, vector<1x256xf32>
        %133 = vector.broadcast %131 : f32 to vector<1x256xf32>
        %134 = arith.mulf %133, %132 : vector<1x256xf32>
        %135 = arith.addf %130, %134 : vector<1x256xf32>
        %c51 = arith.constant 51 : index
        %136 = memref.load %arg3[%c51] : memref<98xf32, #tpu.memory_space<smem>>
        %c9_104 = arith.constant 9 : index
        %c0_105 = arith.constant 0 : index
        %137 = vector.load %arg11[%c9_104, %c0_105] : memref<14x256xf32, #tpu.memory_space<vmem>>, vector<1x256xf32>
        %138 = vector.broadcast %136 : f32 to vector<1x256xf32>
        %139 = arith.mulf %138, %137 : vector<1x256xf32>
        %140 = arith.addf %135, %139 : vector<1x256xf32>
        %c52 = arith.constant 52 : index
        %141 = memref.load %arg3[%c52] : memref<98xf32, #tpu.memory_space<smem>>
        %c10_106 = arith.constant 10 : index
        %c0_107 = arith.constant 0 : index
        %142 = vector.load %arg11[%c10_106, %c0_107] : memref<14x256xf32, #tpu.memory_space<vmem>>, vector<1x256xf32>
        %143 = vector.broadcast %141 : f32 to vector<1x256xf32>
        %144 = arith.mulf %143, %142 : vector<1x256xf32>
        %145 = arith.addf %140, %144 : vector<1x256xf32>
        %c53 = arith.constant 53 : index
        %146 = memref.load %arg3[%c53] : memref<98xf32, #tpu.memory_space<smem>>
        %c11_108 = arith.constant 11 : index
        %c0_109 = arith.constant 0 : index
        %147 = vector.load %arg11[%c11_108, %c0_109] : memref<14x256xf32, #tpu.memory_space<vmem>>, vector<1x256xf32>
        %148 = vector.broadcast %146 : f32 to vector<1x256xf32>
        %149 = arith.mulf %148, %147 : vector<1x256xf32>
        %150 = arith.addf %145, %149 : vector<1x256xf32>
        %c54 = arith.constant 54 : index
        %151 = memref.load %arg3[%c54] : memref<98xf32, #tpu.memory_space<smem>>
        %c12_110 = arith.constant 12 : index
        %c0_111 = arith.constant 0 : index
        %152 = vector.load %arg11[%c12_110, %c0_111] : memref<14x256xf32, #tpu.memory_space<vmem>>, vector<1x256xf32>
        %153 = vector.broadcast %151 : f32 to vector<1x256xf32>
        %154 = arith.mulf %153, %152 : vector<1x256xf32>
        %155 = arith.addf %150, %154 : vector<1x256xf32>
        %c55 = arith.constant 55 : index
        %156 = memref.load %arg3[%c55] : memref<98xf32, #tpu.memory_space<smem>>
        %c13_112 = arith.constant 13 : index
        %c0_113 = arith.constant 0 : index
        %157 = vector.load %arg11[%c13_112, %c0_113] : memref<14x256xf32, #tpu.memory_space<vmem>>, vector<1x256xf32>
        %158 = vector.broadcast %156 : f32 to vector<1x256xf32>
        %159 = arith.mulf %158, %157 : vector<1x256xf32>
        %160 = arith.addf %155, %159 : vector<1x256xf32>
        %c48_i32 = arith.constant 48 : i32
        %161 = tpu.dynamic_rotate %160 by %c48_i32 dim 1 : vector<1x256xf32>, i32 -> vector<1x256xf32>
        %c0_114 = arith.constant 0 : index
        %c0_115 = arith.constant 0 : index
        %162 = vector.load %arg10[%c0_114, %c0_115] : memref<1x256xf32, #tpu.memory_space<vmem>>, vector<1x256xf32>
        %c0_116 = arith.constant 0 : index
        %c0_117 = arith.constant 0 : index
        %163 = vector.load %arg6[%c0_116, %c0_117] : memref<7x256xf32, #tpu.memory_space<vmem>>, vector<1x256xf32>
        %164 = arith.mulf %163, %161 : vector<1x256xf32>
        %165 = arith.addf %162, %164 : vector<1x256xf32>
        %c0_118 = arith.constant 0 : index
        %c0_119 = arith.constant 0 : index
        %166 = vector.load %arg10[%c0_118, %c0_119] : memref<1x256xf32, #tpu.memory_space<vmem>>, vector<1x256xf32>
        tpu.vector_store %arg10[%c0_118, %c0_119], %165 {strides = array<i32>} : memref<1x256xf32, #tpu.memory_space<vmem>>, vector<1x256xf32>,
        %cst_120 = arith.constant 0.000000e+00 : f32
        %167 = vector.broadcast %cst_120 : f32 to vector<1x256xf32>
        %c7_121 = arith.constant 7 : index
        %168 = memref.load %arg3[%c7_121] : memref<98xf32, #tpu.memory_space<smem>>
        %c0_122 = arith.constant 0 : index
        %c0_123 = arith.constant 0 : index
        %169 = vector.load %arg11[%c0_122, %c0_123] : memref<14x256xf32, #tpu.memory_space<vmem>>, vector<1x256xf32>
        %170 = vector.broadcast %168 : f32 to vector<1x256xf32>
        %171 = arith.mulf %170, %169 : vector<1x256xf32>
        %172 = arith.addf %167, %171 : vector<1x256xf32>
        %c8_124 = arith.constant 8 : index
        %173 = memref.load %arg3[%c8_124] : memref<98xf32, #tpu.memory_space<smem>>
        %c1_125 = arith.constant 1 : index
        %c0_126 = arith.constant 0 : index
        %174 = vector.load %arg11[%c1_125, %c0_126] : memref<14x256xf32, #tpu.memory_space<vmem>>, vector<1x256xf32>
        %175 = vector.broadcast %173 : f32 to vector<1x256xf32>
        %176 = arith.mulf %175, %174 : vector<1x256xf32>
        %177 = arith.addf %172, %176 : vector<1x256xf32>
        %c9_127 = arith.constant 9 : index
        %178 = memref.load %arg3[%c9_127] : memref<98xf32, #tpu.memory_space<smem>>
        %c2_128 = arith.constant 2 : index
        %c0_129 = arith.constant 0 : index
        %179 = vector.load %arg11[%c2_128, %c0_129] : memref<14x256xf32, #tpu.memory_space<vmem>>, vector<1x256xf32>
        %180 = vector.broadcast %178 : f32 to vector<1x256xf32>
        %181 = arith.mulf %180, %179 : vector<1x256xf32>
        %182 = arith.addf %177, %181 : vector<1x256xf32>
        %c10_130 = arith.constant 10 : index
        %183 = memref.load %arg3[%c10_130] : memref<98xf32, #tpu.memory_space<smem>>
        %c3_131 = arith.constant 3 : index
        %c0_132 = arith.constant 0 : index
        %184 = vector.load %arg11[%c3_131, %c0_132] : memref<14x256xf32, #tpu.memory_space<vmem>>, vector<1x256xf32>
        %185 = vector.broadcast %183 : f32 to vector<1x256xf32>
        %186 = arith.mulf %185, %184 : vector<1x256xf32>
        %187 = arith.addf %182, %186 : vector<1x256xf32>
        %c11_133 = arith.constant 11 : index
        %188 = memref.load %arg3[%c11_133] : memref<98xf32, #tpu.memory_space<smem>>
        %c4_134 = arith.constant 4 : index
        %c0_135 = arith.constant 0 : index
        %189 = vector.load %arg11[%c4_134, %c0_135] : memref<14x256xf32, #tpu.memory_space<vmem>>, vector<1x256xf32>
        %190 = vector.broadcast %188 : f32 to vector<1x256xf32>
        %191 = arith.mulf %190, %189 : vector<1x256xf32>
        %192 = arith.addf %187, %191 : vector<1x256xf32>
        %c12_136 = arith.constant 12 : index
        %193 = memref.load %arg3[%c12_136] : memref<98xf32, #tpu.memory_space<smem>>
        %c5_137 = arith.constant 5 : index
        %c0_138 = arith.constant 0 : index
        %194 = vector.load %arg11[%c5_137, %c0_138] : memref<14x256xf32, #tpu.memory_space<vmem>>, vector<1x256xf32>
        %195 = vector.broadcast %193 : f32 to vector<1x256xf32>
        %196 = arith.mulf %195, %194 : vector<1x256xf32>
        %197 = arith.addf %192, %196 : vector<1x256xf32>
        %c13_139 = arith.constant 13 : index
        %198 = memref.load %arg3[%c13_139] : memref<98xf32, #tpu.memory_space<smem>>
        %c6_140 = arith.constant 6 : index
        %c0_141 = arith.constant 0 : index
        %199 = vector.load %arg11[%c6_140, %c0_141] : memref<14x256xf32, #tpu.memory_space<vmem>>, vector<1x256xf32>
        %200 = vector.broadcast %198 : f32 to vector<1x256xf32>
        %201 = arith.mulf %200, %199 : vector<1x256xf32>
        %202 = arith.addf %197, %201 : vector<1x256xf32>
        %c56 = arith.constant 56 : index
        %203 = memref.load %arg3[%c56] : memref<98xf32, #tpu.memory_space<smem>>
        %c7_142 = arith.constant 7 : index
        %c0_143 = arith.constant 0 : index
        %204 = vector.load %arg11[%c7_142, %c0_143] : memref<14x256xf32, #tpu.memory_space<vmem>>, vector<1x256xf32>
        %205 = vector.broadcast %203 : f32 to vector<1x256xf32>
        %206 = arith.mulf %205, %204 : vector<1x256xf32>
        %207 = arith.addf %202, %206 : vector<1x256xf32>
        %c57 = arith.constant 57 : index
        %208 = memref.load %arg3[%c57] : memref<98xf32, #tpu.memory_space<smem>>
        %c8_144 = arith.constant 8 : index
        %c0_145 = arith.constant 0 : index
        %209 = vector.load %arg11[%c8_144, %c0_145] : memref<14x256xf32, #tpu.memory_space<vmem>>, vector<1x256xf32>
        %210 = vector.broadcast %208 : f32 to vector<1x256xf32>
        %211 = arith.mulf %210, %209 : vector<1x256xf32>
        %212 = arith.addf %207, %211 : vector<1x256xf32>
        %c58 = arith.constant 58 : index
        %213 = memref.load %arg3[%c58] : memref<98xf32, #tpu.memory_space<smem>>
        %c9_146 = arith.constant 9 : index
        %c0_147 = arith.constant 0 : index
        %214 = vector.load %arg11[%c9_146, %c0_147] : memref<14x256xf32, #tpu.memory_space<vmem>>, vector<1x256xf32>
        %215 = vector.broadcast %213 : f32 to vector<1x256xf32>
        %216 = arith.mulf %215, %214 : vector<1x256xf32>
        %217 = arith.addf %212, %216 : vector<1x256xf32>
        %c59 = arith.constant 59 : index
        %218 = memref.load %arg3[%c59] : memref<98xf32, #tpu.memory_space<smem>>
        %c10_148 = arith.constant 10 : index
        %c0_149 = arith.constant 0 : index
        %219 = vector.load %arg11[%c10_148, %c0_149] : memref<14x256xf32, #tpu.memory_space<vmem>>, vector<1x256xf32>
        %220 = vector.broadcast %218 : f32 to vector<1x256xf32>
        %221 = arith.mulf %220, %219 : vector<1x256xf32>
        %222 = arith.addf %217, %221 : vector<1x256xf32>
        %c60 = arith.constant 60 : index
        %223 = memref.load %arg3[%c60] : memref<98xf32, #tpu.memory_space<smem>>
        %c11_150 = arith.constant 11 : index
        %c0_151 = arith.constant 0 : index
        %224 = vector.load %arg11[%c11_150, %c0_151] : memref<14x256xf32, #tpu.memory_space<vmem>>, vector<1x256xf32>
        %225 = vector.broadcast %223 : f32 to vector<1x256xf32>
        %226 = arith.mulf %225, %224 : vector<1x256xf32>
        %227 = arith.addf %222, %226 : vector<1x256xf32>
        %c61 = arith.constant 61 : index
        %228 = memref.load %arg3[%c61] : memref<98xf32, #tpu.memory_space<smem>>
        %c12_152 = arith.constant 12 : index
        %c0_153 = arith.constant 0 : index
        %229 = vector.load %arg11[%c12_152, %c0_153] : memref<14x256xf32, #tpu.memory_space<vmem>>, vector<1x256xf32>
        %230 = vector.broadcast %228 : f32 to vector<1x256xf32>
        %231 = arith.mulf %230, %229 : vector<1x256xf32>
        %232 = arith.addf %227, %231 : vector<1x256xf32>
        %c62 = arith.constant 62 : index
        %233 = memref.load %arg3[%c62] : memref<98xf32, #tpu.memory_space<smem>>
        %c13_154 = arith.constant 13 : index
        %c0_155 = arith.constant 0 : index
        %234 = vector.load %arg11[%c13_154, %c0_155] : memref<14x256xf32, #tpu.memory_space<vmem>>, vector<1x256xf32>
        %235 = vector.broadcast %233 : f32 to vector<1x256xf32>
        %236 = arith.mulf %235, %234 : vector<1x256xf32>
        %237 = arith.addf %232, %236 : vector<1x256xf32>
        %c32_i32 = arith.constant 32 : i32
        %238 = tpu.dynamic_rotate %237 by %c32_i32 dim 1 : vector<1x256xf32>, i32 -> vector<1x256xf32>
        %c0_156 = arith.constant 0 : index
        %c0_157 = arith.constant 0 : index
        %239 = vector.load %arg10[%c0_156, %c0_157] : memref<1x256xf32, #tpu.memory_space<vmem>>, vector<1x256xf32>
        %c1_158 = arith.constant 1 : index
        %c0_159 = arith.constant 0 : index
        %240 = vector.load %arg6[%c1_158, %c0_159] : memref<7x256xf32, #tpu.memory_space<vmem>>, vector<1x256xf32>
        %241 = arith.mulf %240, %238 : vector<1x256xf32>
        %242 = arith.addf %239, %241 : vector<1x256xf32>
        %c0_160 = arith.constant 0 : index
        %c0_161 = arith.constant 0 : index
        %243 = vector.load %arg10[%c0_160, %c0_161] : memref<1x256xf32, #tpu.memory_space<vmem>>, vector<1x256xf32>
        tpu.vector_store %arg10[%c0_160, %c0_161], %242 {strides = array<i32>} : memref<1x256xf32, #tpu.memory_space<vmem>>, vector<1x256xf32>,
        %cst_162 = arith.constant 0.000000e+00 : f32
        %244 = vector.broadcast %cst_162 : f32 to vector<1x256xf32>
        %c14 = arith.constant 14 : index
        %245 = memref.load %arg3[%c14] : memref<98xf32, #tpu.memory_space<smem>>
        %c0_163 = arith.constant 0 : index
        %c0_164 = arith.constant 0 : index
        %246 = vector.load %arg11[%c0_163, %c0_164] : memref<14x256xf32, #tpu.memory_space<vmem>>, vector<1x256xf32>
        %247 = vector.broadcast %245 : f32 to vector<1x256xf32>
        %248 = arith.mulf %247, %246 : vector<1x256xf32>
        %249 = arith.addf %244, %248 : vector<1x256xf32>
        %c15 = arith.constant 15 : index
        %250 = memref.load %arg3[%c15] : memref<98xf32, #tpu.memory_space<smem>>
        %c1_165 = arith.constant 1 : index
        %c0_166 = arith.constant 0 : index
        %251 = vector.load %arg11[%c1_165, %c0_166] : memref<14x256xf32, #tpu.memory_space<vmem>>, vector<1x256xf32>
        %252 = vector.broadcast %250 : f32 to vector<1x256xf32>
        %253 = arith.mulf %252, %251 : vector<1x256xf32>
        %254 = arith.addf %249, %253 : vector<1x256xf32>
        %c16 = arith.constant 16 : index
        %255 = memref.load %arg3[%c16] : memref<98xf32, #tpu.memory_space<smem>>
        %c2_167 = arith.constant 2 : index
        %c0_168 = arith.constant 0 : index
        %256 = vector.load %arg11[%c2_167, %c0_168] : memref<14x256xf32, #tpu.memory_space<vmem>>, vector<1x256xf32>
        %257 = vector.broadcast %255 : f32 to vector<1x256xf32>
        %258 = arith.mulf %257, %256 : vector<1x256xf32>
        %259 = arith.addf %254, %258 : vector<1x256xf32>
        %c17 = arith.constant 17 : index
        %260 = memref.load %arg3[%c17] : memref<98xf32, #tpu.memory_space<smem>>
        %c3_169 = arith.constant 3 : index
        %c0_170 = arith.constant 0 : index
        %261 = vector.load %arg11[%c3_169, %c0_170] : memref<14x256xf32, #tpu.memory_space<vmem>>, vector<1x256xf32>
        %262 = vector.broadcast %260 : f32 to vector<1x256xf32>
        %263 = arith.mulf %262, %261 : vector<1x256xf32>
        %264 = arith.addf %259, %263 : vector<1x256xf32>
        %c18 = arith.constant 18 : index
        %265 = memref.load %arg3[%c18] : memref<98xf32, #tpu.memory_space<smem>>
        %c4_171 = arith.constant 4 : index
        %c0_172 = arith.constant 0 : index
        %266 = vector.load %arg11[%c4_171, %c0_172] : memref<14x256xf32, #tpu.memory_space<vmem>>, vector<1x256xf32>
        %267 = vector.broadcast %265 : f32 to vector<1x256xf32>
        %268 = arith.mulf %267, %266 : vector<1x256xf32>
        %269 = arith.addf %264, %268 : vector<1x256xf32>
        %c19 = arith.constant 19 : index
        %270 = memref.load %arg3[%c19] : memref<98xf32, #tpu.memory_space<smem>>
        %c5_173 = arith.constant 5 : index
        %c0_174 = arith.constant 0 : index
        %271 = vector.load %arg11[%c5_173, %c0_174] : memref<14x256xf32, #tpu.memory_space<vmem>>, vector<1x256xf32>
        %272 = vector.broadcast %270 : f32 to vector<1x256xf32>
        %273 = arith.mulf %272, %271 : vector<1x256xf32>
        %274 = arith.addf %269, %273 : vector<1x256xf32>
        %c20 = arith.constant 20 : index
        %275 = memref.load %arg3[%c20] : memref<98xf32, #tpu.memory_space<smem>>
        %c6_175 = arith.constant 6 : index
        %c0_176 = arith.constant 0 : index
        %276 = vector.load %arg11[%c6_175, %c0_176] : memref<14x256xf32, #tpu.memory_space<vmem>>, vector<1x256xf32>
        %277 = vector.broadcast %275 : f32 to vector<1x256xf32>
        %278 = arith.mulf %277, %276 : vector<1x256xf32>
        %279 = arith.addf %274, %278 : vector<1x256xf32>
        %c63 = arith.constant 63 : index
        %280 = memref.load %arg3[%c63] : memref<98xf32, #tpu.memory_space<smem>>
        %c7_177 = arith.constant 7 : index
        %c0_178 = arith.constant 0 : index
        %281 = vector.load %arg11[%c7_177, %c0_178] : memref<14x256xf32, #tpu.memory_space<vmem>>, vector<1x256xf32>
        %282 = vector.broadcast %280 : f32 to vector<1x256xf32>
        %283 = arith.mulf %282, %281 : vector<1x256xf32>
        %284 = arith.addf %279, %283 : vector<1x256xf32>
        %c64 = arith.constant 64 : index
        %285 = memref.load %arg3[%c64] : memref<98xf32, #tpu.memory_space<smem>>
        %c8_179 = arith.constant 8 : index
        %c0_180 = arith.constant 0 : index
        %286 = vector.load %arg11[%c8_179, %c0_180] : memref<14x256xf32, #tpu.memory_space<vmem>>, vector<1x256xf32>
        %287 = vector.broadcast %285 : f32 to vector<1x256xf32>
        %288 = arith.mulf %287, %286 : vector<1x256xf32>
        %289 = arith.addf %284, %288 : vector<1x256xf32>
        %c65 = arith.constant 65 : index
        %290 = memref.load %arg3[%c65] : memref<98xf32, #tpu.memory_space<smem>>
        %c9_181 = arith.constant 9 : index
        %c0_182 = arith.constant 0 : index
        %291 = vector.load %arg11[%c9_181, %c0_182] : memref<14x256xf32, #tpu.memory_space<vmem>>, vector<1x256xf32>
        %292 = vector.broadcast %290 : f32 to vector<1x256xf32>
        %293 = arith.mulf %292, %291 : vector<1x256xf32>
        %294 = arith.addf %289, %293 : vector<1x256xf32>
        %c66 = arith.constant 66 : index
        %295 = memref.load %arg3[%c66] : memref<98xf32, #tpu.memory_space<smem>>
        %c10_183 = arith.constant 10 : index
        %c0_184 = arith.constant 0 : index
        %296 = vector.load %arg11[%c10_183, %c0_184] : memref<14x256xf32, #tpu.memory_space<vmem>>, vector<1x256xf32>
        %297 = vector.broadcast %295 : f32 to vector<1x256xf32>
        %298 = arith.mulf %297, %296 : vector<1x256xf32>
        %299 = arith.addf %294, %298 : vector<1x256xf32>
        %c67 = arith.constant 67 : index
        %300 = memref.load %arg3[%c67] : memref<98xf32, #tpu.memory_space<smem>>
        %c11_185 = arith.constant 11 : index
        %c0_186 = arith.constant 0 : index
        %301 = vector.load %arg11[%c11_185, %c0_186] : memref<14x256xf32, #tpu.memory_space<vmem>>, vector<1x256xf32>
        %302 = vector.broadcast %300 : f32 to vector<1x256xf32>
        %303 = arith.mulf %302, %301 : vector<1x256xf32>
        %304 = arith.addf %299, %303 : vector<1x256xf32>
        %c68 = arith.constant 68 : index
        %305 = memref.load %arg3[%c68] : memref<98xf32, #tpu.memory_space<smem>>
        %c12_187 = arith.constant 12 : index
        %c0_188 = arith.constant 0 : index
        %306 = vector.load %arg11[%c12_187, %c0_188] : memref<14x256xf32, #tpu.memory_space<vmem>>, vector<1x256xf32>
        %307 = vector.broadcast %305 : f32 to vector<1x256xf32>
        %308 = arith.mulf %307, %306 : vector<1x256xf32>
        %309 = arith.addf %304, %308 : vector<1x256xf32>
        %c69 = arith.constant 69 : index
        %310 = memref.load %arg3[%c69] : memref<98xf32, #tpu.memory_space<smem>>
        %c13_189 = arith.constant 13 : index
        %c0_190 = arith.constant 0 : index
        %311 = vector.load %arg11[%c13_189, %c0_190] : memref<14x256xf32, #tpu.memory_space<vmem>>, vector<1x256xf32>
        %312 = vector.broadcast %310 : f32 to vector<1x256xf32>
        %313 = arith.mulf %312, %311 : vector<1x256xf32>
        %314 = arith.addf %309, %313 : vector<1x256xf32>
        %c16_i32 = arith.constant 16 : i32
        %315 = tpu.dynamic_rotate %314 by %c16_i32 dim 1 : vector<1x256xf32>, i32 -> vector<1x256xf32>
        %c0_191 = arith.constant 0 : index
        %c0_192 = arith.constant 0 : index
        %316 = vector.load %arg10[%c0_191, %c0_192] : memref<1x256xf32, #tpu.memory_space<vmem>>, vector<1x256xf32>
        %c2_193 = arith.constant 2 : index
        %c0_194 = arith.constant 0 : index
        %317 = vector.load %arg6[%c2_193, %c0_194] : memref<7x256xf32, #tpu.memory_space<vmem>>, vector<1x256xf32>
        %318 = arith.mulf %317, %315 : vector<1x256xf32>
        %319 = arith.addf %316, %318 : vector<1x256xf32>
        %c0_195 = arith.constant 0 : index
        %c0_196 = arith.constant 0 : index
        %320 = vector.load %arg10[%c0_195, %c0_196] : memref<1x256xf32, #tpu.memory_space<vmem>>, vector<1x256xf32>
        tpu.vector_store %arg10[%c0_195, %c0_196], %319 {strides = array<i32>} : memref<1x256xf32, #tpu.memory_space<vmem>>, vector<1x256xf32>,
        %cst_197 = arith.constant 0.000000e+00 : f32
        %321 = vector.broadcast %cst_197 : f32 to vector<1x256xf32>
        %c21 = arith.constant 21 : index
        %322 = memref.load %arg3[%c21] : memref<98xf32, #tpu.memory_space<smem>>
        %c0_198 = arith.constant 0 : index
        %c0_199 = arith.constant 0 : index
        %323 = vector.load %arg11[%c0_198, %c0_199] : memref<14x256xf32, #tpu.memory_space<vmem>>, vector<1x256xf32>
        %324 = vector.broadcast %322 : f32 to vector<1x256xf32>
        %325 = arith.mulf %324, %323 : vector<1x256xf32>
        %326 = arith.addf %321, %325 : vector<1x256xf32>
        %c22 = arith.constant 22 : index
        %327 = memref.load %arg3[%c22] : memref<98xf32, #tpu.memory_space<smem>>
        %c1_200 = arith.constant 1 : index
        %c0_201 = arith.constant 0 : index
        %328 = vector.load %arg11[%c1_200, %c0_201] : memref<14x256xf32, #tpu.memory_space<vmem>>, vector<1x256xf32>
        %329 = vector.broadcast %327 : f32 to vector<1x256xf32>
        %330 = arith.mulf %329, %328 : vector<1x256xf32>
        %331 = arith.addf %326, %330 : vector<1x256xf32>
        %c23 = arith.constant 23 : index
        %332 = memref.load %arg3[%c23] : memref<98xf32, #tpu.memory_space<smem>>
        %c2_202 = arith.constant 2 : index
        %c0_203 = arith.constant 0 : index
        %333 = vector.load %arg11[%c2_202, %c0_203] : memref<14x256xf32, #tpu.memory_space<vmem>>, vector<1x256xf32>
        %334 = vector.broadcast %332 : f32 to vector<1x256xf32>
        %335 = arith.mulf %334, %333 : vector<1x256xf32>
        %336 = arith.addf %331, %335 : vector<1x256xf32>
        %c24 = arith.constant 24 : index
        %337 = memref.load %arg3[%c24] : memref<98xf32, #tpu.memory_space<smem>>
        %c3_204 = arith.constant 3 : index
        %c0_205 = arith.constant 0 : index
        %338 = vector.load %arg11[%c3_204, %c0_205] : memref<14x256xf32, #tpu.memory_space<vmem>>, vector<1x256xf32>
        %339 = vector.broadcast %337 : f32 to vector<1x256xf32>
        %340 = arith.mulf %339, %338 : vector<1x256xf32>
        %341 = arith.addf %336, %340 : vector<1x256xf32>
        %c25 = arith.constant 25 : index
        %342 = memref.load %arg3[%c25] : memref<98xf32, #tpu.memory_space<smem>>
        %c4_206 = arith.constant 4 : index
        %c0_207 = arith.constant 0 : index
        %343 = vector.load %arg11[%c4_206, %c0_207] : memref<14x256xf32, #tpu.memory_space<vmem>>, vector<1x256xf32>
        %344 = vector.broadcast %342 : f32 to vector<1x256xf32>
        %345 = arith.mulf %344, %343 : vector<1x256xf32>
        %346 = arith.addf %341, %345 : vector<1x256xf32>
        %c26 = arith.constant 26 : index
        %347 = memref.load %arg3[%c26] : memref<98xf32, #tpu.memory_space<smem>>
        %c5_208 = arith.constant 5 : index
        %c0_209 = arith.constant 0 : index
        %348 = vector.load %arg11[%c5_208, %c0_209] : memref<14x256xf32, #tpu.memory_space<vmem>>, vector<1x256xf32>
        %349 = vector.broadcast %347 : f32 to vector<1x256xf32>
        %350 = arith.mulf %349, %348 : vector<1x256xf32>
        %351 = arith.addf %346, %350 : vector<1x256xf32>
        %c27 = arith.constant 27 : index
        %352 = memref.load %arg3[%c27] : memref<98xf32, #tpu.memory_space<smem>>
        %c6_210 = arith.constant 6 : index
        %c0_211 = arith.constant 0 : index
        %353 = vector.load %arg11[%c6_210, %c0_211] : memref<14x256xf32, #tpu.memory_space<vmem>>, vector<1x256xf32>
        %354 = vector.broadcast %352 : f32 to vector<1x256xf32>
        %355 = arith.mulf %354, %353 : vector<1x256xf32>
        %356 = arith.addf %351, %355 : vector<1x256xf32>
        %c70 = arith.constant 70 : index
        %357 = memref.load %arg3[%c70] : memref<98xf32, #tpu.memory_space<smem>>
        %c7_212 = arith.constant 7 : index
        %c0_213 = arith.constant 0 : index
        %358 = vector.load %arg11[%c7_212, %c0_213] : memref<14x256xf32, #tpu.memory_space<vmem>>, vector<1x256xf32>
        %359 = vector.broadcast %357 : f32 to vector<1x256xf32>
        %360 = arith.mulf %359, %358 : vector<1x256xf32>
        %361 = arith.addf %356, %360 : vector<1x256xf32>
        %c71 = arith.constant 71 : index
        %362 = memref.load %arg3[%c71] : memref<98xf32, #tpu.memory_space<smem>>
        %c8_214 = arith.constant 8 : index
        %c0_215 = arith.constant 0 : index
        %363 = vector.load %arg11[%c8_214, %c0_215] : memref<14x256xf32, #tpu.memory_space<vmem>>, vector<1x256xf32>
        %364 = vector.broadcast %362 : f32 to vector<1x256xf32>
        %365 = arith.mulf %364, %363 : vector<1x256xf32>
        %366 = arith.addf %361, %365 : vector<1x256xf32>
        %c72 = arith.constant 72 : index
        %367 = memref.load %arg3[%c72] : memref<98xf32, #tpu.memory_space<smem>>
        %c9_216 = arith.constant 9 : index
        %c0_217 = arith.constant 0 : index
        %368 = vector.load %arg11[%c9_216, %c0_217] : memref<14x256xf32, #tpu.memory_space<vmem>>, vector<1x256xf32>
        %369 = vector.broadcast %367 : f32 to vector<1x256xf32>
        %370 = arith.mulf %369, %368 : vector<1x256xf32>
        %371 = arith.addf %366, %370 : vector<1x256xf32>
        %c73 = arith.constant 73 : index
        %372 = memref.load %arg3[%c73] : memref<98xf32, #tpu.memory_space<smem>>
        %c10_218 = arith.constant 10 : index
        %c0_219 = arith.constant 0 : index
        %373 = vector.load %arg11[%c10_218, %c0_219] : memref<14x256xf32, #tpu.memory_space<vmem>>, vector<1x256xf32>
        %374 = vector.broadcast %372 : f32 to vector<1x256xf32>
        %375 = arith.mulf %374, %373 : vector<1x256xf32>
        %376 = arith.addf %371, %375 : vector<1x256xf32>
        %c74 = arith.constant 74 : index
        %377 = memref.load %arg3[%c74] : memref<98xf32, #tpu.memory_space<smem>>
        %c11_220 = arith.constant 11 : index
        %c0_221 = arith.constant 0 : index
        %378 = vector.load %arg11[%c11_220, %c0_221] : memref<14x256xf32, #tpu.memory_space<vmem>>, vector<1x256xf32>
        %379 = vector.broadcast %377 : f32 to vector<1x256xf32>
        %380 = arith.mulf %379, %378 : vector<1x256xf32>
        %381 = arith.addf %376, %380 : vector<1x256xf32>
        %c75 = arith.constant 75 : index
        %382 = memref.load %arg3[%c75] : memref<98xf32, #tpu.memory_space<smem>>
        %c12_222 = arith.constant 12 : index
        %c0_223 = arith.constant 0 : index
        %383 = vector.load %arg11[%c12_222, %c0_223] : memref<14x256xf32, #tpu.memory_space<vmem>>, vector<1x256xf32>
        %384 = vector.broadcast %382 : f32 to vector<1x256xf32>
        %385 = arith.mulf %384, %383 : vector<1x256xf32>
        %386 = arith.addf %381, %385 : vector<1x256xf32>
        %c76 = arith.constant 76 : index
        %387 = memref.load %arg3[%c76] : memref<98xf32, #tpu.memory_space<smem>>
        %c13_224 = arith.constant 13 : index
        %c0_225 = arith.constant 0 : index
        %388 = vector.load %arg11[%c13_224, %c0_225] : memref<14x256xf32, #tpu.memory_space<vmem>>, vector<1x256xf32>
        %389 = vector.broadcast %387 : f32 to vector<1x256xf32>
        %390 = arith.mulf %389, %388 : vector<1x256xf32>
        %391 = arith.addf %386, %390 : vector<1x256xf32>
        %c0_226 = arith.constant 0 : index
        %c0_227 = arith.constant 0 : index
        %392 = vector.load %arg10[%c0_226, %c0_227] : memref<1x256xf32, #tpu.memory_space<vmem>>, vector<1x256xf32>
        %c3_228 = arith.constant 3 : index
        %c0_229 = arith.constant 0 : index
        %393 = vector.load %arg6[%c3_228, %c0_229] : memref<7x256xf32, #tpu.memory_space<vmem>>, vector<1x256xf32>
        %394 = arith.mulf %393, %391 : vector<1x256xf32>
        %395 = arith.addf %392, %394 : vector<1x256xf32>
        %c0_230 = arith.constant 0 : index
        %c0_231 = arith.constant 0 : index
        %396 = vector.load %arg10[%c0_230, %c0_231] : memref<1x256xf32, #tpu.memory_space<vmem>>, vector<1x256xf32>
        tpu.vector_store %arg10[%c0_230, %c0_231], %395 {strides = array<i32>} : memref<1x256xf32, #tpu.memory_space<vmem>>, vector<1x256xf32>,
        %cst_232 = arith.constant 0.000000e+00 : f32
        %397 = vector.broadcast %cst_232 : f32 to vector<1x256xf32>
        %c28 = arith.constant 28 : index
        %398 = memref.load %arg3[%c28] : memref<98xf32, #tpu.memory_space<smem>>
        %c0_233 = arith.constant 0 : index
        %c0_234 = arith.constant 0 : index
        %399 = vector.load %arg11[%c0_233, %c0_234] : memref<14x256xf32, #tpu.memory_space<vmem>>, vector<1x256xf32>
        %400 = vector.broadcast %398 : f32 to vector<1x256xf32>
        %401 = arith.mulf %400, %399 : vector<1x256xf32>
        %402 = arith.addf %397, %401 : vector<1x256xf32>
        %c29 = arith.constant 29 : index
        %403 = memref.load %arg3[%c29] : memref<98xf32, #tpu.memory_space<smem>>
        %c1_235 = arith.constant 1 : index
        %c0_236 = arith.constant 0 : index
        %404 = vector.load %arg11[%c1_235, %c0_236] : memref<14x256xf32, #tpu.memory_space<vmem>>, vector<1x256xf32>
        %405 = vector.broadcast %403 : f32 to vector<1x256xf32>
        %406 = arith.mulf %405, %404 : vector<1x256xf32>
        %407 = arith.addf %402, %406 : vector<1x256xf32>
        %c30 = arith.constant 30 : index
        %408 = memref.load %arg3[%c30] : memref<98xf32, #tpu.memory_space<smem>>
        %c2_237 = arith.constant 2 : index
        %c0_238 = arith.constant 0 : index
        %409 = vector.load %arg11[%c2_237, %c0_238] : memref<14x256xf32, #tpu.memory_space<vmem>>, vector<1x256xf32>
        %410 = vector.broadcast %408 : f32 to vector<1x256xf32>
        %411 = arith.mulf %410, %409 : vector<1x256xf32>
        %412 = arith.addf %407, %411 : vector<1x256xf32>
        %c31 = arith.constant 31 : index
        %413 = memref.load %arg3[%c31] : memref<98xf32, #tpu.memory_space<smem>>
        %c3_239 = arith.constant 3 : index
        %c0_240 = arith.constant 0 : index
        %414 = vector.load %arg11[%c3_239, %c0_240] : memref<14x256xf32, #tpu.memory_space<vmem>>, vector<1x256xf32>
        %415 = vector.broadcast %413 : f32 to vector<1x256xf32>
        %416 = arith.mulf %415, %414 : vector<1x256xf32>
        %417 = arith.addf %412, %416 : vector<1x256xf32>
        %c32 = arith.constant 32 : index
        %418 = memref.load %arg3[%c32] : memref<98xf32, #tpu.memory_space<smem>>
        %c4_241 = arith.constant 4 : index
        %c0_242 = arith.constant 0 : index
        %419 = vector.load %arg11[%c4_241, %c0_242] : memref<14x256xf32, #tpu.memory_space<vmem>>, vector<1x256xf32>
        %420 = vector.broadcast %418 : f32 to vector<1x256xf32>
        %421 = arith.mulf %420, %419 : vector<1x256xf32>
        %422 = arith.addf %417, %421 : vector<1x256xf32>
        %c33 = arith.constant 33 : index
        %423 = memref.load %arg3[%c33] : memref<98xf32, #tpu.memory_space<smem>>
        %c5_243 = arith.constant 5 : index
        %c0_244 = arith.constant 0 : index
        %424 = vector.load %arg11[%c5_243, %c0_244] : memref<14x256xf32, #tpu.memory_space<vmem>>, vector<1x256xf32>
        %425 = vector.broadcast %423 : f32 to vector<1x256xf32>
        %426 = arith.mulf %425, %424 : vector<1x256xf32>
        %427 = arith.addf %422, %426 : vector<1x256xf32>
        %c34 = arith.constant 34 : index
        %428 = memref.load %arg3[%c34] : memref<98xf32, #tpu.memory_space<smem>>
        %c6_245 = arith.constant 6 : index
        %c0_246 = arith.constant 0 : index
        %429 = vector.load %arg11[%c6_245, %c0_246] : memref<14x256xf32, #tpu.memory_space<vmem>>, vector<1x256xf32>
        %430 = vector.broadcast %428 : f32 to vector<1x256xf32>
        %431 = arith.mulf %430, %429 : vector<1x256xf32>
        %432 = arith.addf %427, %431 : vector<1x256xf32>
        %c77 = arith.constant 77 : index
        %433 = memref.load %arg3[%c77] : memref<98xf32, #tpu.memory_space<smem>>
        %c7_247 = arith.constant 7 : index
        %c0_248 = arith.constant 0 : index
        %434 = vector.load %arg11[%c7_247, %c0_248] : memref<14x256xf32, #tpu.memory_space<vmem>>, vector<1x256xf32>
        %435 = vector.broadcast %433 : f32 to vector<1x256xf32>
        %436 = arith.mulf %435, %434 : vector<1x256xf32>
        %437 = arith.addf %432, %436 : vector<1x256xf32>
        %c78 = arith.constant 78 : index
        %438 = memref.load %arg3[%c78] : memref<98xf32, #tpu.memory_space<smem>>
        %c8_249 = arith.constant 8 : index
        %c0_250 = arith.constant 0 : index
        %439 = vector.load %arg11[%c8_249, %c0_250] : memref<14x256xf32, #tpu.memory_space<vmem>>, vector<1x256xf32>
        %440 = vector.broadcast %438 : f32 to vector<1x256xf32>
        %441 = arith.mulf %440, %439 : vector<1x256xf32>
        %442 = arith.addf %437, %441 : vector<1x256xf32>
        %c79 = arith.constant 79 : index
        %443 = memref.load %arg3[%c79] : memref<98xf32, #tpu.memory_space<smem>>
        %c9_251 = arith.constant 9 : index
        %c0_252 = arith.constant 0 : index
        %444 = vector.load %arg11[%c9_251, %c0_252] : memref<14x256xf32, #tpu.memory_space<vmem>>, vector<1x256xf32>
        %445 = vector.broadcast %443 : f32 to vector<1x256xf32>
        %446 = arith.mulf %445, %444 : vector<1x256xf32>
        %447 = arith.addf %442, %446 : vector<1x256xf32>
        %c80 = arith.constant 80 : index
        %448 = memref.load %arg3[%c80] : memref<98xf32, #tpu.memory_space<smem>>
        %c10_253 = arith.constant 10 : index
        %c0_254 = arith.constant 0 : index
        %449 = vector.load %arg11[%c10_253, %c0_254] : memref<14x256xf32, #tpu.memory_space<vmem>>, vector<1x256xf32>
        %450 = vector.broadcast %448 : f32 to vector<1x256xf32>
        %451 = arith.mulf %450, %449 : vector<1x256xf32>
        %452 = arith.addf %447, %451 : vector<1x256xf32>
        %c81 = arith.constant 81 : index
        %453 = memref.load %arg3[%c81] : memref<98xf32, #tpu.memory_space<smem>>
        %c11_255 = arith.constant 11 : index
        %c0_256 = arith.constant 0 : index
        %454 = vector.load %arg11[%c11_255, %c0_256] : memref<14x256xf32, #tpu.memory_space<vmem>>, vector<1x256xf32>
        %455 = vector.broadcast %453 : f32 to vector<1x256xf32>
        %456 = arith.mulf %455, %454 : vector<1x256xf32>
        %457 = arith.addf %452, %456 : vector<1x256xf32>
        %c82 = arith.constant 82 : index
        %458 = memref.load %arg3[%c82] : memref<98xf32, #tpu.memory_space<smem>>
        %c12_257 = arith.constant 12 : index
        %c0_258 = arith.constant 0 : index
        %459 = vector.load %arg11[%c12_257, %c0_258] : memref<14x256xf32, #tpu.memory_space<vmem>>, vector<1x256xf32>
        %460 = vector.broadcast %458 : f32 to vector<1x256xf32>
        %461 = arith.mulf %460, %459 : vector<1x256xf32>
        %462 = arith.addf %457, %461 : vector<1x256xf32>
        %c83 = arith.constant 83 : index
        %463 = memref.load %arg3[%c83] : memref<98xf32, #tpu.memory_space<smem>>
        %c13_259 = arith.constant 13 : index
        %c0_260 = arith.constant 0 : index
        %464 = vector.load %arg11[%c13_259, %c0_260] : memref<14x256xf32, #tpu.memory_space<vmem>>, vector<1x256xf32>
        %465 = vector.broadcast %463 : f32 to vector<1x256xf32>
        %466 = arith.mulf %465, %464 : vector<1x256xf32>
        %467 = arith.addf %462, %466 : vector<1x256xf32>
        %c240_i32 = arith.constant 240 : i32
        %468 = tpu.dynamic_rotate %467 by %c240_i32 dim 1 : vector<1x256xf32>, i32 -> vector<1x256xf32>
        %c0_261 = arith.constant 0 : index
        %c0_262 = arith.constant 0 : index
        %469 = vector.load %arg10[%c0_261, %c0_262] : memref<1x256xf32, #tpu.memory_space<vmem>>, vector<1x256xf32>
        %c4_263 = arith.constant 4 : index
        %c0_264 = arith.constant 0 : index
        %470 = vector.load %arg6[%c4_263, %c0_264] : memref<7x256xf32, #tpu.memory_space<vmem>>, vector<1x256xf32>
        %471 = arith.mulf %470, %468 : vector<1x256xf32>
        %472 = arith.addf %469, %471 : vector<1x256xf32>
        %c0_265 = arith.constant 0 : index
        %c0_266 = arith.constant 0 : index
        %473 = vector.load %arg10[%c0_265, %c0_266] : memref<1x256xf32, #tpu.memory_space<vmem>>, vector<1x256xf32>
        tpu.vector_store %arg10[%c0_265, %c0_266], %472 {strides = array<i32>} : memref<1x256xf32, #tpu.memory_space<vmem>>, vector<1x256xf32>,
        %cst_267 = arith.constant 0.000000e+00 : f32
        %474 = vector.broadcast %cst_267 : f32 to vector<1x256xf32>
        %c35 = arith.constant 35 : index
        %475 = memref.load %arg3[%c35] : memref<98xf32, #tpu.memory_space<smem>>
        %c0_268 = arith.constant 0 : index
        %c0_269 = arith.constant 0 : index
        %476 = vector.load %arg11[%c0_268, %c0_269] : memref<14x256xf32, #tpu.memory_space<vmem>>, vector<1x256xf32>
        %477 = vector.broadcast %475 : f32 to vector<1x256xf32>
        %478 = arith.mulf %477, %476 : vector<1x256xf32>
        %479 = arith.addf %474, %478 : vector<1x256xf32>
        %c36 = arith.constant 36 : index
        %480 = memref.load %arg3[%c36] : memref<98xf32, #tpu.memory_space<smem>>
        %c1_270 = arith.constant 1 : index
        %c0_271 = arith.constant 0 : index
        %481 = vector.load %arg11[%c1_270, %c0_271] : memref<14x256xf32, #tpu.memory_space<vmem>>, vector<1x256xf32>
        %482 = vector.broadcast %480 : f32 to vector<1x256xf32>
        %483 = arith.mulf %482, %481 : vector<1x256xf32>
        %484 = arith.addf %479, %483 : vector<1x256xf32>
        %c37 = arith.constant 37 : index
        %485 = memref.load %arg3[%c37] : memref<98xf32, #tpu.memory_space<smem>>
        %c2_272 = arith.constant 2 : index
        %c0_273 = arith.constant 0 : index
        %486 = vector.load %arg11[%c2_272, %c0_273] : memref<14x256xf32, #tpu.memory_space<vmem>>, vector<1x256xf32>
        %487 = vector.broadcast %485 : f32 to vector<1x256xf32>
        %488 = arith.mulf %487, %486 : vector<1x256xf32>
        %489 = arith.addf %484, %488 : vector<1x256xf32>
        %c38 = arith.constant 38 : index
        %490 = memref.load %arg3[%c38] : memref<98xf32, #tpu.memory_space<smem>>
        %c3_274 = arith.constant 3 : index
        %c0_275 = arith.constant 0 : index
        %491 = vector.load %arg11[%c3_274, %c0_275] : memref<14x256xf32, #tpu.memory_space<vmem>>, vector<1x256xf32>
        %492 = vector.broadcast %490 : f32 to vector<1x256xf32>
        %493 = arith.mulf %492, %491 : vector<1x256xf32>
        %494 = arith.addf %489, %493 : vector<1x256xf32>
        %c39 = arith.constant 39 : index
        %495 = memref.load %arg3[%c39] : memref<98xf32, #tpu.memory_space<smem>>
        %c4_276 = arith.constant 4 : index
        %c0_277 = arith.constant 0 : index
        %496 = vector.load %arg11[%c4_276, %c0_277] : memref<14x256xf32, #tpu.memory_space<vmem>>, vector<1x256xf32>
        %497 = vector.broadcast %495 : f32 to vector<1x256xf32>
        %498 = arith.mulf %497, %496 : vector<1x256xf32>
        %499 = arith.addf %494, %498 : vector<1x256xf32>
        %c40 = arith.constant 40 : index
        %500 = memref.load %arg3[%c40] : memref<98xf32, #tpu.memory_space<smem>>
        %c5_278 = arith.constant 5 : index
        %c0_279 = arith.constant 0 : index
        %501 = vector.load %arg11[%c5_278, %c0_279] : memref<14x256xf32, #tpu.memory_space<vmem>>, vector<1x256xf32>
        %502 = vector.broadcast %500 : f32 to vector<1x256xf32>
        %503 = arith.mulf %502, %501 : vector<1x256xf32>
        %504 = arith.addf %499, %503 : vector<1x256xf32>
        %c41 = arith.constant 41 : index
        %505 = memref.load %arg3[%c41] : memref<98xf32, #tpu.memory_space<smem>>
        %c6_280 = arith.constant 6 : index
        %c0_281 = arith.constant 0 : index
        %506 = vector.load %arg11[%c6_280, %c0_281] : memref<14x256xf32, #tpu.memory_space<vmem>>, vector<1x256xf32>
        %507 = vector.broadcast %505 : f32 to vector<1x256xf32>
        %508 = arith.mulf %507, %506 : vector<1x256xf32>
        %509 = arith.addf %504, %508 : vector<1x256xf32>
        %c84 = arith.constant 84 : index
        %510 = memref.load %arg3[%c84] : memref<98xf32, #tpu.memory_space<smem>>
        %c7_282 = arith.constant 7 : index
        %c0_283 = arith.constant 0 : index
        %511 = vector.load %arg11[%c7_282, %c0_283] : memref<14x256xf32, #tpu.memory_space<vmem>>, vector<1x256xf32>
        %512 = vector.broadcast %510 : f32 to vector<1x256xf32>
        %513 = arith.mulf %512, %511 : vector<1x256xf32>
        %514 = arith.addf %509, %513 : vector<1x256xf32>
        %c85 = arith.constant 85 : index
        %515 = memref.load %arg3[%c85] : memref<98xf32, #tpu.memory_space<smem>>
        %c8_284 = arith.constant 8 : index
        %c0_285 = arith.constant 0 : index
        %516 = vector.load %arg11[%c8_284, %c0_285] : memref<14x256xf32, #tpu.memory_space<vmem>>, vector<1x256xf32>
        %517 = vector.broadcast %515 : f32 to vector<1x256xf32>
        %518 = arith.mulf %517, %516 : vector<1x256xf32>
        %519 = arith.addf %514, %518 : vector<1x256xf32>
        %c86 = arith.constant 86 : index
        %520 = memref.load %arg3[%c86] : memref<98xf32, #tpu.memory_space<smem>>
        %c9_286 = arith.constant 9 : index
        %c0_287 = arith.constant 0 : index
        %521 = vector.load %arg11[%c9_286, %c0_287] : memref<14x256xf32, #tpu.memory_space<vmem>>, vector<1x256xf32>
        %522 = vector.broadcast %520 : f32 to vector<1x256xf32>
        %523 = arith.mulf %522, %521 : vector<1x256xf32>
        %524 = arith.addf %519, %523 : vector<1x256xf32>
        %c87 = arith.constant 87 : index
        %525 = memref.load %arg3[%c87] : memref<98xf32, #tpu.memory_space<smem>>
        %c10_288 = arith.constant 10 : index
        %c0_289 = arith.constant 0 : index
        %526 = vector.load %arg11[%c10_288, %c0_289] : memref<14x256xf32, #tpu.memory_space<vmem>>, vector<1x256xf32>
        %527 = vector.broadcast %525 : f32 to vector<1x256xf32>
        %528 = arith.mulf %527, %526 : vector<1x256xf32>
        %529 = arith.addf %524, %528 : vector<1x256xf32>
        %c88 = arith.constant 88 : index
        %530 = memref.load %arg3[%c88] : memref<98xf32, #tpu.memory_space<smem>>
        %c11_290 = arith.constant 11 : index
        %c0_291 = arith.constant 0 : index
        %531 = vector.load %arg11[%c11_290, %c0_291] : memref<14x256xf32, #tpu.memory_space<vmem>>, vector<1x256xf32>
        %532 = vector.broadcast %530 : f32 to vector<1x256xf32>
        %533 = arith.mulf %532, %531 : vector<1x256xf32>
        %534 = arith.addf %529, %533 : vector<1x256xf32>
        %c89 = arith.constant 89 : index
        %535 = memref.load %arg3[%c89] : memref<98xf32, #tpu.memory_space<smem>>
        %c12_292 = arith.constant 12 : index
        %c0_293 = arith.constant 0 : index
        %536 = vector.load %arg11[%c12_292, %c0_293] : memref<14x256xf32, #tpu.memory_space<vmem>>, vector<1x256xf32>
        %537 = vector.broadcast %535 : f32 to vector<1x256xf32>
        %538 = arith.mulf %537, %536 : vector<1x256xf32>
        %539 = arith.addf %534, %538 : vector<1x256xf32>
        %c90 = arith.constant 90 : index
        %540 = memref.load %arg3[%c90] : memref<98xf32, #tpu.memory_space<smem>>
        %c13_294 = arith.constant 13 : index
        %c0_295 = arith.constant 0 : index
        %541 = vector.load %arg11[%c13_294, %c0_295] : memref<14x256xf32, #tpu.memory_space<vmem>>, vector<1x256xf32>
        %542 = vector.broadcast %540 : f32 to vector<1x256xf32>
        %543 = arith.mulf %542, %541 : vector<1x256xf32>
        %544 = arith.addf %539, %543 : vector<1x256xf32>
        %c224_i32 = arith.constant 224 : i32
        %545 = tpu.dynamic_rotate %544 by %c224_i32 dim 1 : vector<1x256xf32>, i32 -> vector<1x256xf32>
        %c0_296 = arith.constant 0 : index
        %c0_297 = arith.constant 0 : index
        %546 = vector.load %arg10[%c0_296, %c0_297] : memref<1x256xf32, #tpu.memory_space<vmem>>, vector<1x256xf32>
        %c5_298 = arith.constant 5 : index
        %c0_299 = arith.constant 0 : index
        %547 = vector.load %arg6[%c5_298, %c0_299] : memref<7x256xf32, #tpu.memory_space<vmem>>, vector<1x256xf32>
        %548 = arith.mulf %547, %545 : vector<1x256xf32>
        %549 = arith.addf %546, %548 : vector<1x256xf32>
        %c0_300 = arith.constant 0 : index
        %c0_301 = arith.constant 0 : index
        %550 = vector.load %arg10[%c0_300, %c0_301] : memref<1x256xf32, #tpu.memory_space<vmem>>, vector<1x256xf32>
        tpu.vector_store %arg10[%c0_300, %c0_301], %549 {strides = array<i32>} : memref<1x256xf32, #tpu.memory_space<vmem>>, vector<1x256xf32>,
        %cst_302 = arith.constant 0.000000e+00 : f32
        %551 = vector.broadcast %cst_302 : f32 to vector<1x256xf32>
        %c42 = arith.constant 42 : index
        %552 = memref.load %arg3[%c42] : memref<98xf32, #tpu.memory_space<smem>>
        %c0_303 = arith.constant 0 : index
        %c0_304 = arith.constant 0 : index
        %553 = vector.load %arg11[%c0_303, %c0_304] : memref<14x256xf32, #tpu.memory_space<vmem>>, vector<1x256xf32>
        %554 = vector.broadcast %552 : f32 to vector<1x256xf32>
        %555 = arith.mulf %554, %553 : vector<1x256xf32>
        %556 = arith.addf %551, %555 : vector<1x256xf32>
        %c43 = arith.constant 43 : index
        %557 = memref.load %arg3[%c43] : memref<98xf32, #tpu.memory_space<smem>>
        %c1_305 = arith.constant 1 : index
        %c0_306 = arith.constant 0 : index
        %558 = vector.load %arg11[%c1_305, %c0_306] : memref<14x256xf32, #tpu.memory_space<vmem>>, vector<1x256xf32>
        %559 = vector.broadcast %557 : f32 to vector<1x256xf32>
        %560 = arith.mulf %559, %558 : vector<1x256xf32>
        %561 = arith.addf %556, %560 : vector<1x256xf32>
        %c44 = arith.constant 44 : index
        %562 = memref.load %arg3[%c44] : memref<98xf32, #tpu.memory_space<smem>>
        %c2_307 = arith.constant 2 : index
        %c0_308 = arith.constant 0 : index
        %563 = vector.load %arg11[%c2_307, %c0_308] : memref<14x256xf32, #tpu.memory_space<vmem>>, vector<1x256xf32>
        %564 = vector.broadcast %562 : f32 to vector<1x256xf32>
        %565 = arith.mulf %564, %563 : vector<1x256xf32>
        %566 = arith.addf %561, %565 : vector<1x256xf32>
        %c45 = arith.constant 45 : index
        %567 = memref.load %arg3[%c45] : memref<98xf32, #tpu.memory_space<smem>>
        %c3_309 = arith.constant 3 : index
        %c0_310 = arith.constant 0 : index
        %568 = vector.load %arg11[%c3_309, %c0_310] : memref<14x256xf32, #tpu.memory_space<vmem>>, vector<1x256xf32>
        %569 = vector.broadcast %567 : f32 to vector<1x256xf32>
        %570 = arith.mulf %569, %568 : vector<1x256xf32>
        %571 = arith.addf %566, %570 : vector<1x256xf32>
        %c46 = arith.constant 46 : index
        %572 = memref.load %arg3[%c46] : memref<98xf32, #tpu.memory_space<smem>>
        %c4_311 = arith.constant 4 : index
        %c0_312 = arith.constant 0 : index
        %573 = vector.load %arg11[%c4_311, %c0_312] : memref<14x256xf32, #tpu.memory_space<vmem>>, vector<1x256xf32>
        %574 = vector.broadcast %572 : f32 to vector<1x256xf32>
        %575 = arith.mulf %574, %573 : vector<1x256xf32>
        %576 = arith.addf %571, %575 : vector<1x256xf32>
        %c47 = arith.constant 47 : index
        %577 = memref.load %arg3[%c47] : memref<98xf32, #tpu.memory_space<smem>>
        %c5_313 = arith.constant 5 : index
        %c0_314 = arith.constant 0 : index
        %578 = vector.load %arg11[%c5_313, %c0_314] : memref<14x256xf32, #tpu.memory_space<vmem>>, vector<1x256xf32>
        %579 = vector.broadcast %577 : f32 to vector<1x256xf32>
        %580 = arith.mulf %579, %578 : vector<1x256xf32>
        %581 = arith.addf %576, %580 : vector<1x256xf32>
        %c48 = arith.constant 48 : index
        %582 = memref.load %arg3[%c48] : memref<98xf32, #tpu.memory_space<smem>>
        %c6_315 = arith.constant 6 : index
        %c0_316 = arith.constant 0 : index
        %583 = vector.load %arg11[%c6_315, %c0_316] : memref<14x256xf32, #tpu.memory_space<vmem>>, vector<1x256xf32>
        %584 = vector.broadcast %582 : f32 to vector<1x256xf32>
        %585 = arith.mulf %584, %583 : vector<1x256xf32>
        %586 = arith.addf %581, %585 : vector<1x256xf32>
        %c91 = arith.constant 91 : index
        %587 = memref.load %arg3[%c91] : memref<98xf32, #tpu.memory_space<smem>>
        %c7_317 = arith.constant 7 : index
        %c0_318 = arith.constant 0 : index
        %588 = vector.load %arg11[%c7_317, %c0_318] : memref<14x256xf32, #tpu.memory_space<vmem>>, vector<1x256xf32>
        %589 = vector.broadcast %587 : f32 to vector<1x256xf32>
        %590 = arith.mulf %589, %588 : vector<1x256xf32>
        %591 = arith.addf %586, %590 : vector<1x256xf32>
        %c92 = arith.constant 92 : index
        %592 = memref.load %arg3[%c92] : memref<98xf32, #tpu.memory_space<smem>>
        %c8_319 = arith.constant 8 : index
        %c0_320 = arith.constant 0 : index
        %593 = vector.load %arg11[%c8_319, %c0_320] : memref<14x256xf32, #tpu.memory_space<vmem>>, vector<1x256xf32>
        %594 = vector.broadcast %592 : f32 to vector<1x256xf32>
        %595 = arith.mulf %594, %593 : vector<1x256xf32>
        %596 = arith.addf %591, %595 : vector<1x256xf32>
        %c93 = arith.constant 93 : index
        %597 = memref.load %arg3[%c93] : memref<98xf32, #tpu.memory_space<smem>>
        %c9_321 = arith.constant 9 : index
        %c0_322 = arith.constant 0 : index
        %598 = vector.load %arg11[%c9_321, %c0_322] : memref<14x256xf32, #tpu.memory_space<vmem>>, vector<1x256xf32>
        %599 = vector.broadcast %597 : f32 to vector<1x256xf32>
        %600 = arith.mulf %599, %598 : vector<1x256xf32>
        %601 = arith.addf %596, %600 : vector<1x256xf32>
        %c94 = arith.constant 94 : index
        %602 = memref.load %arg3[%c94] : memref<98xf32, #tpu.memory_space<smem>>
        %c10_323 = arith.constant 10 : index
        %c0_324 = arith.constant 0 : index
        %603 = vector.load %arg11[%c10_323, %c0_324] : memref<14x256xf32, #tpu.memory_space<vmem>>, vector<1x256xf32>
        %604 = vector.broadcast %602 : f32 to vector<1x256xf32>
        %605 = arith.mulf %604, %603 : vector<1x256xf32>
        %606 = arith.addf %601, %605 : vector<1x256xf32>
        %c95 = arith.constant 95 : index
        %607 = memref.load %arg3[%c95] : memref<98xf32, #tpu.memory_space<smem>>
        %c11_325 = arith.constant 11 : index
        %c0_326 = arith.constant 0 : index
        %608 = vector.load %arg11[%c11_325, %c0_326] : memref<14x256xf32, #tpu.memory_space<vmem>>, vector<1x256xf32>
        %609 = vector.broadcast %607 : f32 to vector<1x256xf32>
        %610 = arith.mulf %609, %608 : vector<1x256xf32>
        %611 = arith.addf %606, %610 : vector<1x256xf32>
        %c96 = arith.constant 96 : index
        %612 = memref.load %arg3[%c96] : memref<98xf32, #tpu.memory_space<smem>>
        %c12_327 = arith.constant 12 : index
        %c0_328 = arith.constant 0 : index
        %613 = vector.load %arg11[%c12_327, %c0_328] : memref<14x256xf32, #tpu.memory_space<vmem>>, vector<1x256xf32>
        %614 = vector.broadcast %612 : f32 to vector<1x256xf32>
        %615 = arith.mulf %614, %613 : vector<1x256xf32>
        %616 = arith.addf %611, %615 : vector<1x256xf32>
        %c97 = arith.constant 97 : index
        %617 = memref.load %arg3[%c97] : memref<98xf32, #tpu.memory_space<smem>>
        %c13_329 = arith.constant 13 : index
        %c0_330 = arith.constant 0 : index
        %618 = vector.load %arg11[%c13_329, %c0_330] : memref<14x256xf32, #tpu.memory_space<vmem>>, vector<1x256xf32>
        %619 = vector.broadcast %617 : f32 to vector<1x256xf32>
        %620 = arith.mulf %619, %618 : vector<1x256xf32>
        %621 = arith.addf %616, %620 : vector<1x256xf32>
        %c208_i32 = arith.constant 208 : i32
        %622 = tpu.dynamic_rotate %621 by %c208_i32 dim 1 : vector<1x256xf32>, i32 -> vector<1x256xf32>
        %c0_331 = arith.constant 0 : index
        %c0_332 = arith.constant 0 : index
        %623 = vector.load %arg10[%c0_331, %c0_332] : memref<1x256xf32, #tpu.memory_space<vmem>>, vector<1x256xf32>
        %c6_333 = arith.constant 6 : index
        %c0_334 = arith.constant 0 : index
        %624 = vector.load %arg6[%c6_333, %c0_334] : memref<7x256xf32, #tpu.memory_space<vmem>>, vector<1x256xf32>
        %625 = arith.mulf %624, %622 : vector<1x256xf32>
        %626 = arith.addf %623, %625 : vector<1x256xf32>
        %c0_335 = arith.constant 0 : index
        %c0_336 = arith.constant 0 : index
        %627 = vector.load %arg10[%c0_335, %c0_336] : memref<1x256xf32, #tpu.memory_space<vmem>>, vector<1x256xf32>
        tpu.vector_store %arg10[%c0_335, %c0_336], %626 {strides = array<i32>} : memref<1x256xf32, #tpu.memory_space<vmem>>, vector<1x256xf32>,
        %c0_337 = arith.constant 0 : index
        %c0_338 = arith.constant 0 : index
        %628 = vector.load %arg10[%c0_337, %c0_338] : memref<1x256xf32, #tpu.memory_space<vmem>>, vector<1x256xf32>
        %c0_339 = arith.constant 0 : index
        %629 = memref.load %arg4[%c0_339] : memref<1xf32, #tpu.memory_space<smem>>
        %630 = vector.broadcast %629 : f32 to vector<1x256xf32>
        %631 = arith.addf %628, %630 : vector<1x256xf32>
        %632 = arith.negf %631 : vector<1x256xf32>
        %633 = math.exp %632 : vector<1x256xf32>
        %cst_340 = arith.constant 1.000000e+00 : f32
        %634 = vector.broadcast %cst_340 : f32 to vector<1x256xf32>
        %635 = arith.addf %634, %633 : vector<1x256xf32>
        %636 = arith.divf %634, %635 : vector<1x256xf32>
        %c0_341 = arith.constant 0 : index
        %c0_342 = arith.constant 0 : index
        %637 = vector.load %arg10[%c0_341, %c0_342] : memref<1x256xf32, #tpu.memory_space<vmem>>, vector<1x256xf32>
        tpu.vector_store %arg10[%c0_341, %c0_342], %636 {strides = array<i32>} : memref<1x256xf32, #tpu.memory_space<vmem>>, vector<1x256xf32>,
      } else {
      }
    } else {
    }
    %c1_i32 = arith.constant 1 : i32
    %3 = arith.cmpi eq, %arg1, %c1_i32 : i32
    %4 = arith.extui %3 : i1 to i32
    %c0_i32_1 = arith.constant 0 : i32
    %5 = arith.cmpi ne, %4, %c0_i32_1 : i32
    scf.if %5 {
      %c0 = arith.constant 0 : index
      %c0_2 = arith.constant 0 : index
      %6 = vector.load %arg10[%c0, %c0_2] : memref<1x256xf32, #tpu.memory_space<vmem>>, vector<1x256xf32>
      %7 = vector.shape_cast %6 : vector<1x256xf32> to vector<1x256xf32>
      %8 = vector.broadcast %7 : vector<1x256xf32> to vector<8x256xf32>
      %c0_3 = arith.constant 0 : index
      %c0_4 = arith.constant 0 : index
      %c0_5 = arith.constant 0 : index
      %9 = vector.load %arg7[%c0_3, %c0_4, %c0_5] : memref<1x4x256xf32, #tpu.memory_space<vmem>>, vector<1x4x256xf32>
      %10 = vector.shape_cast %9 : vector<1x4x256xf32> to vector<4x256xf32>
      %11 = vector.extract_strided_slice %8 {offsets = [0, 0], sizes = [4, 256], strides = [1, 1]} : vector<8x256xf32> to vector<4x256xf32>
      %12 = arith.mulf %10, %11 : vector<4x256xf32>
      %c0_6 = arith.constant 0 : index
      %c0_7 = arith.constant 0 : index
      %c0_8 = arith.constant 0 : index
      %13 = vector.load %arg8[%c0_6, %c0_7, %c0_8] : memref<1x4x256xf32, #tpu.memory_space<vmem>>, vector<1x4x256xf32>
      %14 = vector.shape_cast %13 : vector<1x4x256xf32> to vector<4x256xf32>
      %15 = vector.shape_cast %12 : vector<4x256xf32> to vector<1x4x256xf32>
      tpu.vector_store %arg8[%c0_6, %c0_7, %c0_8], %15 {strides = array<i32>} : memref<1x4x256xf32, #tpu.memory_space<vmem>>, vector<1x4x256xf32>,
    } else {
    }
    return
  }
  func.func @transform_0(%arg0: i32, %arg1: i32, %arg2: i32) -> i32 {
    %c0_i32 = arith.constant 0 : i32
    %c0_i32_0 = arith.constant 0 : i32
    return %c0_i32 : i32
  }
  func.func @transform_1(%arg0: i32, %arg1: i32, %arg2: i32) -> i32 {
    %c0_i32 = arith.constant 0 : i32
    %c0_i32_0 = arith.constant 0 : i32
    return %c0_i32 : i32
  }
  func.func @transform_2(%arg0: i32, %arg1: i32, %arg2: i32) -> (i32, i32) {
    %c0_i32 = arith.constant 0 : i32
    %c0_i32_0 = arith.constant 0 : i32
    %c0_i32_1 = arith.constant 0 : i32
    return %c0_i32, %c0_i32_0 : i32, i32
  }
  func.func @transform_3(%arg0: i32, %arg1: i32, %arg2: i32) -> (i32, i32) {
    %c0_i32 = arith.constant 0 : i32
    %c0_i32_0 = arith.constant 0 : i32
    %c0_i32_1 = arith.constant 0 : i32
    return %c0_i32, %c0_i32_0 : i32, i32
  }
  func.func @transform_4(%arg0: i32, %arg1: i32, %arg2: i32) -> (i32, i32, i32) {
    %c0_i32 = arith.constant 0 : i32
    %c0_i32_0 = arith.constant 0 : i32
    return %arg0, %arg2, %c0_i32 : i32, i32, i32
  }
  func.func @transform_5(%arg0: i32, %arg1: i32, %arg2: i32) -> (i32, i32, i32) {
    %0 = arith.muli %arg2, %arg1 : i32
    %c0_i32 = arith.constant 0 : i32
    %c0_i32_0 = arith.constant 0 : i32
    return %arg0, %0, %c0_i32 : i32, i32, i32
  }
}

</mosaic_0001>

<bundles_post_ra>
// kernel: tpu_custom_call.1
= control target key start
LH: loop header
LB: loop body
LE: loop exit
PB: predicated region body
PF: predicated region fallthrough
CT: control target
= control target key end

     0   :  { %s2669_s0 = inlined_call_operand.vmem [shape: f32[98], index: 0, kind: input, shape index: {}]   ;;  %s2670_s1 = inlined_call_operand.<no memory space> [shape: f32[1], index: 1, kind: input, shape index: {}]   ;;  %s2671_s2 = inlined_call_operand.hbm [shape: f32[7,256], index: 2, kind: input, shape index: {}]   ;;  %s2672_s3 = inlined_call_operand.hbm [shape: f32[7,256], index: 3, kind: input, shape index: {}]   ;;  %s2673_s4 = inlined_call_operand.hbm [shape: f32[2,4,256], index: 4, kind: input, shape index: {}]   ;;  %s2674_s5 = inlined_call_operand.hbm [shape: f32[2,4,256], index: 5, kind: output, shape index: {}]  }
   0x1   :  { %2708 = sst [smem:[#allocation57_spill]] %s2669_s0 }
   0x2   :  { %2709 = sst [smem:[#allocation58_spill]] %s2671_s2 }
   0x3   :  { %2710 = sst [smem:[#allocation59_spill]] %s2672_s3 }
   0x4   :  { %2711 = sst [smem:[#allocation60_spill]] %s2673_s4 }
   0x5   :  { %2712 = sst [smem:[#allocation61_spill]] %s2674_s5 }
   0x6   :  { %10 = sst [smem:[#allocation5]] %s2670_s1 }
   0x7   :  { %11 = vsyncpa [#allocation9], 0 }
   0x8   :  { %12 = vsyncpa [#allocation7], 0 }
   0x9   :  { %13 = vsyncpa [#allocation12], 0 }
   0xa   :  { %14 = vsyncpa [#allocation8], 0 }
   0xb   :  { %16 = vsyncpa [#allocation8 + $0x1], 0  ;;  %s1954_s20 = smov 0   ;;  %s1956_s21 = smov 0  }
   0xc   :  { %s1958_s22 = smov 0   ;;  %s1960_s23 = smov 0  }
   0xd   :  { %s1962_s24 = smov 0   ;;  %s1964_s25 = smov 0  }
   0xe   :  { %s1966_s26 = smov 0   ;;  %s1968_s1 = smov 0  }
   0xf LB: > { %2713 = sst [smem:[#allocation20_spill]] %s1874_s20  ;;  %s1995_s27 = sadd.s32 4294967295, %s1902_s1   ;;  %s1902_s1 = sphi %s1968_s1, %s22_s1   ;;  %s1898_s26 = sphi %s1966_s26, %s2808_s26   ;;  %s1894_s25 = sphi %s1964_s25, %s2807_s25   ;;  %s1890_s24 = sphi %s1962_s24, %s2806_s24   ;;  %s1886_s23 = sphi %s1960_s23, %s2805_s23   ;;  %s1882_s22 = sphi %s1958_s22, %s2804_s22   ;;  %s1878_s21 = sphi %s1956_s21, %s2803_s21   ;;  %s1874_s20 = sphi %s1954_s20, %s2802_s20  }
  0x10   : > { %2714 = sst [smem:[#allocation21_spill]] %s1878_s21  ;;  %s1438_s28 = sadd.s32 4294967294, %s1902_s1  }
  0x11   : > { %2715 = sst [smem:[#allocation22_spill]] %s1882_s22  ;;  %p147_p0 = scmp.ne.s32.totalorder %s1878_s21, %s1874_s20 }
  0x12   : > { %2716 = sst [smem:[#allocation23_spill]] %s1886_s23  ;;  %p148_p1 = scmp.eq.s32.totalorder %s1995_s27, 0 }
  0x13   : > { %2717 = sst [smem:[#allocation24_spill]] %s1890_s24  ;;  %p175_p2 = scmp.eq.s32.totalorder %s1995_s27, 3 }
  0x14   : > { %2718 = sst [smem:[#allocation25_spill]] %s1894_s25  ;;  %p181_p3 = scmp.eq.s32.totalorder %s1438_s28, 3 }
  0x15   : > { %2719 = sst [smem:[#allocation26_spill]] %s1898_s26  ;;  %p2004_p4 = por %p148_p1, %p147_p0 }
  0x16   : > { %2720 = sst [smem:[#allocation27_spill]] %s1902_s1  ;;  %p1439_p5 = scmp.ge.s32.totalorder %s1902_s1, 1 }
  0x17   : > { %p2009_p6 = por %p181_p3, %p147_p0  ;;  %p188_p7 = scmp.lt.s32.totalorder %s1902_s1, 5 }
  0x18   : > { %s2724_s2 = sld [smem:[#allocation58_spill]]  ;;  %s1904_s10 = smov [#allocation10]  }
  0x19   : > { %s2722_s30 = scalar_select %p2009_p6, 1, 0 }
  0x1a   : > { %p2017_p8 = pnand %p1439_p5, %p188_p7  ;;  %s215_s11 = sshll.u32 %s1904_s10, 4  ;;  %s216_s11 = int_to_ptr.vmem [resolvable:$true] %s215_s11 }
  0x1b   : > { %2723 = sst [smem:[#allocation28_spill]] %s2722_s30  ;;  %s1905_s15 = smov [#allocation6]  }
  0x1c   : > { %p1576_p9 = pneg %p2017_p8  ;;  %s2726_s0 = sld [smem:[#allocation57_spill]] }
  0x1d   : > { %s2727_s3 = sld [smem:[#allocation59_spill]]  ;;  %s1906_s19 = smov [#allocation11]  }
  0x1e   : > { %s213_s8 = sshll.u32 %s2724_s2, 4  ;;  %p1577_p10 = pnand %p1576_p9, %p148_p1  ;;  %s214_s8 = int_to_ptr.hbm [resolvable:$true] %s213_s8 }
  0x1f   : > { %s227_s28 = sshll.u32 %s1906_s19, 4  ;;  %s37_s6 = sadd.s32 1, %s1894_s25  ;;  %s228_s28 = int_to_ptr.vmem [resolvable:$true] %s227_s28 }
  0x20   : > { %1582 = dma.hbm_to_vmem [thread:$0]  (!%p1577_p10), %s214_s8, 256, %s216_s11, [#allocation7]  }
  0x21   : > { %p39_p11 = scmp.ge.s32.totalorder %s37_s6, 2  ;;  %s41_s7 = sadd.s32 1, %s1898_s26 }
  0x22   : > { %s200_s14 = sshll.u32 %s2726_s0, 4  ;;  %s134_s8 = sadd.s32 1, %s1882_s22  ;;  %s201_s14 = int_to_ptr.vmem [resolvable:$true] %s200_s14 }
  0x23   : > { %1579 = dma.vmem_to_smem (!%p1577_p10), %s201_s14, 16, %s1905_s15, [#allocation9]  }
  0x24   : > { %s225_s18 = sshll.u32 %s2727_s3, 4  ;;  %p141_p12 = scmp.ne.s32.totalorder %s1882_s22, %s1878_s21  ;;  %s226_s18 = int_to_ptr.hbm [resolvable:$true] %s225_s18 }
  0x25   : > { %1585 = dma.hbm_to_vmem [thread:$0]  (!%p1577_p10), %s226_s18, 256, %s228_s28, [#allocation12]  }
  0x26   : > { %s2810_s6 = smov (%p39_p11, %s37_s6), 0  ;;  %s2812_s7 = smov (!%p39_p11, %s41_s7), %s1898_s26 }
  0x27   : > { %2728 = sst [smem:[#allocation29_spill]] %s2810_s6  ;;  %p142_p13 = scmp.eq.s32.totalorder %s1902_s1, 0 }
  0x28   : > { %p2042_p0 = por %p175_p2, %p141_p12  ;;  %p43_p3 = scmp.ge.s32.totalorder %s2812_s7, 2 }
  0x29   : > { %p1597_p5 = scmp.lt.s32.totalorder %s1902_s1, 4  ;;  %p2047_p7 = por %p142_p13, %p141_p12 }
  0x2a   : > { %s2729_s10 = scalar_select %p2042_p0, 1, 0 }
  0x2b   : > { %s238_s12 = sand.u32 1, %s1902_s1   ;;  %s2814_s7 = smov (%p43_p3, %s2812_s7), 0 }
  0x2c   : > { %2730 = sst [smem:[#allocation30_spill]] %s2729_s10  ;;  %s240_s13 = sand.u32 1, %s1882_s22  }
  0x2d   : > { %2732 = sst [smem:[#allocation31_spill]] %s2814_s7  ;;  %s129_s14 = ssub.s32 %s1898_s26, %s2814_s7 }
  0x2e   : > { %s1444_s15 = sshll.u32 %s240_s13, 3  ;;  %p132_p9 = scmp.eq.s32.totalorder %s129_s14, 0 }
  0x2f   : > { %s1558_s16 = sshll.u32 %s1898_s26, 3  ;;  %s242_s17 = scalar_lea.vmem [#allocation13], %s1444_s15 }
  0x30   : > { %s253_s18 = sshll.u32 %s242_s17, 4  ;;  %s2734_s4 = sld [smem:[#allocation60_spill]]  ;;  %s254_s18 = int_to_ptr.vmem [resolvable:$true] %s253_s18 }
  0x31   : > { %s2059_s19 = scalar_select %p132_p9, %s1882_s22, %s134_s8  }
  0x32   : > { %p1587_p2 = pnand %p1597_p5, %p2047_p7  ;;  %s239_s6 = scalar_lea.sflag [#allocation7], %s238_s12 }
  0x33   : > { %2733 = sst [smem:[#allocation32_spill]] %s2059_s19 }
  0x34   : > { %262 = sbr.rel (%p2017_p8) target bundleno = 574 (0x23e), region = 40 }
  0x36   : > { %s249_s2 = scalar_lea.hbm %s2734_s4, %s1558_s16 }
  0x37   : > { %s251_s3 = sshll.u32 %s249_s2, 4  ;;  %s252_s3 = int_to_ptr.hbm [resolvable:$true] %s251_s3 }
  0x38   : > { %1589 = dma.hbm_to_vmem [thread:$0]  (!%p1587_p2), %s252_s3, 128, %s254_s18, %s239_s6  }
  0x39   : > { %1853 = dma.done.wait (%p148_p1), [#allocation9], 16  }
  0x3a   : > { %1855 = vsyncadd (%p148_p1), [#allocation9], 4294967280 }
  0x3b   : > { %1857 = dma.done.wait (%p148_p1), [#allocation7], 256  }
  0x3c   : > { %1859 = vsyncadd (%p148_p1), [#allocation7], 4294967040 }
  0x3d   : > { %1861 = dma.done.wait (%p148_p1), [#allocation12], 256  }
  0x3e   : > { %1863 = vsyncadd (%p148_p1), [#allocation12], 4294967040  ;;  %s279_s0 = sand.u32 1, %s1995_s27   ;;  %s2675_s2 = sand.u32 1, %s1878_s21  }
  0x3f   : > { %s2086_s3 = sshll.u32 %s2675_s2, 3  ;;  %s280_s9 = scalar_lea.sflag [#allocation7], %s279_s0 }
  0x40   : > { %2735 = sst [smem:[#allocation33_spill]] %s2086_s3  ;;  %s2676_s6 = scalar_lea.vmem [#allocation13], %s2086_s3 }
  0x41   : > { %1865 = dma.done.wait (%p2004_p4), %s280_s9, 128  }
  0x42   : > { %1867 = vsyncadd (%p2004_p4), %s280_s9, 4294967168 }
  0x43   : > { %289 = sfence }
  0x44   : > { %p1453_p1 = scmp.ne.s32.totalorder %s1886_s23, 0 }
  0x46   : > { %316 = sbr.rel (%p1453_p1) target bundleno = 529 (0x211), region = 60 }
  0x4b   : > { %v321_v0 = vlaneseq  ;;  %v328_v1 = vld [vmem:[%s2676_s6] sm:$0xff]  ;;  %v1907_v3 = vmov -inf   ;;  %vm335_vm1 = vcmask 1043456   ;;  %v1908_v17 = vmov 0.0   ;;  %s1909_s27 = smov 2   ;;  %s1910_s29 = smov 3  }
  0x4c   : > { %330 = vst [vmem:[#allocation1] ss:$2 sm:$0xff] %v328_v1  ;;  %vm375_vm2 = vcmask 1040384   ;;  %v457_v43 = vld [vmem:[#allocation10 + $0x3] ss:$8 sm:$0x3] }
  0x4d   : > { %vm2098_vm0 = vcmp.lt.s32.totalorder %v321_v0, 256  ;;  %s1911_s11 = smov 1   ;;  %v570_v50 = vld [vmem:[#allocation10 + $0x3] ss:$8 sm:$0x3]  ;;  %s1912_s12 = smov 127  }
  0x4e   : > { %325 = vst.msk [vmem:[#allocation2] ss:$2 sm:$0x3] %vm2098_vm0, %v1907_v3  ;;  %s1913_s13 = smov 126   ;;  %s1914_s14 = smov 125   ;;  %v2143_v56 = vand.u32 127, %v321_v0 }
  0x4f   : > { %327 = vst.msk [vmem:[#allocation2 + $0x1] ss:$2 sm:$0x3] %vm2098_vm0, %v1908_v17  ;;  %s2122_s15 = sld [smem:[#allocation6 + $0x9]] }
  0x50   : > { %623 = vst.msk [vmem:[#allocation3] sm:$0x3] %vm2098_vm0, %v1908_v17  ;;  %s2124_s16 = sld [smem:[#allocation6 + $0x2]]  ;;  %vm442_vm3 = vcmp.lt.s32.totalorder %v2143_v56, 1  ;;  %vm424_vm4 = vcmp.lt.s32.totalorder %v2143_v56, 2  ;;  %vm408_vm5 = vcmp.lt.s32.totalorder %v2143_v56, 3 }
  0x51   : > { %s2126_s17 = sld [smem:[#allocation6 + $0x7]]  ;;  %v446_v60 = vld [vmem:[#allocation10 + $0x2] ss:$8 sm:$0x3]  ;;  %vm466_vm6 = vcmp.lt.s32.totalorder %v2143_v56, 127  ;;  %vm502_vm7 = vcmp.lt.s32.totalorder %v2143_v56, 125 }
  0x52   : > { %s2128_s18 = sld [smem:[#allocation6 + $0x10]]  ;;  %vm484_vm8 = vcmp.lt.s32.totalorder %v2143_v56, 126  ;;  %vm703_vm9 = vcmp.lt.s32.totalorder %v2143_v56, 48  ;;  %vm795_vm10 = vcmp.lt.s32.totalorder %v2143_v56, 32  ;;  %vm888_vm11 = vcmp.lt.s32.totalorder %v2143_v56, 16 }
  0x53   : > { %v331_v4 = vld.sshfl [vmem:[#allocation1] sm:$0xff pattern:$0x75316420]  ;;  %v332_v5 = vld.sshfl [vmem:[#allocation1 + $0x8] sm:$0xff pattern:$0x75316420] }
  0x54   : > { %v336_v6 = vsel %vm335_vm1, %v331_v4, -inf  ;;  %v343_v7 = vsel %vm335_vm1, %v332_v5, -inf  ;;  %350 = vst [vmem:[#allocation1] ss:$2 sm:$0xff] %v328_v1  ;;  %s2130_s28 = sld [smem:[#allocation6 + $0x8]]  ;;  %vm1057_vm12 = vcmp.lt.s32.totalorder %v2143_v56, 112 }
  0x55   : > { %v337_v8 = vrot.slane %v336_v6, 4  ;;  %v344_v9 = vrot.slane %v343_v7, 4  ;;  %v371_v29 = vld [vmem:[#allocation2] ss:$2 sm:$0x3]  ;;  %s2132_s0 = sld [smem:[#allocation6]] }
  0x56   : > { %v385_v41 = vld [vmem:[#allocation2 + $0x1] ss:$2 sm:$0x3]  ;;  %s2134_s9 = sld [smem:[#allocation6 + $0x1]]  ;;  %vm1150_vm13 = vcmp.lt.s32.totalorder %v2143_v56, 96  ;;  %vm1243_vm14 = vcmp.lt.s32.totalorder %v2143_v56, 80 }
  0x57   : > { %v338_v10 = vmax.f32 %v336_v6, %v337_v8  ;;  %v345_v11 = vmax.f32 %v343_v7, %v344_v9  ;;  %s2151_s2 = sld [smem:[#allocation6 + $0x4]]  ;;  %v428_v6 = vld [vmem:[#allocation10 + $0x1] ss:$8 sm:$0x3] }
  0x58   : > { %s2154_s8 = sld [smem:[#allocation6 + $0x23]] }
  0x59   : > { %v339_v12 = vrot.slane %v338_v10, 2  ;;  %v346_v13 = vrot.slane %v345_v11, 2  ;;  %s2156_s6 = sld [smem:[#allocation6 + $0x12]] }
  0x5a   : > { %s2158_s4 = sld [smem:[#allocation6 + $0x24]] }
  0x5b   : > { %v340_v14 = vmax.f32 %v338_v10, %v339_v12  ;;  %v347_v15 = vmax.f32 %v345_v11, %v346_v13  ;;  %v351_v16 = vld.sshfl [vmem:[#allocation1] sm:$0xff pattern:$0x75316420]  ;;  %v352_v18 = vld.sshfl [vmem:[#allocation1 + $0x8] sm:$0xff pattern:$0x75316420] }
  0x5c   : > { %v355_v21 = vsel %vm335_vm1, %v351_v16, 0.0  ;;  %v362_v22 = vsel %vm335_vm1, %v352_v18, 0.0  ;;  %s2164_s7 = sld [smem:[#allocation6 + $0xc]]  ;;  %v411_v10 = vld [vmem:[#allocation10] ss:$8 sm:$0x3] }
  0x5d   : > { %v341_v19 = vrot.slane %v340_v14, 1  ;;  %v348_v20 = vrot.slane %v347_v15, 1  ;;  %v356_v23 = vrot.slane %v355_v21, 4  ;;  %v363_v24 = vrot.slane %v362_v22, 4  ;;  %s2166_s26 = sld [smem:[#allocation6 + $0xd]] }
  0x5e   : > { %s2168_s25 = sld [smem:[#allocation6 + $0x5]] }
  0x5f   : > { %v342_v25 = vmax.f32 %v340_v14, %v341_v19  ;;  %v349_v26 = vmax.f32 %v347_v15, %v348_v20  ;;  %v357_v27 = vadd.f32 %v356_v23, %v355_v21  ;;  %v364_v28 = vadd.f32 %v363_v24, %v362_v22  ;;  %s2171_s19 = sld [smem:[#allocation6 + $0x6]]  ;;  %v470_v22 = vld [vmem:[#allocation10 + $0x4] ss:$8 sm:$0x3] }
  0x60   : > { %s2173_s22 = sld [smem:[#allocation6 + $0x25]] }
  0x61   : > { %v374_v30 = vrot.slane %v349_v26, 7  ;;  %v358_v31 = vrot.slane %v357_v27, 2  ;;  %v365_v32 = vrot.slane %v364_v28, 2  ;;  %s2175_s30 = sld [smem:[#allocation6 + $0x38]] }
  0x62   : > { %s2179_s20 = sld [smem:[#allocation6 + $0x13]] }
  0x63   : > { %v376_v33 = vsel %vm375_vm2, %v342_v25, %v374_v30  ;;  %v359_v35 = vadd.f32 %v358_v31, %v357_v27  ;;  %v366_v36 = vadd.f32 %v365_v32, %v364_v28  ;;  %s2181_s1 = sld [smem:[#allocation6 + $0x31]]  ;;  %v506_v28 = vld [vmem:[#allocation10 + $0x6] ss:$8 sm:$0x3]  ;;  %v728_v32 = vstv %s2122_s15 }
  0x64   : > { %v378_v34 = vmax.f32 %v371_v29, %v376_v33  ;;  %s2183_s5 = sld [smem:[#allocation6 + $0x14]]  ;;  %v488_v30 = vld [vmem:[#allocation10 + $0x5] ss:$8 sm:$0x3]  ;;  %v636_v33 = vstv %s2124_s16 }
  0x65   : > { %v360_v37 = vrot.slane %v359_v35, 1  ;;  %v367_v38 = vrot.slane %v366_v36, 1  ;;  %2738 = sst [smem:[#allocation34_spill]] %s2171_s19 }
  0x66   : > { %383 = vst.msk [vmem:[#allocation2] ss:$2 sm:$0x3] %vm2098_vm0, %v378_v34  ;;  %s2185_s10 = sld [smem:[#allocation6 + $0x26]] }
  0x67   : > { %v361_v39 = vadd.f32 %v360_v37, %v359_v35  ;;  %v368_v40 = vadd.f32 %v367_v38, %v366_v36  ;;  %2739 = sst [smem:[#allocation35_spill]] %s2175_s30  ;;  %v718_v37 = vstv %s2126_s17 }
  0x68   : > { %2740 = sst [smem:[#allocation36_spill]] %s2179_s20 }
  0x69   : > { %v388_v42 = vrot.slane %v368_v40, 7  ;;  %2741 = sst [smem:[#allocation37_spill]] %s2181_s1 }
  0x6a   : > { %2742 = sst [smem:[#allocation38_spill]] %s2183_s5 }
  0x6b   : > { %v389_v44 = vsel %vm375_vm2, %v361_v39, %v388_v42  ;;  %s2187_s21 = sld [smem:[#allocation6 + $0x27]] }
  0x6c   : > { %v391_v46 = vadd.f32 %v389_v44, %v385_v41  ;;  %s2189_s24 = sld [smem:[#allocation6 + $0x39]]  ;;  %v821_v44 = vstv %s2128_s18 }
  0x6d   : > { %v396_v45 = vld [vmem:[#allocation2] ss:$2 sm:$0x3]  ;;  %s2191_s3 = sld [smem:[#allocation6 + $0x3a]] }
  0x6e   : > { %v398_v47 = vperm.slane %v396_v45, 0  ;;  %v458_v48 = vmul.f32 %v457_v43, %v396_v45  ;;  %392 = vst.msk [vmem:[#allocation2 + $0x1] ss:$2 sm:$0x3] %vm2098_vm0, %v391_v46  ;;  %v399_v49 = vperm.slane %v396_v45, 1  ;;  %s2193_s23 = sld [smem:[#allocation6 + $0x32]]  ;;  %v723_v46 = vstv %s2130_s28 }
  0x6f   : > { %s2195_s30 = sld [smem:[#allocation6 + $0x3b]] }
  0x70   : > { %460 = vst.msk [vmem:[#allocation4 + $0x3] ss:$8 sm:$0x3] %vm2098_vm0, %v458_v48  ;;  %420 = vrot.lane.b32.xlu1 %v398_v47, %s1909_s27  ;;  %402 = vrot.lane.b32.xlu0 %v398_v47, %s1910_s29  ;;  %s2197_s19 = sld [smem:[#allocation6 + $0x33]]  ;;  %v631_v48 = vstv %s2134_s9 }
  0x71   : > { %438 = vrot.lane.b32.xlu2 %v398_v47, %s1911_s11  ;;  %2743 = sst [smem:[#allocation39_spill]] %s2187_s21 }
  0x72   : > { %s2199_s20 = sld [smem:[#allocation6 + $0x34]] }
  0x73   : > { %2744 = sst [smem:[#allocation40_spill]] %s2191_s3 }
  0x74   : > { %2745 = sst [smem:[#allocation41_spill]] %s2193_s23 }
  0x75   : > { %v516_v51 = vld [vmem:[#allocation2 + $0x1] ss:$2 sm:$0x3]  ;;  %s2203_s5 = sld [smem:[#allocation6 + $0x3c]] }
  0x76   : > { %v571_v52 = vmul.f32 %v570_v50, %v516_v51  ;;  %v519_v53 = vperm.slane %v516_v51, 1  ;;  %v518_v54 = vperm.slane %v516_v51, 0  ;;  %2746 = sst [smem:[#allocation42_spill]] %s2197_s19 }
  0x77   : > { %s2205_s1 = sld [smem:[#allocation6 + $0x3f]]  ;;  %v732_v39 = vld [vmem:[#allocation4 + $0x3] ss:$8 sm:$0x3] }
  0x78   : > { %422 = vrot.lane.b32.xlu1 %v399_v49, %s1909_s27  ;;  %404 = vrot.lane.b32.xlu0 %v399_v49, %s1910_s29  ;;  %573 = vst.msk [vmem:[#allocation4 + $0x12] ss:$8 sm:$0x3] %vm2098_vm0, %v571_v52  ;;  %s2207_s21 = sld [smem:[#allocation6 + $0x35]] }
  0x79   : > { %440 = vrot.lane.b32.xlu2 %v399_v49, %s1911_s11  ;;  %s2211_s23 = sld [smem:[#allocation6 + $0x40]] }
  0x7a   : > { %s2213_s3 = sld [smem:[#allocation6 + $0x41]] }
  0x7b   : > { %s2215_s19 = sld [smem:[#allocation6 + $0x42]] }
  0x7c   : > { %s2321_s15 = sld [smem:[#allocation6 + $0x57]] }
  0x7d   : > { %2747 = sst [smem:[#allocation43_spill]] %s2205_s1 }
  0x7e   : > { %2748 = sst [smem:[#allocation44_spill]] %s2207_s21 }
  0x7f   : > { %2749 = sst [smem:[#allocation45_spill]] %s2211_s23 }
  0x80   : > { %464 = vrot.lane.b32.xlu1 %v399_v49, %s1912_s12  ;;  %462 = vrot.lane.b32.xlu0 %v398_v47, %s1912_s12  ;;  %2750 = sst [smem:[#allocation46_spill]] %s2213_s3 }
  0x81   : > { %480 = vrot.lane.b32.xlu2 %v398_v47, %s1913_s13  ;;  %2751 = sst [smem:[#allocation47_spill]] %s2215_s19 }
  0x82   : > { %s2221_s1 = sld [smem:[#allocation6 + $0x3d]] }
  0x83   : > { %s2227_s3 = sld [smem:[#allocation6 + $0x3e]] }
  0x84   : > { %s2231_s19 = sld [smem:[#allocation6 + $0x36]] }
  0x85   : > { %s2236_s23 = sld [smem:[#allocation6 + $0x43]] }
  0x86   : > { %s2240_s21 = sld [smem:[#allocation6 + $0x28]] }
  0x87   : > { %s2762_s16 = sld [smem:[#allocation35_spill]] }
  0x88   : > { %498 = vrot.lane.b32.xlu1 %v398_v47, %s1914_s14  ;;  %482 = vrot.lane.b32.xlu0 %v399_v49, %s1913_s13  ;;  %2752 = sst [smem:[#allocation48_spill]] %s2221_s1  ;;  %v626_v47 = vstv %s2132_s0 }
  0x89   : > { %500 = vrot.lane.b32.xlu2 %v399_v49, %s1914_s14  ;;  %2753 = sst [smem:[#allocation49_spill]] %s2227_s3  ;;  %v640_v49 = vld [vmem:[#allocation4 + $0x3] ss:$8 sm:$0x3] }
  0x8a   : > { %2754 = sst [smem:[#allocation50_spill]] %s2231_s19 }
  0x8b   : > { %s2233_s1 = sld [smem:[#allocation6 + $0x37]] }
  0x8c   : > { %2756 = sst [smem:[#allocation52_spill]] %s2236_s23 }
  0x8d   : > { %2757 = sst [smem:[#allocation53_spill]] %s2240_s21 }
  0x8e   : > { %s2244_s19 = sld [smem:[#allocation6 + $0x29]] }
  0x8f   : > { %s2250_s23 = sld [smem:[#allocation6 + $0x44]] }
  0x90   : > { %524 = vrot.lane.b32.xlu1 %v519_v53, %s1910_s29  ;;  %522 = vrot.lane.b32.xlu0 %v518_v54, %s1910_s29  ;;  %s2138_s29 = sld [smem:[#allocation6 + $0xe]] }
  0x91   : > { %538 = vrot.lane.b32.xlu2 %v518_v54, %s1909_s27  ;;  %2755 = sst [smem:[#allocation51_spill]] %s2233_s1 }
  0x92   : > { %s2248_s1 = sld [smem:[#allocation6 + $0x54]] }
  0x93   : > { %s2254_s21 = sld [smem:[#allocation6 + $0x45]] }
  0x94   : > { %2758 = sst [smem:[#allocation54_spill]] %s2244_s19 }
  0x95   : > { %2759 = sst [smem:[#allocation55_spill]] %s2250_s23 }
  0x96   : > { %s2257_s3 = sld [smem:[#allocation6 + $0x55]] }
  0x97   : > { %s2259_s19 = sld [smem:[#allocation6 + $0x56]] }
  0x98   : > { %554 = vrot.lane.b32.xlu1 %v518_v54, %s1911_s11  ;;  %540 = vrot.lane.b32.xlu0 %v519_v53, %s1909_s27  ;;  %s2136_s27 = sld [smem:[#allocation6 + $0xa]] }
  0x99   : > { %556 = vrot.lane.b32.xlu2 %v519_v53, %s1911_s11  ;;  %s2140_s11 = sld [smem:[#allocation6 + $0x3]] }
  0x9a   : > { %2760 = sst [smem:[#allocation56_spill]] %s2254_s21 }
  0x9b   : > { %s2263_s23 = sld [smem:[#allocation6 + $0x1c]] }
  0x9c   : > { %s2269_s21 = sld [smem:[#allocation6 + $0x1d]] }
  0x9d   : > { %s2763_s17 = sld [smem:[#allocation36_spill]] }
  0x9e   : > { %v733_v42 = vstv %s2136_s27  ;;  %s2324_s18 = sld [smem:[#allocation6 + $0x1e]] }
  0x9f   : > { %s2764_s28 = sld [smem:[#allocation37_spill]] }
  0xa0   : > { %577 = vrot.lane.b32.xlu1 %v519_v53, %s1912_s12  ;;  %575 = vrot.lane.b32.xlu0 %v518_v54, %s1912_s12  ;;  %s2145_s12 = sld [smem:[#allocation6 + $0xf]] }
  0xa1   : > { %591 = vrot.lane.b32.xlu2 %v518_v54, %s1913_s13  ;;  %s2765_s0 = sld [smem:[#allocation38_spill]] }
  0xa2   : > { %s2329_s9 = sld [smem:[#allocation6 + $0x58]] }
  0xa3   : > { %s2767_s27 = sld [smem:[#allocation39_spill]] }
  0xa8   : > { %607 = vrot.lane.b32.xlu1 %v518_v54, %s1914_s14  ;;  %593 = vrot.lane.b32.xlu0 %v519_v53, %s1913_s13  ;;  %s2147_s13 = sld [smem:[#allocation6 + $0xb]]  ;;  %v811_v54 = vstv %s2138_s29 }
  0xa9   : > { %609 = vrot.lane.b32.xlu2 %v519_v53, %s1914_s14  ;;  %s2149_s14 = sld [smem:[#allocation6 + $0x11]]  ;;  %v641_v53 = vstv %s2140_s11 }
  0xaa   : > { %s2335_s29 = sld [smem:[#allocation6 + $0x1f]] }
  0xab   : > { %s2339_s11 = sld [smem:[#allocation6 + $0x20]] }
  0xb1   : > { %2768 = sst [smem:[#allocation35_spill]] %s2339_s11 }
  0xb2   : > { %s2771_s11 = sld [smem:[#allocation42_spill]] }
  0xcb   : > { %v439_v55 = vpop.permute.xlu2 %438 }
  0xd3   : > { %v441_v57 = vpop.permute.xlu2 %440 }
  0xd4   : > { %v443_v58 = vsel %vm442_vm3, %v439_v55, %v441_v57  ;;  %v444_v59 = vsel %vm442_vm3, %v441_v57, %v439_v55  ;;  %v825_v55 = vld [vmem:[#allocation4 + $0x3] ss:$8 sm:$0x3] }
  0xd5   : > { %v449_v61 = vrot.slane %v443_v58, 7 }
  0xd7   : > { %v450_v62 = vsel %vm375_vm2, %v444_v59, %v449_v61 }
  0xd8   : > { %v452_v63 = vmul.f32 %v450_v62, %v446_v60  ;;  %v2293_v62 = vmul.f32 %v733_v42, %v732_v39  ;;  %v836_v42 = vstv %s2763_s17  ;;  %s2778_s17 = sld [smem:[#allocation49_spill]] }
  0xda   : > { %454 = vst.msk [vmem:[#allocation4 + $0x2] ss:$8 sm:$0x3] %vm2098_vm0, %v452_v63  ;;  %v826_v63 = vstv %s2149_s14  ;;  %s2770_s14 = sld [smem:[#allocation41_spill]] }
  0xdb   : > { %v2201_v3 = vpop.permute.xlu2 %480 }
  0xe1   : > { %v727_v38 = vld [vmem:[#allocation4 + $0x2] ss:$8 sm:$0x3] }
  0xe2   : > { %v421_v0 = vpop.permute.xlu1 %420  ;;  %v403_v1 = vpop.permute.xlu0 %402  ;;  %v635_v43 = vld [vmem:[#allocation4 + $0x2] ss:$8 sm:$0x3] }
  0xe3   : > { %v501_v18 = vpop.permute.xlu2 %500  ;;  %v820_v50 = vld [vmem:[#allocation4 + $0x2] ss:$8 sm:$0x3] }
  0xe4   : > { %v1082_v57 = vld [vmem:[#allocation4 + $0x2] ss:$8 sm:$0x3] }
  0xea   : > { %v423_v4 = vpop.permute.xlu1 %422  ;;  %v405_v5 = vpop.permute.xlu0 %404 }
  0xeb   : > { %v425_v7 = vsel %vm424_vm4, %v421_v0, %v423_v4  ;;  %v409_v8 = vsel %vm408_vm5, %v403_v1, %v405_v5  ;;  %v426_v12 = vsel %vm424_vm4, %v423_v4, %v421_v0  ;;  %v410_v13 = vsel %vm408_vm5, %v405_v5, %v403_v1  ;;  %v2267_v27 = vpop.permute.xlu2 %538 }
  0xec   : > { %v431_v9 = vrot.slane %v425_v7, 7  ;;  %v414_v11 = vrot.slane %v409_v8, 7  ;;  %v2296_v0 = vmul.f32 %v728_v32, %v727_v38  ;;  %v2298_v4 = vmul.f32 %v636_v33, %v635_v43 }
  0xed   : > { %v816_v5 = vstv %s2145_s12  ;;  %v738_v7 = vstv %s2147_s13  ;;  %v2305_v8 = vmul.f32 %v641_v53, %v640_v49  ;;  %v1088_v38 = vstv %s2185_s10  ;;  %s2769_s12 = sld [smem:[#allocation40_spill]] }
  0xee   : > { %v432_v14 = vsel %vm375_vm2, %v426_v12, %v431_v9  ;;  %v415_v15 = vsel %vm375_vm2, %v410_v13, %v414_v11  ;;  %v1073_v11 = vstv %s2154_s8  ;;  %v1093_v49 = vstv %s2767_s27  ;;  %s2351_s10 = sld [smem:[#allocation6 + $0x59]] }
  0xef   : > { %v434_v16 = vmul.f32 %v432_v14, %v428_v6  ;;  %v417_v17 = vmul.f32 %v415_v15, %v411_v10  ;;  %v1083_v6 = vstv %s2173_s22  ;;  %v2307_v10 = vmul.f32 %v821_v44, %v820_v50  ;;  %s2761_s22 = sld [smem:[#allocation34_spill]] }
  0xf0   : > { %v646_v14 = vstv %s2151_s2  ;;  %2766 = sst [smem:[#allocation34_spill]] %s2329_s9  ;;  %v661_v44 = vstv %s2764_s28  ;;  %v985_v50 = vstv %s2269_s21 }
  0xf1   : > { %436 = vst.msk [vmem:[#allocation4 + $0x1] ss:$8 sm:$0x3] %vm2098_vm0, %v434_v16  ;;  %v2313_v16 = vmul.f32 %v826_v63, %v825_v55  ;;  %s2344_s9 = sld [smem:[#allocation6 + $0x21]]  ;;  %v758_v55 = vstv %s2189_s24 }
  0xf2   : > { %418 = vst.msk [vmem:[#allocation4] ss:$8 sm:$0x3] %vm2098_vm0, %v417_v17  ;;  %v465_v19 = vpop.permute.xlu1 %464  ;;  %v463_v20 = vpop.permute.xlu0 %462  ;;  %v831_v17 = vstv %s2156_s6  ;;  %s2774_s2 = sld [smem:[#allocation45_spill]] }
  0xf3   : > { %v468_v21 = vsel %vm466_vm6, %v465_v19, %v463_v20  ;;  %v467_v24 = vsel %vm466_vm6, %v463_v20, %v465_v19  ;;  %s2776_s6 = sld [smem:[#allocation47_spill]] }
  0xf4   : > { %v473_v23 = vrot.slane %v468_v21, 7  ;;  %s2777_s8 = sld [smem:[#allocation48_spill]] }
  0xf5   : > { %s2421_s13 = sld [smem:[#allocation6 + $0x2a]] }
  0xf6   : > { %v474_v25 = vsel %vm375_vm2, %v467_v24, %v473_v23  ;;  %v528_v23 = vld [vmem:[#allocation10] ss:$8 sm:$0x3]  ;;  %s2438_s28 = sld [smem:[#allocation6 + $0x2c]] }
  0xf7   : > { %v476_v26 = vmul.f32 %v474_v25, %v470_v22  ;;  %v2319_v22 = vmul.f32 %v1083_v6, %v1082_v57  ;;  %v557_v25 = vpop.permute.xlu2 %556  ;;  %v763_v57 = vstv %s2769_s12  ;;  %s2466_s24 = sld [smem:[#allocation6 + $0x4e]] }
  0xf8   : > { %v722_v61 = vld [vmem:[#allocation4 + $0x1] ss:$8 sm:$0x3]  ;;  %s2783_s27 = sld [smem:[#allocation52_spill]] }
  0xf9   : > { %478 = vst.msk [vmem:[#allocation4 + $0x4] ss:$8 sm:$0x3] %vm2098_vm0, %v476_v26  ;;  %v717_v60 = vld [vmem:[#allocation4] ss:$8 sm:$0x3]  ;;  %v724_v21 = vmul.f32 %v723_v46, %v722_v61  ;;  %v743_v26 = vstv %s2164_s7  ;;  %v980_v46 = vstv %s2263_s23 }
  0xfa   : > { %v499_v29 = vpop.permute.xlu1 %498  ;;  %v483_v31 = vpop.permute.xlu0 %482  ;;  %v625_v1 = vld [vmem:[#allocation4] ss:$8 sm:$0x3]  ;;  %v815_v15 = vld [vmem:[#allocation4 + $0x1] ss:$8 sm:$0x3]  ;;  %v719_v20 = vmul.f32 %v718_v37, %v717_v60  ;;  %v666_v60 = vstv %s2770_s14 }
  0xfb   : > { %v503_v34 = vsel %vm502_vm7, %v499_v29, %v501_v18  ;;  %v504_v35 = vsel %vm502_vm7, %v501_v18, %v499_v29  ;;  %v486_v36 = vsel %vm484_vm8, %v483_v31, %v2201_v3  ;;  %v485_v45 = vsel %vm484_vm8, %v2201_v3, %v483_v31  ;;  %v630_v3 = vld [vmem:[#allocation4 + $0x1] ss:$8 sm:$0x3]  ;;  %v810_v9 = vld [vmem:[#allocation4] ss:$8 sm:$0x3] }
  0xfc   : > { %v509_v40 = vrot.slane %v504_v35, 7  ;;  %v491_v41 = vrot.slane %v486_v36, 7  ;;  %v1078_v18 = vstv %s2158_s4  ;;  %v632_v29 = vmul.f32 %v631_v48, %v630_v3  ;;  %v1087_v37 = vld [vmem:[#allocation4 + $0x3] ss:$8 sm:$0x3]  ;;  %s2773_s7 = sld [smem:[#allocation43_spill]] }
  0xfd   : > { %v748_v31 = vstv %s2166_s26  ;;  %v812_v32 = vmul.f32 %v811_v54, %v810_v9  ;;  %v817_v33 = vmul.f32 %v816_v5, %v815_v15  ;;  %v651_v35 = vstv %s2168_s25  ;;  %s2775_s25 = sld [smem:[#allocation46_spill]]  ;;  %s1915_s14 = smov 32  }
  0xfe   : > { %v510_v51 = vsel %vm375_vm2, %v503_v34, %v509_v40  ;;  %v492_v52 = vsel %vm375_vm2, %v485_v45, %v491_v41  ;;  %v656_v36 = vstv %s2761_s22  ;;  %v725_v40 = vadd.f32 %v724_v21, %v719_v20  ;;  %s2413_s4 = sld [smem:[#allocation6 + $0x22]] }
  0xff   : > { %v512_v58 = vmul.f32 %v510_v51, %v506_v28  ;;  %v494_v59 = vmul.f32 %v492_v52, %v488_v30  ;;  %v627_v28 = vmul.f32 %v626_v47, %v625_v1  ;;  %v753_v41 = vstv %s2762_s16  ;;  %v560_v51 = vld [vmem:[#allocation10 + $0x2] ss:$8 sm:$0x3]  ;;  %v544_v1 = vld [vmem:[#allocation10 + $0x1] ss:$8 sm:$0x3] }
 0x100   : > { %v841_v45 = vstv %s2765_s0  ;;  %v818_v47 = vadd.f32 %v817_v33, %v812_v32  ;;  %v2348_v48 = vmul.f32 %v1088_v38, %v1087_v37  ;;  %v737_v54 = vld [vmem:[#allocation4 + $0x4] ss:$8 sm:$0x3]  ;;  %v730_v5 = vadd.f32 %v2296_v0, %v725_v40  ;;  %v1072_v38 = vld [vmem:[#allocation4] ss:$8 sm:$0x3] }
 0x101   : > { %514 = vst.msk [vmem:[#allocation4 + $0x6] ss:$8 sm:$0x3] %vm2098_vm0, %v512_v58  ;;  %v633_v43 = vadd.f32 %v632_v29, %v627_v28  ;;  %v767_v58 = vld [vmem:[#allocation4 + $0x12] ss:$8 sm:$0x3]  ;;  %v671_v15 = vstv %s2771_s11  ;;  %v739_v21 = vmul.f32 %v738_v7, %v737_v54  ;;  %v2378_v29 = vpop.permute.xlu2 %591  ;;  %v676_v32 = vstv %s2199_s20 }
 0x102   : > { %496 = vst.msk [vmem:[#allocation4 + $0x5] ss:$8 sm:$0x3] %vm2098_vm0, %v494_v59  ;;  %v525_v12 = vpop.permute.xlu1 %524  ;;  %v523_v13 = vpop.permute.xlu0 %522  ;;  %v768_v59 = vstv %s2195_s30  ;;  %v645_v6 = vld [vmem:[#allocation4 + $0x4] ss:$8 sm:$0x3]  ;;  %v735_v37 = vadd.f32 %v2293_v62, %v730_v5 }
 0x103   : > { %v526_v19 = vsel %vm408_vm5, %v523_v13, %v525_v12  ;;  %v527_v30 = vsel %vm408_vm5, %v525_v12, %v523_v13  ;;  %v638_v13 = vadd.f32 %v2298_v4, %v633_v43  ;;  %s2772_s30 = sld [smem:[#allocation44_spill]] }
 0x104   : > { %v531_v24 = vrot.slane %v526_v19, 7  ;;  %v830_v19 = vld [vmem:[#allocation4 + $0x4] ss:$8 sm:$0x3]  ;;  %s2392_s20 = sld [smem:[#allocation6 + $0x5a]]  ;;  %v740_v62 = vadd.f32 %v739_v21, %v735_v37  ;;  %v856_v21 = vstv %s2775_s25  ;;  %v778_v37 = vstv %s2777_s8 }
 0x105   : > { %s2780_s26 = sld [smem:[#allocation53_spill]] }
 0x106   : > { %v532_v34 = vsel %vm375_vm2, %v527_v30, %v531_v24  ;;  %v2373_v24 = vmul.f32 %v768_v59, %v767_v58  ;;  %v675_v30 = vld [vmem:[#allocation4 + $0x12] ss:$8 sm:$0x3]  ;;  %s2433_s22 = sld [smem:[#allocation6 + $0x2b]] }
 0x107   : > { %v534_v39 = vmul.f32 %v532_v34, %v528_v23  ;;  %s2781_s16 = sld [smem:[#allocation51_spill]] }
 0x108   : > { %v747_v43 = vld [vmem:[#allocation4 + $0x6] ss:$8 sm:$0x3]  ;;  %s2782_s0 = sld [smem:[#allocation54_spill]] }
 0x109   : > { %536 = vst.msk [vmem:[#allocation4 + $0x7] ss:$8 sm:$0x3] %vm2098_vm0, %v534_v39  ;;  %v742_v23 = vld [vmem:[#allocation4 + $0x5] ss:$8 sm:$0x3]  ;;  %v681_v59 = vstv %s2772_s30 }
 0x10a   : > { %v555_v52 = vpop.permute.xlu1 %554  ;;  %v541_v53 = vpop.permute.xlu0 %540  ;;  %v650_v0 = vld [vmem:[#allocation4 + $0x5] ss:$8 sm:$0x3]  ;;  %v1077_v39 = vld [vmem:[#allocation4 + $0x1] ss:$8 sm:$0x3]  ;;  %v744_v40 = vmul.f32 %v743_v26, %v742_v23 }
 0x10b   : > { %v558_v61 = vsel %vm442_vm3, %v555_v52, %v557_v25  ;;  %v559_v63 = vsel %vm442_vm3, %v557_v25, %v555_v52  ;;  %v542_v3 = vsel %vm424_vm4, %v2267_v27, %v541_v53  ;;  %v543_v20 = vsel %vm424_vm4, %v541_v53, %v2267_v27  ;;  %v835_v7 = vld [vmem:[#allocation4 + $0x5] ss:$8 sm:$0x3]  ;;  %s2785_s12 = sld [smem:[#allocation56_spill]]  ;;  %s1916_s30 = smov 48  }
 0x10c   : > { %v563_v9 = vrot.slane %v558_v61, 7  ;;  %v547_v12 = vrot.slane %v542_v3, 7  ;;  %v823_v25 = vadd.f32 %v2307_v10, %v818_v47  ;;  %v647_v27 = vmul.f32 %v646_v14, %v645_v6  ;;  %v840_v61 = vld [vmem:[#allocation4 + $0x6] ss:$8 sm:$0x3]  ;;  %s2493_s21 = sld [smem:[#allocation6 + $0x50]] }
 0x10d   : > { %v832_v10 = vmul.f32 %v831_v17, %v830_v19  ;;  %v773_v47 = vstv %s2203_s5  ;;  %v643_v52 = vadd.f32 %v2305_v8, %v638_v13  ;;  %v652_v14 = vmul.f32 %v651_v35, %v650_v0  ;;  %v655_v17 = vld [vmem:[#allocation4 + $0x6] ss:$8 sm:$0x3]  ;;  %v581_v35 = vld [vmem:[#allocation10 + $0x4] ss:$8 sm:$0x3] }
 0x10e   : > { %v564_v28 = vsel %vm375_vm2, %v559_v63, %v563_v9  ;;  %v548_v4 = vsel %vm375_vm2, %v543_v20, %v547_v12  ;;  %v828_v26 = vadd.f32 %v2313_v16, %v823_v25  ;;  %v837_v53 = vmul.f32 %v836_v42, %v835_v7  ;;  %v1092_v25 = vld [vmem:[#allocation4 + $0x4] ss:$8 sm:$0x3]  ;;  %s2786_s23 = sld [smem:[#allocation35_spill]] }
 0x10f   : > { %v566_v33 = vmul.f32 %v564_v28, %v560_v51  ;;  %v550_v34 = vmul.f32 %v548_v4, %v544_v1  ;;  %v2396_v51 = vmul.f32 %v676_v32, %v675_v30  ;;  %v648_v58 = vadd.f32 %v647_v27, %v643_v52  ;;  %s2500_s5 = sld [smem:[#allocation6 + $0x51]] }
 0x110   : > { %v1074_v63 = vmul.f32 %v1073_v11, %v1072_v38  ;;  %v1079_v1 = vmul.f32 %v1078_v18, %v1077_v39  ;;  %v752_v42 = vld [vmem:[#allocation4 + $0x7] ss:$8 sm:$0x3]  ;;  %v833_v5 = vadd.f32 %v832_v10, %v828_v26  ;;  %v846_v6 = vstv %s2773_s7  ;;  %s2779_s7 = sld [smem:[#allocation50_spill]] }
 0x111   : > { %568 = vst.msk [vmem:[#allocation4 + $0x11] ss:$8 sm:$0x3] %vm2098_vm0, %v566_v33  ;;  %v660_v3 = vld [vmem:[#allocation4 + $0x7] ss:$8 sm:$0x3]  ;;  %v851_v9 = vstv %s2774_s2  ;;  %v745_v13 = vadd.f32 %v744_v40, %v740_v62  ;;  %v653_v19 = vadd.f32 %v652_v14, %v648_v58  ;;  %v749_v18 = vmul.f32 %v748_v31, %v747_v43  ;;  %v610_v33 = vpop.permute.xlu2 %609 }
 0x112   : > { %552 = vst.msk [vmem:[#allocation4 + $0x10] ss:$8 sm:$0x3] %vm2098_vm0, %v550_v34  ;;  %v578_v8 = vpop.permute.xlu1 %577  ;;  %v576_v54 = vpop.permute.xlu0 %575  ;;  %v845_v20 = vld [vmem:[#allocation4 + $0x7] ss:$8 sm:$0x3]  ;;  %v657_v23 = vmul.f32 %v656_v36, %v655_v17  ;;  %v838_v0 = vadd.f32 %v837_v53, %v833_v5  ;;  %v754_v4 = vmul.f32 %v753_v41, %v752_v42  ;;  %v662_v27 = vmul.f32 %v661_v44, %v660_v3 }
 0x113   : > { %v580_v16 = vsel %vm466_vm6, %v578_v8, %v576_v54  ;;  %v579_v11 = vsel %vm466_vm6, %v576_v54, %v578_v8  ;;  %v1080_v30 = vadd.f32 %v1079_v1, %v1074_v63  ;;  %s2428_s2 = sld [smem:[#allocation6 + $0x4d]]  ;;  %v842_v36 = vmul.f32 %v841_v45, %v840_v61  ;;  %v1097_v45 = vld [vmem:[#allocation4 + $0x5] ss:$8 sm:$0x3] }
 0x114   : > { %v584_v12 = vrot.slane %v580_v16, 7  ;;  %v847_v32 = vmul.f32 %v846_v6, %v845_v20  ;;  %v861_v7 = vstv %s2776_s6  ;;  %v750_v34 = vadd.f32 %v749_v18, %v745_v13  ;;  %v613_v43 = vld [vmem:[#allocation10 + $0x6] ss:$8 sm:$0x3]  ;;  %s2528_s11 = sld [smem:[#allocation6 + $0x2f]]  ;;  %s1917_s6 = smov 16  }
 0x115   : > { %v658_v10 = vadd.f32 %v657_v23, %v653_v19  ;;  %v1094_v41 = vmul.f32 %v1093_v49, %v1092_v25  ;;  %v783_v44 = vstv %s2778_s17  ;;  %v843_v39 = vadd.f32 %v842_v36, %v838_v0  ;;  %v597_v58 = vld [vmem:[#allocation10 + $0x5] ss:$8 sm:$0x3]  ;;  %v1102_v19 = vld [vmem:[#allocation4 + $0x6] ss:$8 sm:$0x3] }
 0x116   : > { %v585_v28 = vsel %vm375_vm2, %v579_v11, %v584_v12  ;;  %v686_v38 = vstv %s2779_s7  ;;  %v1098_v40 = vstv %s2780_s26  ;;  %v755_v62 = vadd.f32 %v754_v4, %v750_v34  ;;  %v1107_v11 = vld [vmem:[#allocation4 + $0x7] ss:$8 sm:$0x3]  ;;  %v979_v18 = vld [vmem:[#allocation4] ss:$8 sm:$0x3] }
 0x117   : > { %v587_v31 = vmul.f32 %v585_v28, %v581_v35  ;;  %v663_v26 = vadd.f32 %v662_v27, %v658_v10  ;;  %v691_v49 = vstv %s2781_s16  ;;  %v1085_v8 = vadd.f32 %v2319_v22, %v1080_v30  ;;  %v860_v22 = vld [vmem:[#allocation4 + $0x12] ss:$8 sm:$0x3]  ;;  %s2540_s25 = sld [smem:[#allocation6 + $0x5b]]  ;;  %s1918_s7 = smov 96  }
 0x118   : > { %v848_v63 = vadd.f32 %v847_v32, %v843_v39  ;;  %v1099_v5 = vmul.f32 %v1098_v40, %v1097_v45  ;;  %v1103_v20 = vstv %s2782_s0  ;;  %v762_v25 = vld [vmem:[#allocation4 + $0x11] ss:$8 sm:$0x3]  ;;  %v1108_v4 = vstv %s2248_s1  ;;  %s2784_s1 = sld [smem:[#allocation55_spill]]  ;;  %s1919_s26 = smov 112  }
 0x119   : > { %589 = vst.msk [vmem:[#allocation4 + $0x13] ss:$8 sm:$0x3] %vm2098_vm0, %v587_v31  ;;  %v757_v17 = vld [vmem:[#allocation4 + $0x10] ss:$8 sm:$0x3]  ;;  %v1090_v28 = vadd.f32 %v2348_v48, %v1085_v8  ;;  %v862_v32 = vmul.f32 %v861_v7, %v860_v22  ;;  %v1104_v34 = vmul.f32 %v1103_v20, %v1102_v19  ;;  %v764_v48 = vmul.f32 %v763_v57, %v762_v25 }
 0x11a   : > { %v608_v52 = vpop.permute.xlu1 %607  ;;  %v594_v14 = vpop.permute.xlu0 %593  ;;  %v665_v53 = vld [vmem:[#allocation4 + $0x10] ss:$8 sm:$0x3]  ;;  %v759_v3 = vmul.f32 %v758_v55, %v757_v17  ;;  %v670_v55 = vld [vmem:[#allocation4 + $0x11] ss:$8 sm:$0x3]  ;;  %v1109_v39 = vmul.f32 %v1108_v4, %v1107_v11  ;;  %v1113_v40 = vstv %s2257_s3  ;;  %v866_v17 = vstv %s2783_s27 }
 0x11b   : > { %v611_v35 = vsel %vm502_vm7, %v608_v52, %v610_v33  ;;  %v612_v54 = vsel %vm502_vm7, %v610_v33, %v608_v52  ;;  %v596_v61 = vsel %vm484_vm8, %v594_v14, %v2378_v29  ;;  %v850_v1 = vld [vmem:[#allocation4 + $0x10] ss:$8 sm:$0x3]  ;;  %v595_v6 = vsel %vm484_vm8, %v2378_v29, %v594_v14  ;;  %v855_v30 = vld [vmem:[#allocation4 + $0x11] ss:$8 sm:$0x3] }
 0x11c   : > { %v616_v16 = vrot.slane %v612_v54, 7  ;;  %v600_v42 = vrot.slane %v596_v61, 7  ;;  %v667_v12 = vmul.f32 %v666_v60, %v665_v53  ;;  %v852_v13 = vmul.f32 %v851_v9, %v850_v1  ;;  %v984_v31 = vld [vmem:[#allocation4 + $0x1] ss:$8 sm:$0x3]  ;;  %s2485_s3 = sld [smem:[#allocation6 + $0x4f]] }
 0x11d   : > { %v760_v60 = vadd.f32 %v759_v3, %v755_v62  ;;  %v1095_v33 = vadd.f32 %v1094_v41, %v1090_v28  ;;  %v672_v10 = vmul.f32 %v671_v15, %v670_v55  ;;  %v1112_v45 = vld [vmem:[#allocation4 + $0x10] ss:$8 sm:$0x3]  ;;  %v857_v41 = vmul.f32 %v856_v21, %v855_v30  ;;  %v989_v54 = vld [vmem:[#allocation4 + $0x2] ss:$8 sm:$0x3] }
 0x11e   : > { %v617_v23 = vsel %vm375_vm2, %v611_v35, %v616_v16  ;;  %v601_v0 = vsel %vm375_vm2, %v595_v6, %v600_v42  ;;  %v668_v9 = vadd.f32 %v667_v12, %v663_v26  ;;  %v853_v36 = vadd.f32 %v852_v13, %v848_v63  ;;  %v1117_v35 = vld [vmem:[#allocation4 + $0x11] ss:$8 sm:$0x3]  ;;  %v1122_v3 = vld [vmem:[#allocation4 + $0x12] ss:$8 sm:$0x3] }
 0x11f   : > { %v619_v27 = vmul.f32 %v617_v23, %v613_v43  ;;  %v603_v29 = vmul.f32 %v601_v0, %v597_v58  ;;  %v1100_v43 = vadd.f32 %v1099_v5, %v1095_v33  ;;  %v981_v52 = vmul.f32 %v980_v46, %v979_v18  ;;  %v994_v5 = vld [vmem:[#allocation4 + $0x3] ss:$8 sm:$0x3]  ;;  %v999_v23 = vld [vmem:[#allocation4 + $0x4] ss:$8 sm:$0x3] }
 0x120   : > { %v772_v7 = vld [vmem:[#allocation4 + $0x13] ss:$8 sm:$0x3]  ;;  %v986_v14 = vmul.f32 %v985_v50, %v984_v31  ;;  %v765_v57 = vadd.f32 %v764_v48, %v760_v60  ;;  %v673_v15 = vadd.f32 %v672_v10, %v668_v9  ;;  %v1118_v26 = vstv %s2259_s19  ;;  %s2787_s19 = sld [smem:[#allocation34_spill]] }
 0x121   : > { %621 = vst.msk [vmem:[#allocation4 + $0x15] ss:$8 sm:$0x3] %vm2098_vm0, %v619_v27  ;;  %v680_v62 = vld [vmem:[#allocation4 + $0x13] ss:$8 sm:$0x3]  ;;  %v858_v53 = vadd.f32 %v857_v41, %v853_v36  ;;  %v1105_v8 = vadd.f32 %v1104_v34, %v1100_v43  ;;  %v1114_v21 = vmul.f32 %v1113_v40, %v1112_v45  ;;  %v990_v46 = vstv %s2324_s18 }
 0x122   : > { %605 = vst.msk [vmem:[#allocation4 + $0x14] ss:$8 sm:$0x3] %vm2098_vm0, %v603_v29  ;;  %v774_v58 = vmul.f32 %v773_v47, %v772_v7  ;;  %v865_v50 = vld [vmem:[#allocation4 + $0x13] ss:$8 sm:$0x3]  ;;  %v871_v61 = vstv %s2784_s1  ;;  %v876_v63 = vstv %s2785_s12  ;;  %v1123_v1 = vstv %s2321_s15 }
 0x123   : > { %v682_v16 = vmul.f32 %v681_v59, %v680_v62  ;;  %v1110_v42 = vadd.f32 %v1109_v39, %v1105_v8  ;;  %v987_v22 = vadd.f32 %v986_v14, %v981_v52  ;;  %v995_v6 = vstv %s2335_s29  ;;  %v1004_v4 = vld [vmem:[#allocation4 + $0x5] ss:$8 sm:$0x3]  ;;  %v1127_v34 = vld [vmem:[#allocation4 + $0x13] ss:$8 sm:$0x3] }
 0x124   : > { %v770_v12 = vadd.f32 %v2373_v24, %v765_v57  ;;  %v678_v13 = vadd.f32 %v2396_v51, %v673_v15  ;;  %v1119_v47 = vmul.f32 %v1118_v26, %v1117_v35  ;;  %v991_v19 = vmul.f32 %v990_v46, %v989_v54  ;;  %v1014_v7 = vld [vmem:[#allocation4 + $0x7] ss:$8 sm:$0x3]  ;;  %s2515_s15 = sld [smem:[#allocation6 + $0x52]] }
 0x125   : > { %v863_v11 = vadd.f32 %v862_v32, %v858_v53  ;;  %v867_v59 = vmul.f32 %v866_v17, %v865_v50  ;;  %v1115_v18 = vadd.f32 %v1114_v21, %v1110_v42  ;;  %v1000_v0 = vstv %s2786_s23  ;;  %s2520_s18 = sld [smem:[#allocation6 + $0x2d]] }
 0x126   : > { %v775_v25 = vadd.f32 %v774_v58, %v770_v12  ;;  %v1124_v24 = vmul.f32 %v1123_v1, %v1122_v3  ;;  %v992_v51 = vadd.f32 %v991_v19, %v987_v22  ;;  %v996_v28 = vmul.f32 %v995_v6, %v994_v5  ;;  %v1019_v58 = vld [vmem:[#allocation4 + $0x10] ss:$8 sm:$0x3]  ;;  %s2526_s29 = sld [smem:[#allocation6 + $0x2e]] }
 0x127   : > { %v683_v29 = vadd.f32 %v682_v16, %v678_v13  ;;  %v1128_v30 = vstv %s2787_s19  ;;  %v1005_v31 = vstv %s2344_s9  ;;  %v1001_v48 = vmul.f32 %v1000_v0, %v999_v23  ;;  %s2522_s9 = sld [smem:[#allocation6 + $0x53]]  ;;  %v1024_v22 = vld [vmem:[#allocation4 + $0x11] ss:$8 sm:$0x3] }
 0x128   : > { %v782_v20 = vld [vmem:[#allocation4 + $0x15] ss:$8 sm:$0x3]  ;;  %v1010_v10 = vstv %s2413_s4  ;;  %v1120_v40 = vadd.f32 %v1119_v47, %v1115_v18  ;;  %v1015_v41 = vstv %s2428_s2  ;;  %v997_v14 = vadd.f32 %v996_v28, %v992_v51  ;;  %v1165_v19 = vld [vmem:[#allocation4] ss:$8 sm:$0x3] }
 0x129   : > { %v777_v55 = vld [vmem:[#allocation4 + $0x14] ss:$8 sm:$0x3]  ;;  %v690_v9 = vld [vmem:[#allocation4 + $0x15] ss:$8 sm:$0x3]  ;;  %v784_v36 = vmul.f32 %v783_v44, %v782_v20  ;;  %v1006_v57 = vmul.f32 %v1005_v31, %v1004_v4  ;;  %v1129_v15 = vmul.f32 %v1128_v30, %v1127_v34  ;;  %v1133_v17 = vstv %s2351_s10 }
 0x12a   : > { %v779_v27 = vmul.f32 %v778_v37, %v777_v55  ;;  %v685_v60 = vld [vmem:[#allocation4 + $0x14] ss:$8 sm:$0x3]  ;;  %v1009_v37 = vld [vmem:[#allocation4 + $0x6] ss:$8 sm:$0x3]  ;;  %v692_v52 = vmul.f32 %v691_v49, %v690_v9  ;;  %v1002_v8 = vadd.f32 %v1001_v48, %v997_v14  ;;  %v1016_v35 = vmul.f32 %v1015_v41, %v1014_v7 }
 0x12b   : > { %v687_v32 = vmul.f32 %v686_v38, %v685_v60  ;;  %v870_v33 = vld [vmem:[#allocation4 + $0x14] ss:$8 sm:$0x3]  ;;  %v868_v38 = vadd.f32 %v867_v59, %v863_v11  ;;  %v875_v53 = vld [vmem:[#allocation4 + $0x15] ss:$8 sm:$0x3]  ;;  %v1011_v21 = vmul.f32 %v1010_v10, %v1009_v37  ;;  %v1125_v46 = vadd.f32 %v1124_v24, %v1120_v40 }
 0x12c   : > { %v780_v39 = vadd.f32 %v779_v27, %v775_v25  ;;  %v872_v45 = vmul.f32 %v871_v61, %v870_v33  ;;  %v1132_v62 = vld [vmem:[#allocation4 + $0x14] ss:$8 sm:$0x3]  ;;  %v1020_v50 = vstv %s2466_s24  ;;  %v1007_v42 = vadd.f32 %v1006_v57, %v1002_v8  ;;  %s2534_s10 = sld [smem:[#allocation6 + $0x30]] }
 0x12d   : > { %v688_v43 = vadd.f32 %v687_v32, %v683_v29  ;;  %v1134_v16 = vmul.f32 %v1133_v17, %v1132_v62  ;;  %v877_v3 = vmul.f32 %v876_v63, %v875_v53  ;;  %v1025_v5 = vstv %s2485_s3  ;;  %v1170_v20 = vld [vmem:[#allocation4 + $0x1] ss:$8 sm:$0x3]  ;;  %v1029_v59 = vld [vmem:[#allocation4 + $0x12] ss:$8 sm:$0x3] }
 0x12e   : > { %v2517_v44 = vadd.f32 %v784_v36, %v780_v39  ;;  %v873_v54 = vadd.f32 %v872_v45, %v868_v38  ;;  %v1130_v6 = vadd.f32 %v1129_v15, %v1125_v46  ;;  %v1138_v12 = vstv %s2392_s20  ;;  %v1034_v24 = vld [vmem:[#allocation4 + $0x13] ss:$8 sm:$0x3]  ;;  %s2543_s20 = sld [smem:[#allocation6 + $0x5c]] }
 0x12f   : > { %v693_v26 = vadd.f32 %v692_v52, %v688_v43  ;;  %v1012_v13 = vadd.f32 %v1011_v21, %v1007_v42  ;;  %v1021_v47 = vmul.f32 %v1020_v50, %v1019_v58  ;;  %v1030_v18 = vstv %s2493_s21  ;;  %v1175_v27 = vld [vmem:[#allocation4 + $0x2] ss:$8 sm:$0x3]  ;;  %v1180_v60 = vld [vmem:[#allocation4 + $0x3] ss:$8 sm:$0x3] }
 0x130   : > { %v787_v49 = vperm.slane %v2517_v44, 0  ;;  %v878_v11 = vadd.f32 %v877_v3, %v873_v54  ;;  %v788_v63 = vperm.slane %v2517_v44, 1  ;;  %v1166_v23 = vstv %s2421_s13  ;;  %v1137_v30 = vld [vmem:[#allocation4 + $0x15] ss:$8 sm:$0x3]  ;;  %s2552_s4 = sld [smem:[#allocation6 + $0x5d]] }
 0x131   : > { %v696_v61 = vperm.slane %v693_v26, 1  ;;  %v695_v1 = vperm.slane %v693_v26, 0  ;;  %v1135_v0 = vadd.f32 %v1134_v16, %v1130_v6  ;;  %v1017_v25 = vadd.f32 %v1016_v35, %v1012_v13  ;;  %v1039_v32 = vld [vmem:[#allocation4 + $0x14] ss:$8 sm:$0x3]  ;;  %s2555_s8 = sld [smem:[#allocation6 + $0x5e]] }
 0x132   : > { %791 = vrot.lane.b32.xlu2 %v787_v49, %s1915_s14  ;;  %v1026_v55 = vmul.f32 %v1025_v5, %v1024_v22  ;;  %v1035_v51 = vstv %s2500_s5  ;;  %v1167_v28 = vmul.f32 %v1166_v23, %v1165_v19  ;;  %v1171_v4 = vstv %s2433_s22  ;;  %v1185_v45 = vld [vmem:[#allocation4 + $0x4] ss:$8 sm:$0x3]  ;;  %v1190_v57 = vld [vmem:[#allocation4 + $0x5] ss:$8 sm:$0x3] }
 0x133   : > { %701 = vrot.lane.b32.xlu1 %v696_v61, %s1916_s30  ;;  %699 = vrot.lane.b32.xlu0 %v695_v1, %s1916_s30  ;;  %v1176_v29 = vstv %s2438_s28  ;;  %v1181_v9 = vstv %s2520_s18  ;;  %v1022_v31 = vadd.f32 %v1021_v47, %v1017_v25  ;;  %v1031_v36 = vmul.f32 %v1030_v18, %v1029_v59  ;;  %v1044_v26 = vld [vmem:[#allocation4 + $0x15] ss:$8 sm:$0x3]  ;;  %s2557_s13 = sld [smem:[#allocation6 + $0x5f]]  ;;  %s1920_s22 = smov 80  }
 0x134   : > { %v1040_v33 = vstv %s2515_s15  ;;  %v1172_v34 = vmul.f32 %v1171_v4, %v1170_v20  ;;  %v881_v48 = vperm.slane %v878_v11, 1  ;;  %v880_v10 = vperm.slane %v878_v11, 0  ;;  %v1195_v49 = vld [vmem:[#allocation4 + $0x6] ss:$8 sm:$0x3]  ;;  %s1549_s17 = sld [smem:[#allocation6 + $0x60]] }
 0x135   : > { %v1036_v39 = vmul.f32 %v1035_v51, %v1034_v24  ;;  %v1186_v40 = vstv %s2526_s29  ;;  %v1027_v37 = vadd.f32 %v1026_v55, %v1022_v31  ;;  %v1177_v41 = vmul.f32 %v1176_v29, %v1175_v27  ;;  %v1200_v46 = vld [vmem:[#allocation4 + $0x7] ss:$8 sm:$0x3]  ;;  %v1205_v42 = vld [vmem:[#allocation4 + $0x10] ss:$8 sm:$0x3] }
 0x136   : > { %v1173_v7 = vadd.f32 %v1172_v34, %v1167_v28  ;;  %v1182_v43 = vmul.f32 %v1181_v9, %v1180_v60  ;;  %v1139_v52 = vmul.f32 %v1138_v12, %v1137_v30  ;;  %v1041_v14 = vmul.f32 %v1040_v33, %v1039_v32  ;;  %s1550_s2 = sld [smem:[#allocation6 + $0x61]]  ;;  %v1210_v11 = vld [vmem:[#allocation4 + $0x11] ss:$8 sm:$0x3] }
 0x137   : > { %v1191_v44 = vstv %s2528_s11  ;;  %v1032_v38 = vadd.f32 %v1031_v36, %v1027_v37  ;;  %v1187_v62 = vmul.f32 %v1186_v40, %v1185_v45  ;;  %v1045_v53 = vstv %s2522_s9  ;;  %v1215_v59 = vld [vmem:[#allocation4 + $0x12] ss:$8 sm:$0x3]  ;;  %v1225_v28 = vld [vmem:[#allocation4 + $0x14] ss:$8 sm:$0x3] }
 0x138   : > { %v1178_v15 = vadd.f32 %v1177_v41, %v1173_v7  ;;  %v1140_v17 = vadd.f32 %v1139_v52, %v1135_v0  ;;  %v1192_v35 = vmul.f32 %v1191_v44, %v1190_v57  ;;  %v1196_v54 = vstv %s2534_s10  ;;  %v1220_v0 = vld [vmem:[#allocation4 + $0x13] ss:$8 sm:$0x3]  ;;  %v1230_v31 = vld [vmem:[#allocation4 + $0x15] ss:$8 sm:$0x3] }
 0x139   : > { %v1037_v8 = vadd.f32 %v1036_v39, %v1032_v38  ;;  %v1201_v58 = vstv %s2540_s25  ;;  %v1046_v61 = vmul.f32 %v1045_v53, %v1044_v26  ;;  %v1206_v3 = vstv %s2543_s20  ;;  %s1496_s16 = sld [smem:[#allocation6 + $0x16]]  ;;  %v908_v40 = vld [vmem:[#allocation4 + $0x1] ss:$8 sm:$0x3] }
 0x13a   : > { %886 = vrot.lane.b32.xlu2 %v881_v48, %s1917_s6  ;;  %v1183_v21 = vadd.f32 %v1182_v43, %v1178_v15  ;;  %v1142_v16 = vperm.slane %v1140_v17, 0  ;;  %v1197_v6 = vmul.f32 %v1196_v54, %v1195_v49  ;;  %v1202_v12 = vmul.f32 %v1201_v58, %v1200_v46  ;;  %s1495_s28 = sld [smem:[#allocation6 + $0x15]]  ;;  %v903_v7 = vld [vmem:[#allocation4] ss:$8 sm:$0x3] }
 0x13b   : > { %884 = vrot.lane.b32.xlu1 %v880_v10, %s1917_s6  ;;  %793 = vrot.lane.b32.xlu0 %v788_v63, %s1915_s14  ;;  %v1042_v50 = vadd.f32 %v1041_v14, %v1037_v8  ;;  %v1207_v20 = vmul.f32 %v1206_v3, %v1205_v42  ;;  %v1211_v63 = vstv %s2552_s4  ;;  %v1216_v18 = vstv %s2555_s8  ;;  %s1497_s0 = sld [smem:[#allocation6 + $0x17]]  ;;  %v913_v14 = vld [vmem:[#allocation4 + $0x2] ss:$8 sm:$0x3]  ;;  %v706_v3 = vld [vmem:[#allocation3] sm:$0x3] }
 0x13c   : > { %v1188_v1 = vadd.f32 %v1187_v62, %v1183_v21  ;;  %v1221_v25 = vstv %s2557_s13  ;;  %v1212_v24 = vmul.f32 %v1211_v63, %v1210_v11  ;;  %v1217_v51 = vmul.f32 %v1216_v18, %v1215_v59  ;;  %s1498_s24 = sld [smem:[#allocation6 + $0x18]]  ;;  %v918_v44 = vld [vmem:[#allocation4 + $0x3] ss:$8 sm:$0x3] }
 0x13d   : > { %v1047_v22 = vadd.f32 %v1046_v61, %v1042_v50  ;;  %v1226_v4 = vstv %s1549_s17  ;;  %v1222_v29 = vmul.f32 %v1221_v25, %v1220_v0  ;;  %v1143_v30 = vperm.slane %v1140_v17, 1  ;;  %s1499_s27 = sld [smem:[#allocation6 + $0x19]]  ;;  %v923_v17 = vld [vmem:[#allocation4 + $0x4] ss:$8 sm:$0x3] }
 0x13e   : > { %v1193_v5 = vadd.f32 %v1192_v35, %v1188_v1  ;;  %v1227_v9 = vmul.f32 %v1226_v4, %v1225_v28  ;;  %v1231_v36 = vstv %s1550_s2  ;;  %s1500_s1 = sld [smem:[#allocation6 + $0x1a]]  ;;  %v928_v21 = vld [vmem:[#allocation4 + $0x5] ss:$8 sm:$0x3] }
 0x13f   : > { %v1050_v13 = vperm.slane %v1047_v22, 1  ;;  %v1049_v47 = vperm.slane %v1047_v22, 0  ;;  %v1232_v34 = vmul.f32 %v1231_v36, %v1230_v31  ;;  %v909_v45 = vstv %s1496_s16  ;;  %s2565_s12 = sld [smem:[#allocation6 + $0x1b]]  ;;  %v707_v58 = vld [vmem:[#allocation11] ss:$8 sm:$0x3] }
 0x140   : > { %v1198_v19 = vadd.f32 %v1197_v6, %v1193_v5  ;;  %v904_v37 = vstv %s1495_s28  ;;  %v910_v41 = vmul.f32 %v909_v45, %v908_v40  ;;  %s2567_s3 = sld [smem:[#allocation6 + $0x46]]  ;;  %v933_v6 = vld [vmem:[#allocation4 + $0x6] ss:$8 sm:$0x3] }
 0x141   : > { %v905_v43 = vmul.f32 %v904_v37, %v903_v7  ;;  %v914_v52 = vstv %s1497_s0  ;;  %s2570_s21 = sld [smem:[#allocation6 + $0x47]]  ;;  %v943_v59 = vld [vmem:[#allocation4 + $0x10] ss:$8 sm:$0x3] }
 0x142   : > { %1146 = vrot.lane.b32.xlu2 %v1142_v16, %s1918_s7  ;;  %v1203_v23 = vadd.f32 %v1202_v12, %v1198_v19  ;;  %v919_v38 = vstv %s1498_s24  ;;  %v915_v15 = vmul.f32 %v914_v52, %v913_v14  ;;  %v938_v19 = vld [vmem:[#allocation4 + $0x7] ss:$8 sm:$0x3]  ;;  %s2575_s23 = sld [smem:[#allocation6 + $0x48]] }
 0x143   : > { %1055 = vrot.lane.b32.xlu1 %v1050_v13, %s1919_s26  ;;  %1053 = vrot.lane.b32.xlu0 %v1049_v47, %s1919_s26  ;;  %v911_v57 = vadd.f32 %v910_v41, %v905_v43  ;;  %v924_v62 = vstv %s1499_s27  ;;  %v920_v53 = vmul.f32 %v919_v38, %v918_v44  ;;  %s2579_s5 = sld [smem:[#allocation6 + $0x49]]  ;;  %v958_v37 = vld [vmem:[#allocation4 + $0x13] ss:$8 sm:$0x3] }
 0x144   : > { %v1208_v55 = vadd.f32 %v1207_v20, %v1203_v23  ;;  %v929_v8 = vstv %s1500_s1  ;;  %v925_v54 = vmul.f32 %v924_v62, %v923_v17  ;;  %s2583_s19 = sld [smem:[#allocation6 + $0x4a]]  ;;  %v963_v14 = vld [vmem:[#allocation4 + $0x14] ss:$8 sm:$0x3] }
 0x145   : > { %v916_v26 = vadd.f32 %v915_v15, %v911_v57  ;;  %v930_v1 = vmul.f32 %v929_v8, %v928_v21  ;;  %v934_v13 = vstv %s2565_s12  ;;  %s2585_s15 = sld [smem:[#allocation6 + $0x4b]]  ;;  %v893_v38 = vld [vmem:[#allocation11 + $0x2] ss:$8 sm:$0x3] }
 0x146   : > { %v1213_v27 = vadd.f32 %v1212_v24, %v1208_v55  ;;  %v939_v47 = vstv %s2567_s3  ;;  %v935_v23 = vmul.f32 %v934_v13, %v933_v6  ;;  %s1508_s18 = sld [smem:[#allocation6 + $0x4c]]  ;;  %v968_v21 = vld [vmem:[#allocation4 + $0x15] ss:$8 sm:$0x3] }
 0x147   : > { %v921_v61 = vadd.f32 %v920_v53, %v916_v26  ;;  %v944_v63 = vstv %s2570_s21  ;;  %v940_v0 = vmul.f32 %v939_v47, %v938_v19  ;;  %s1258_s9 = sld [smem:[#allocation5]] }
 0x148   : > { %v1218_v60 = vadd.f32 %v1217_v51, %v1213_v27  ;;  %v945_v51 = vmul.f32 %v944_v63, %v943_v59  ;;  %v800_v27 = vld [vmem:[#allocation11 + $0x1] ss:$8 sm:$0x3] }
 0x149   : > { %v926_v5 = vadd.f32 %v925_v54, %v921_v61 }
 0x14a   : > { %v1223_v32 = vadd.f32 %v1222_v29, %v1218_v60  ;;  %v959_v40 = vstv %s2583_s19 }
 0x14b   : > { %1148 = vrot.lane.b32.xlu0 %v1143_v30, %s1918_s7  ;;  %v931_v20 = vadd.f32 %v930_v1, %v926_v5  ;;  %v948_v30 = vld [vmem:[#allocation4 + $0x11] ss:$8 sm:$0x3]  ;;  %v964_v52 = vstv %s2585_s15  ;;  %v960_v57 = vmul.f32 %v959_v40, %v958_v37 }
 0x14c   : > { %v1228_v33 = vadd.f32 %v1227_v9, %v1223_v32  ;;  %v949_v9 = vstv %s2575_s23  ;;  %v965_v17 = vmul.f32 %v964_v52, %v963_v14  ;;  %v969_v8 = vstv %s1508_s18 }
 0x14d   : > { %v936_v24 = vadd.f32 %v935_v23, %v931_v20 }
 0x14e   : > { %v1233_v48 = vadd.f32 %v1232_v34, %v1228_v33  ;;  %v953_v34 = vld [vmem:[#allocation4 + $0x12] ss:$8 sm:$0x3] }
 0x14f   : > { %v941_v60 = vadd.f32 %v940_v0, %v936_v24 }
 0x150   : > { %v1236_v10 = vperm.slane %v1233_v48, 1  ;;  %v1235_v39 = vperm.slane %v1233_v48, 0  ;;  %v954_v48 = vstv %s2579_s5 }
 0x151   : > { %v946_v36 = vadd.f32 %v945_v51, %v941_v60  ;;  %v955_v43 = vmul.f32 %v954_v48, %v953_v34 }
 0x152   : > { %1241 = vrot.lane.b32.xlu2 %v1236_v10, %s1920_s22  ;;  %1239 = vrot.lane.b32.xlu1 %v1235_v39, %s1920_s22  ;;  %v950_v39 = vmul.f32 %v949_v9, %v948_v30  ;;  %v1248_v9 = vld [vmem:[#allocation11 + $0x6] ss:$8 sm:$0x3] }
 0x154   : > { %v951_v41 = vadd.f32 %v950_v39, %v946_v36 }
 0x156   : > { %v956_v62 = vadd.f32 %v955_v43, %v951_v41 }
 0x158   : > { %v961_v26 = vadd.f32 %v960_v57, %v956_v62 }
 0x18c   : > { %v792_v42 = vpop.permute.xlu2 %791 }
 0x194   : > { %v887_v31 = vpop.permute.xlu2 %886 }
 0x19c   : > { %v1147_v19 = vpop.permute.xlu2 %1146 }
 0x1a5   : > { %v702_v35 = vpop.permute.xlu1 %701  ;;  %v700_v49 = vpop.permute.xlu0 %699 }
 0x1a6   : > { %v704_v46 = vsel %vm703_vm9, %v700_v49, %v702_v35  ;;  %v705_v16 = vsel %vm703_vm9, %v702_v35, %v700_v49  ;;  %v966_v49 = vadd.f32 %v965_v17, %v961_v26 }
 0x1a7   : > { %v710_v50 = vrot.slane %v704_v46, 7  ;;  %v970_v46 = vmul.f32 %v969_v8, %v968_v21 }
 0x1a9   : > { %v711_v22 = vsel %vm375_vm2, %v705_v16, %v710_v50  ;;  %v974_v50 = vld [vmem:[#allocation11 + $0x3] ss:$8 sm:$0x3] }
 0x1aa   : > { %v713_v12 = vmul.f32 %v711_v22, %v707_v58  ;;  %v971_v58 = vadd.f32 %v970_v46, %v966_v49 }
 0x1ac   : > { %v714_v11 = vadd.f32 %v713_v12, %v706_v3  ;;  %v975_v16 = vmul.f32 %v974_v50, %v971_v58  ;;  %v1062_v12 = vld [vmem:[#allocation11 + $0x4] ss:$8 sm:$0x3]  ;;  %v1242_v24 = vpop.permute.xlu2 %1241 }
 0x1ad   : > { %v794_v18 = vpop.permute.xlu0 %793  ;;  %v885_v4 = vpop.permute.xlu1 %884 }
 0x1ae   : > { %715 = vst.msk [vmem:[#allocation3] sm:$0x3] %vm2098_vm0, %v714_v11  ;;  %v796_v25 = vsel %vm795_vm10, %v792_v42, %v794_v18  ;;  %v797_v28 = vsel %vm795_vm10, %v794_v18, %v792_v42  ;;  %v889_v32 = vsel %vm888_vm11, %v885_v4, %v887_v31  ;;  %v890_v44 = vsel %vm888_vm11, %v887_v31, %v885_v4 }
 0x1af   : > { %v803_v55 = vrot.slane %v796_v25, 7  ;;  %v896_v7 = vrot.slane %v889_v32, 7  ;;  %v1155_v25 = vld [vmem:[#allocation11 + $0x5] ss:$8 sm:$0x3]  ;;  %v1259_v32 = vstv %s1258_s9 }
 0x1b1   : > { %v804_v29 = vsel %vm375_vm2, %v797_v28, %v803_v55  ;;  %v897_v15 = vsel %vm375_vm2, %v890_v44, %v896_v7 }
 0x1b2   : > { %v806_v33 = vmul.f32 %v804_v29, %v800_v27  ;;  %v899_v53 = vmul.f32 %v897_v15, %v893_v38 }
 0x1b5   : > { %v798_v10 = vld [vmem:[#allocation3] sm:$0x3]  ;;  %v1056_v61 = vpop.permute.xlu1 %1055  ;;  %v1054_v1 = vpop.permute.xlu0 %1053 }
 0x1b6   : > { %v807_v45 = vadd.f32 %v806_v33, %v798_v10  ;;  %v1059_v42 = vsel %vm1057_vm12, %v1056_v61, %v1054_v1  ;;  %v1058_v6 = vsel %vm1057_vm12, %v1054_v1, %v1056_v61 }
 0x1b7   : > { %v1065_v5 = vrot.slane %v1059_v42, 7 }
 0x1b8   : > { %808 = vst.msk [vmem:[#allocation3] sm:$0x3] %vm2098_vm0, %v807_v45 }
 0x1b9   : > { %v1066_v13 = vsel %vm375_vm2, %v1058_v6, %v1065_v5 }
 0x1ba   : > { %v1068_v20 = vmul.f32 %v1066_v13, %v1062_v12 }
 0x1bd   : > { %v1149_v47 = vpop.permute.xlu0 %1148 }
 0x1be   : > { %v1152_v11 = vsel %vm1150_vm13, %v1149_v47, %v1147_v19  ;;  %v1151_v23 = vsel %vm1150_vm13, %v1147_v19, %v1149_v47 }
 0x1bf   : > { %v891_v35 = vld [vmem:[#allocation3] sm:$0x3]  ;;  %v1158_v18 = vrot.slane %v1152_v11, 7 }
 0x1c0   : > { %v900_v54 = vadd.f32 %v899_v53, %v891_v35 }
 0x1c1   : > { %v1159_v55 = vsel %vm375_vm2, %v1151_v23, %v1158_v18 }
 0x1c2   : > { %901 = vst.msk [vmem:[#allocation3] sm:$0x3] %vm2098_vm0, %v900_v54  ;;  %v1161_v28 = vmul.f32 %v1159_v55, %v1155_v25 }
 0x1c4   : > { %v1240_v0 = vpop.permute.xlu1 %1239 }
 0x1c5   : > { %v1245_v51 = vsel %vm1243_vm14, %v1242_v24, %v1240_v0  ;;  %v1244_v60 = vsel %vm1243_vm14, %v1240_v0, %v1242_v24 }
 0x1c6   : > { %v1251_v29 = vrot.slane %v1245_v51, 7 }
 0x1c8   : > { %v1252_v30 = vsel %vm375_vm2, %v1244_v60, %v1251_v29 }
 0x1c9   : > { %v972_v3 = vld [vmem:[#allocation3] sm:$0x3]  ;;  %v1254_v31 = vmul.f32 %v1252_v30, %v1248_v9 }
 0x1ca   : > { %v976_v22 = vadd.f32 %v975_v16, %v972_v3 }
 0x1cc   : > { %977 = vst.msk [vmem:[#allocation3] sm:$0x3] %vm2098_vm0, %v976_v22 }
 0x1d3   : > { %v1060_v63 = vld [vmem:[#allocation3] sm:$0x3] }
 0x1d4   : > { %v1069_v59 = vadd.f32 %v1068_v20, %v1060_v63 }
 0x1d6   : > { %1070 = vst.msk [vmem:[#allocation3] sm:$0x3] %vm2098_vm0, %v1069_v59 }
 0x1dd   : > { %v1153_v4 = vld [vmem:[#allocation3] sm:$0x3] }
 0x1de   : > { %v1162_v27 = vadd.f32 %v1161_v28, %v1153_v4 }
 0x1e0   : > { %1163 = vst.msk [vmem:[#allocation3] sm:$0x3] %vm2098_vm0, %v1162_v27 }
 0x1e7   : > { %v1246_v56 = vld [vmem:[#allocation3] sm:$0x3] }
 0x1e8   : > { %v1255_v36 = vadd.f32 %v1254_v31, %v1246_v56 }
 0x1ea   : > { %1256 = vst.msk [vmem:[#allocation3] sm:$0x3] %vm2098_vm0, %v1255_v36 }
 0x1f1   : > { %v1257_v33 = vld [vmem:[#allocation3] sm:$0x3] }
 0x1f2   : > { %v1260_v34 = vadd.f32 %v1259_v32, %v1257_v33 }
 0x1f4   : > { %v1551_v48 = vmul.f32 -1.442695, %v1260_v34 }
 0x1f6   : > { %1683 = vpow2.f32 %v1551_v48 }
 0x1fc   : > { %v1684_v10 = vpop.eup %1683 }
 0x1fd   : > { %v1264_v39 = vadd.f32 1.0, %v1684_v10 }
 0x1ff   : > { %1685 = vrcp.f32 %v1264_v39  ;;  %v1276_v7 = vand.u32 2147483648, %v1264_v39  ;;  %v1274_v43 = vand.u32 2147483647, %v1264_v39  ;;  %vm1270_vm1 = vweird.f32 %v1264_v39 }
 0x201   : > { %v1277_v14 = vor.u32 1.1754944e-38, %v1276_v7  ;;  %vm1275_vm3 = vcmp.eq.f32.partialorder %v1274_v43, 8.507059e+37 }
 0x205   : > { %v1686_v45 = vpop.eup %1685 }
 0x206   : > { %v1266_v40 = vmul.f32 %v1686_v45, %v1264_v39  ;;  %vm1271_vm15 = vweird.f32 %v1686_v45 }
 0x207   : > { %vm1272_vm2 = vmor %vm1270_vm1, %vm1271_vm15 }
 0x208   : > { %v1267_v37 = vsub.f32 1.0, %v1266_v40 }
 0x20a   : > { %v1268_v41 = vmul.f32 %v1686_v45, %v1267_v37 }
 0x20c   : > { %v1269_v52 = vadd.f32 %v1686_v45, %v1268_v41 }
 0x20e   : > { %v1273_v57 = vsel %vm1272_vm2, %v1686_v45, %v1269_v52 }
 0x20f   : > { %v1278_v44 = vsel %vm1275_vm3, %v1277_v14, %v1273_v57 }
 0x210   : > { %1280 = vst.msk [vmem:[#allocation3] sm:$0x3] %vm2098_vm0, %v1278_v44 }
 0x211 PF: > { %s2788_s29 = sld [smem:[#allocation23_spill]] }
 0x217   : > { %p1552_p4 = scmp.ne.s32.totalorder %s2788_s29, 1 }
 0x218   : > { %s2789_s11 = sld [smem:[#allocation33_spill]] (!%p1552_p4) }
 0x219   : > { %1284 = sbr.rel (%p1552_p4) target bundleno = 551 (0x227), region = 72 }
 0x21e   : > { %v1285_v38 = vld [vmem:[#allocation3] sm:$0x3]  ;;  %vm1291_vm4 = vcmask 1043456   ;;  %s2790_s14 = scalar_lea.vmem [#allocation13], %s2789_s11  ;;  %s2791_s10 = scalar_lea.vmem [#allocation14], %s2789_s11 }
 0x21f   : > { %v1288_v15 = vperm.slane %v1285_v38, 0  ;;  %v1289_v62 = vperm.slane %v1285_v38, 1  ;;  %v1286_v17 = vld [vmem:[%s2790_s14] sm:$0xff] }
 0x221   : > { %v1290_v26 = vrot.slane %v1289_v62, 4 }
 0x223   : > { %v1292_v53 = vsel %vm1291_vm4, %v1288_v15, %v1290_v26 }
 0x224   : > { %v1294_v8 = vmul.f32 %v1292_v53, %v1286_v17 }
 0x226   : > { %1295 = vst [vmem:[%s2791_s10] sm:$0xff] %v1294_v8 }
 0x227 PF: > { %s2792_s30 = sld [smem:[#allocation24_spill]] }
 0x228   : > { %s2793_s25 = sld [smem:[#allocation33_spill]] }
 0x229   : > { %s2794_s20 = sld [smem:[#allocation21_spill]] }
 0x22a   : > { %s2796_s17 = sld [smem:[#allocation61_spill]] }
 0x22d   : > { %s1559_s4 = sshll.u32 %s2792_s30, 3 }
 0x22e   : > { %s2797_s2 = scalar_lea.vmem [#allocation14], %s2793_s25 }
 0x22f   : > { %s1313_s26 = sshll.u32 %s2797_s2, 4  ;;  %s2798_s16 = sand.u32 1, %s2794_s20   ;;  %s1314_s26 = int_to_ptr.vmem [resolvable:$true] %s1313_s26 }
 0x230   : > { %s1311_s7 = scalar_lea.hbm %s2796_s17, %s1559_s4  ;;  %s1297_s28 = scalar_lea.sflag [#allocation8], %s2798_s16 }
 0x231   : > { %s1315_s22 = sshll.u32 %s1311_s7, 4  ;;  %s1812_s12 = scalar_lea.hbm %s2796_s17, 16  ;;  %s1316_s22 = int_to_ptr.hbm [resolvable:$true] %s1315_s22 }
 0x232   : > { %s1806_s0 = sshra.s32 %s1316_s22, 4  ;;  %s1807_s0 = int_to_ptr.hbm [resolvable:$true] %s1806_s0 }
 0x233   : > { %s1808_s24 = scalar_lea.hbm %s1807_s0, 8  ;;  %p1813_p12 = scmp.lt.s32.totalorder %s1807_s0, %s2796_s17 }
 0x234   : > { %p1809_p8 = scmp.ne.s32.totalorder %s1807_s0, %s1808_s24  ;;  %p1814_p13 = scmp.lt.s32.totalorder %s1812_s12, %s1808_s24 }
 0x236   : > { %p1810_p10 = pnand %p1809_p8, %p2042_p0  ;;  %p1815_p3 = por %p1814_p13, %p1813_p12 }
 0x238   : > { %p1811_p11 = pneg %p1810_p10 }
 0x23a   : > { %p1816_p5 = pnand %p1815_p3, %p1811_p11 }
 0x23c   : > { %1819 = shalt.err (!%p1816_p5)
}
 0x23d   : > { %1574 = dma.vmem_to_hbm [thread:$0]  (%p2042_p0), %s1314_s26, 128, %s1316_s22, %s1297_s28  }
 0x23e PF: > { %s2799_s23 = sld [smem:[#allocation27_spill]] }
 0x23f   : > { %s2800_s5 = sld [smem:[#allocation20_spill]] }
 0x244   : > { %p1601_p7 = scmp.ge.s32.totalorder %s2799_s23, 2 }
 0x245   : > { %s1327_s15 = sand.u32 1, %s2800_s5  }
 0x246   : > { %p1591_p9 = pnand %p1601_p7, %p2009_p6  ;;  %s1328_s18 = scalar_lea.sflag [#allocation8], %s1327_s15 }
 0x248   : > { %p1592_p2 = pneg %p1591_p9 }
 0x24a   : > { %1869 = dma.done.wait (%p1592_p2), %s1328_s18, 128  }
 0x24b   : > { %1871 = vsyncadd (%p1592_p2), %s1328_s18, 4294967168  ;;  %s22_s1 = sadd.s32 1, %s2799_s23   ;;  %s2802_s20 = sld [smem:[#allocation21_spill]] }
 0x24c   : > { %p19_p1 = scmp.ge.s32.totalorder %s22_s1, 6   ;;  %s2803_s21 = sld [smem:[#allocation22_spill]] }
 0x24d   : > { %s2804_s22 = sld [smem:[#allocation32_spill]] }
 0x24e   : > { %s2805_s23 = sld [smem:[#allocation25_spill]]  ;;  %21 = sbr.rel (!%p19_p1) target bundleno = 15 (0xf), region = 140 }
 0x24f   : > { %s2806_s24 = sld [smem:[#allocation26_spill]] }
 0x250   : > { %s2807_s25 = sld [smem:[#allocation29_spill]] }
 0x251   : > { %s2808_s26 = sld [smem:[#allocation31_spill]] }
 0x253   :  { %1334 = vsyncpa [#allocation7], 1 }
 0x254   :  { %1336 = vsyncpa [#allocation7 + $0x1], 1 }
 0x255   :  { %1337 = vsyncpa [#allocation12], 1 }
 0x256   :  { %1338 = vsyncpa [#allocation8], 1 }
 0x257   :  { %1340 = vsyncpa [#allocation8 + $0x1], 1 }
 0x258   :  { %1341 = vsyncpa [#allocation9], 1 }
 0x259   :  { %1343 = vsyncpa [#allocation9 + $0x1], 1 }

</bundles_post_ra>
